<compile_context>
chip_gen: v5e
topology: v5e:2x2
jax: 0.10.0
libtpu: 0.0.40
codegen_flags: <defaults>
</compile_context>

<pallas_src>
import functools

import jax
import jax.numpy as jnp
from jax.experimental import pallas as pl
from jax.experimental.pallas import tpu as pltpu


def bottleneck_kernel(x_ref, w1_ref, b1_ref, w2_ref, b2_ref, w3_ref, b3_ref,
                      o_ref, pad_ref, *, H, W):
    # x_ref  : (1, Cin, H*W)  f32   NCHW image, spatial flattened (lane-dense)
    # w1_ref : (P, Cin)       bf16  BN1 scale folded, transposed (CF matmul)
    # b1_ref : (P, 1)         f32
    # w2_ref : (9*P, P)       bf16  HWIO-flattened 3x3 weights, BN2 folded
    # b2_ref : (1, P)         f32
    # w3_ref : (C4, P)        bf16  BN3 scale folded, transposed
    # b3_ref : (C4, 1)        f32
    # o_ref  : (1, C4, H*W)   f32   NCHW output, spatial flattened
    # pad_ref: (H+2, W+2, P)  bf16  zero-padded h1 scratch for the 3x3 conv
    P = w1_ref.shape[0]
    HW = H * W

    x_cf = x_ref[0]                                            # (Cin, HW) f32

    # ---- conv1 (1x1) + bn1 + relu : channels-first MXU matmul ----
    h1_cf = jnp.dot(w1_ref[...], x_cf.astype(jnp.bfloat16),
                    preferred_element_type=jnp.float32)        # (P, HW) f32
    h1_cf = jnp.maximum(h1_cf + b1_ref[...], 0.0)

    # ---- conv2 (3x3, pad=1, stride=1) + bn2 + relu ----
    # Padded VMEM scratch: taps are static slices; one K=9P matmul.
    pad_ref[...] = jnp.zeros_like(pad_ref)
    h1_hwp = h1_cf.T.reshape(H, W, P)                          # small on-chip T
    pad_ref[1:H + 1, 1:W + 1, :] = h1_hwp.astype(jnp.bfloat16)
    cols = [pad_ref[dy:dy + H, dx:dx + W, :]
            for dy in range(3) for dx in range(3)]
    im2col = jnp.concatenate(cols, axis=-1).reshape(HW, 9 * P)  # (HW, 9P) bf16
    h2 = jnp.dot(im2col, w2_ref[...],
                 preferred_element_type=jnp.float32)           # (HW, P) f32
    h2 = jnp.maximum(h2 + b2_ref[...], 0.0)

    # ---- conv3 (1x1) + bn3 : channels-first so the result is NCHW already ----
    h2_cf = h2.T.astype(jnp.bfloat16)                          # (P, HW)
    h3_cf = jnp.dot(w3_ref[...], h2_cf,
                    preferred_element_type=jnp.float32)        # (C4, HW) f32

    # ---- residual add + relu, written directly in NCHW layout ----
    out = jnp.maximum(h3_cf + b3_ref[...] + x_cf, 0.0)
    o_ref[0] = out.astype(o_ref.dtype)


def bottleneck_forward(x_nchw, params):
    """x_nchw: (N, Cin, H, W) f32 with Cin == 4 * planes (identity residual)."""
    w1t, b1, w2f, b2, w3t, b3 = params
    N, Cin, H, W = x_nchw.shape
    P = w1t.shape[0]
    C4 = w3t.shape[0]
    assert Cin == C4, "identity residual requires inplanes == planes*expansion"
    HW = H * W

    x_flat = x_nchw.reshape(N, Cin, HW)        # free view; stays NCHW in HBM

    kernel = functools.partial(bottleneck_kernel, H=H, W=W)
    out_flat = pl.pallas_call(
        kernel,
        out_shape=jax.ShapeDtypeStruct((N, C4, HW), jnp.float32),
        grid_spec=pltpu.PrefetchScalarGridSpec(
            num_scalar_prefetch=0,
            grid=(N,),
            in_specs=[
                pl.BlockSpec((1, Cin, HW), lambda n: (n, 0, 0)),  # x (per image)
                pl.BlockSpec((P, Cin), lambda n: (0, 0)),         # w1 (resident)
                pl.BlockSpec((P, 1), lambda n: (0, 0)),           # b1
                pl.BlockSpec((9 * P, P), lambda n: (0, 0)),       # w2
                pl.BlockSpec((1, P), lambda n: (0, 0)),           # b2
                pl.BlockSpec((C4, P), lambda n: (0, 0)),          # w3
                pl.BlockSpec((C4, 1), lambda n: (0, 0)),          # b3
            ],
            out_specs=pl.BlockSpec((1, C4, HW), lambda n: (n, 0, 0)),
            scratch_shapes=[pltpu.VMEM((H + 2, W + 2, P), jnp.bfloat16)],
        ),
        compiler_params=pltpu.CompilerParams(
            dimension_semantics=("parallel",),   # batch axis -> 2 TCs on v7x
        ),
    )(x_flat, w1t, b1, w2f, b2, w3t, b3)

    return out_flat.reshape(N, C4, H, W)


# ---------------- pure-JAX reference (for correctness check) ----------------
def reference_forward(x_nchw, params):
    """Mirrors the kernel math: same BN-folded weights, same bf16 rounding of
    matmul operands, f32 accumulation and f32 pointwise math.  Differences vs.
    the kernel are only f32 accumulation-order effects (plus rare bf16
    re-rounding of intermediates), hence the modest tolerance in __main__."""
    w1t, b1, w2f, b2, w3t, b3 = params
    N, Cin, H, W = x_nchw.shape
    P = w1t.shape[0]
    x = jnp.transpose(x_nchw, (0, 2, 3, 1)).astype(jnp.float32)    # NHWC
    xb = x.astype(jnp.bfloat16).astype(jnp.float32)
    h1 = jnp.einsum('nhwc,pc->nhwp', xb, w1t.astype(jnp.float32),
                    precision='highest')
    h1 = jnp.maximum(h1 + b1[:, 0], 0.0)
    h1b = h1.astype(jnp.bfloat16).astype(jnp.float32)
    w2_hwio = w2f.astype(jnp.float32).reshape(3, 3, P, P)
    h2 = jax.lax.conv_general_dilated(
        h1b, w2_hwio, window_strides=(1, 1), padding=((1, 1), (1, 1)),
        dimension_numbers=('NHWC', 'HWIO', 'NHWC'), precision='highest')
    h2 = jnp.maximum(h2 + b2[0], 0.0)
    h2b = h2.astype(jnp.bfloat16).astype(jnp.float32)
    h3 = jnp.einsum('nhwp,qp->nhwq', h2b, w3t.astype(jnp.float32),
                    precision='highest')
    out = jnp.maximum(h3 + b3[:, 0] + x, 0.0)
    return jnp.transpose(out, (0, 3, 1, 2))


def make_params(key, inplanes, planes):
    expansion = 4
    c4 = planes * expansion
    ks = jax.random.split(key, 6)

    def bn_fold(k, c):
        kg, kb, km, kv = jax.random.split(k, 4)
        eps = 1e-5
        gamma = 0.5 + jax.random.uniform(kg, (c,), jnp.float32)
        beta = 0.1 * jax.random.normal(kb, (c,), jnp.float32)
        mean = 0.1 * jax.random.normal(km, (c,), jnp.float32)
        var = 0.5 + jax.random.uniform(kv, (c,), jnp.float32)
        scale = gamma / jnp.sqrt(var + eps)
        shift = beta - mean * scale
        return scale, shift

    w1 = 0.2 * jax.random.normal(ks[0], (planes, inplanes), jnp.float32)  # OI
    s1, sh1 = bn_fold(ks[1], planes)
    w2 = 0.2 * jax.random.normal(ks[2], (3, 3, planes, planes), jnp.float32)  # HWIO
    s2, sh2 = bn_fold(ks[3], planes)
    w3 = 0.2 * jax.random.normal(ks[4], (c4, planes), jnp.float32)        # OI
    s3, sh3 = bn_fold(ks[5], c4)

    # One-time BN-scale folding (exact in f32) + bf16 cast for the MXU.
    w1t = (w1 * s1[:, None]).astype(jnp.bfloat16)                   # (P, Cin)
    w2f = (w2 * s2[None, None, None, :]).astype(jnp.bfloat16).reshape(
        9 * planes, planes)                                          # (9P, P)
    w3t = (w3 * s3[:, None]).astype(jnp.bfloat16)                   # (C4, P)
    b1 = sh1[:, None].astype(jnp.float32)                            # (P, 1)
    b2 = sh2[None, :].astype(jnp.float32)                            # (1, P)
    b3 = sh3[:, None].astype(jnp.float32)                            # (C4, 1)
    return (w1t, b1, w2f, b2, w3t, b3)


if __name__ == "__main__":
    key = jax.random.PRNGKey(0)
    kx, kp = jax.random.split(key)

    planes = 32
    inplanes = planes * 4          # expansion=4, identity residual; C4=128 lanes
    N, H, W = 2, 16, 16

    x = jax.random.normal(kx, (N, inplanes, H, W), jnp.float32)      # NCHW
    params = make_params(kp, inplanes, planes)

    out = jax.block_until_ready(bottleneck_forward(x, params))
    ref = jax.block_until_ready(reference_forward(x, params))

    assert out.shape == (N, inplanes, H, W)
    # Tolerance covers f32 accumulation-order differences and the occasional
    # bf16 re-rounding flip of intermediate activations; algorithmic errors
    # would be orders of magnitude larger.
    assert jnp.allclose(out, ref, atol=2e-2, rtol=2e-2), \
        f"max abs err {float(jnp.max(jnp.abs(out - ref)))}"

    print("KERNEL_OK")
</pallas_src>

<mosaic_0001>
module attributes {stable_mosaic.version = 11 : i64} {
  func.func @bottleneck_kernel(%arg0: i32, %arg1: memref<1x128x256xf32, #tpu.memory_space<vmem>>, %arg2: memref<32x128xbf16, #tpu.memory_space<vmem>>, %arg3: memref<32x1xf32, #tpu.memory_space<vmem>>, %arg4: memref<288x32xbf16, #tpu.memory_space<vmem>>, %arg5: memref<1x32xf32, #tpu.memory_space<vmem>>, %arg6: memref<128x32xbf16, #tpu.memory_space<vmem>>, %arg7: memref<128x1xf32, #tpu.memory_space<vmem>>, %arg8: memref<1x128x256xf32, #tpu.memory_space<vmem>>, %arg9: memref<18x18x32xbf16, #tpu.memory_space<vmem>>) attributes {dimension_semantics = [#tpu.dimension_semantics<parallel>], iteration_bounds = array<i64: 2>, scalar_prefetch = 0 : i64, scratch_operands = 1 : i64, tpu.core_type = #tpu.core_type<tc>, window_params = [{transform_indices = @transform_0, window_bounds = array<i64: 1, 128, 256>}, {pipeline_mode = #tpu.pipeline_mode<synchronous>, transform_indices = @transform_1, window_bounds = array<i64: 32, 128>}, {pipeline_mode = #tpu.pipeline_mode<synchronous>, transform_indices = @transform_2, window_bounds = array<i64: 32, 1>}, {pipeline_mode = #tpu.pipeline_mode<synchronous>, transform_indices = @transform_3, window_bounds = array<i64: 288, 32>}, {pipeline_mode = #tpu.pipeline_mode<synchronous>, transform_indices = @transform_4, window_bounds = array<i64: 1, 32>}, {pipeline_mode = #tpu.pipeline_mode<synchronous>, transform_indices = @transform_5, window_bounds = array<i64: 128, 32>}, {pipeline_mode = #tpu.pipeline_mode<synchronous>, transform_indices = @transform_6, window_bounds = array<i64: 128, 1>}, {transform_indices = @transform_7, window_bounds = array<i64: 1, 128, 256>}]} {
    %c0 = arith.constant 0 : index
    %c0_0 = arith.constant 0 : index
    %c0_1 = arith.constant 0 : index
    %0 = vector.load %arg1[%c0, %c0_0, %c0_1] : memref<1x128x256xf32, #tpu.memory_space<vmem>>, vector<1x128x256xf32>
    %1 = vector.shape_cast %0 : vector<1x128x256xf32> to vector<128x256xf32>
    %c0_2 = arith.constant 0 : index
    %c0_3 = arith.constant 0 : index
    %2 = vector.load %arg2[%c0_2, %c0_3] : memref<32x128xbf16, #tpu.memory_space<vmem>>, vector<32x128xbf16>
    %3 = arith.truncf %1 : vector<128x256xf32> to vector<128x256xbf16>
    %cst = arith.constant dense<0.000000e+00> : vector<32x256xf32>
    %4 = tpu.matmul %2, %3, %cst {dimension_numbers = #tpu.dot_dimension_numbers<[1], [0], [0], [1], [0, 0, 1, 1], [], []>} : vector<32x128xbf16>, vector<128x256xbf16>, vector<32x256xf32> -> vector<32x256xf32>
    %c0_4 = arith.constant 0 : index
    %c0_5 = arith.constant 0 : index
    %5 = vector.load %arg3[%c0_4, %c0_5] : memref<32x1xf32, #tpu.memory_space<vmem>>, vector<32x1xf32>
    %6 = vector.broadcast %5 : vector<32x1xf32> to vector<32x256xf32>
    %7 = arith.addf %4, %6 : vector<32x256xf32>
    %cst_6 = arith.constant 0.000000e+00 : f32
    %8 = vector.broadcast %cst_6 : f32 to vector<32x256xf32>
    %9 = arith.maximumf %7, %8 : vector<32x256xf32>
    %cst_7 = arith.constant 0.000000e+00 : bf16
    %10 = vector.broadcast %cst_7 : bf16 to vector<18x18x32xbf16>
    %c0_8 = arith.constant 0 : index
    %c0_9 = arith.constant 0 : index
    %c0_10 = arith.constant 0 : index
    %11 = vector.load %arg9[%c0_8, %c0_9, %c0_10] : memref<18x18x32xbf16, #tpu.memory_space<vmem>>, vector<18x18x32xbf16>
    tpu.vector_store %arg9[%c0_8, %c0_9, %c0_10], %10 {strides = array<i32>} : memref<18x18x32xbf16, #tpu.memory_space<vmem>>, vector<18x18x32xbf16>,
    %12 = tpu.transpose %9, [1, 0] : vector<32x256xf32> -> vector<256x32xf32>
    %13 = vector.shape_cast %12 : vector<256x32xf32> to vector<16x16x32xf32>
    %14 = arith.truncf %13 : vector<16x16x32xf32> to vector<16x16x32xbf16>
    %c1 = arith.constant 1 : index
    %c1_11 = arith.constant 1 : index
    %c0_12 = arith.constant 0 : index
    %15 = vector.load %arg9[%c1, %c1_11, %c0_12] : memref<18x18x32xbf16, #tpu.memory_space<vmem>>, vector<16x16x32xbf16>
    tpu.vector_store %arg9[%c1, %c1_11, %c0_12], %14 {strides = array<i32>} : memref<18x18x32xbf16, #tpu.memory_space<vmem>>, vector<16x16x32xbf16>,
    %c0_13 = arith.constant 0 : index
    %c0_14 = arith.constant 0 : index
    %c0_15 = arith.constant 0 : index
    %16 = vector.load %arg9[%c0_13, %c0_14, %c0_15] : memref<18x18x32xbf16, #tpu.memory_space<vmem>>, vector<16x16x32xbf16>
    %c0_16 = arith.constant 0 : index
    %c1_17 = arith.constant 1 : index
    %c0_18 = arith.constant 0 : index
    %17 = vector.load %arg9[%c0_16, %c1_17, %c0_18] : memref<18x18x32xbf16, #tpu.memory_space<vmem>>, vector<16x16x32xbf16>
    %c0_19 = arith.constant 0 : index
    %c2 = arith.constant 2 : index
    %c0_20 = arith.constant 0 : index
    %18 = vector.load %arg9[%c0_19, %c2, %c0_20] : memref<18x18x32xbf16, #tpu.memory_space<vmem>>, vector<16x16x32xbf16>
    %c1_21 = arith.constant 1 : index
    %c0_22 = arith.constant 0 : index
    %c0_23 = arith.constant 0 : index
    %19 = vector.load %arg9[%c1_21, %c0_22, %c0_23] : memref<18x18x32xbf16, #tpu.memory_space<vmem>>, vector<16x16x32xbf16>
    %c1_24 = arith.constant 1 : index
    %c1_25 = arith.constant 1 : index
    %c0_26 = arith.constant 0 : index
    %20 = vector.load %arg9[%c1_24, %c1_25, %c0_26] : memref<18x18x32xbf16, #tpu.memory_space<vmem>>, vector<16x16x32xbf16>
    %c1_27 = arith.constant 1 : index
    %c2_28 = arith.constant 2 : index
    %c0_29 = arith.constant 0 : index
    %21 = vector.load %arg9[%c1_27, %c2_28, %c0_29] : memref<18x18x32xbf16, #tpu.memory_space<vmem>>, vector<16x16x32xbf16>
    %c2_30 = arith.constant 2 : index
    %c0_31 = arith.constant 0 : index
    %c0_32 = arith.constant 0 : index
    %22 = vector.load %arg9[%c2_30, %c0_31, %c0_32] : memref<18x18x32xbf16, #tpu.memory_space<vmem>>, vector<16x16x32xbf16>
    %c2_33 = arith.constant 2 : index
    %c1_34 = arith.constant 1 : index
    %c0_35 = arith.constant 0 : index
    %23 = vector.load %arg9[%c2_33, %c1_34, %c0_35] : memref<18x18x32xbf16, #tpu.memory_space<vmem>>, vector<16x16x32xbf16>
    %c2_36 = arith.constant 2 : index
    %c2_37 = arith.constant 2 : index
    %c0_38 = arith.constant 0 : index
    %24 = vector.load %arg9[%c2_36, %c2_37, %c0_38] : memref<18x18x32xbf16, #tpu.memory_space<vmem>>, vector<16x16x32xbf16>
    %25 = tpu.concatenate %16, %17, %18, %19, %20, %21, %22, %23, %24 in 2 : vector<16x16x32xbf16>, vector<16x16x32xbf16>, vector<16x16x32xbf16>, vector<16x16x32xbf16>, vector<16x16x32xbf16>, vector<16x16x32xbf16>, vector<16x16x32xbf16>, vector<16x16x32xbf16>, vector<16x16x32xbf16> -> vector<16x16x288xbf16>
    %26 = vector.shape_cast %25 : vector<16x16x288xbf16> to vector<256x288xbf16>
    %c0_39 = arith.constant 0 : index
    %c0_40 = arith.constant 0 : index
    %27 = vector.load %arg4[%c0_39, %c0_40] : memref<288x32xbf16, #tpu.memory_space<vmem>>, vector<288x32xbf16>
    %cst_41 = arith.constant dense<0.000000e+00> : vector<256x32xf32>
    %28 = tpu.matmul %26, %27, %cst_41 {dimension_numbers = #tpu.dot_dimension_numbers<[1], [0], [0], [1], [0, 0, 1, 1], [], []>} : vector<256x288xbf16>, vector<288x32xbf16>, vector<256x32xf32> -> vector<256x32xf32>
    %c0_42 = arith.constant 0 : index
    %c0_43 = arith.constant 0 : index
    %29 = vector.load %arg5[%c0_42, %c0_43] : memref<1x32xf32, #tpu.memory_space<vmem>>, vector<1x32xf32>
    %30 = vector.broadcast %29 : vector<1x32xf32> to vector<256x32xf32>
    %31 = arith.addf %28, %30 : vector<256x32xf32>
    %cst_44 = arith.constant 0.000000e+00 : f32
    %32 = vector.broadcast %cst_44 : f32 to vector<256x32xf32>
    %33 = arith.maximumf %31, %32 : vector<256x32xf32>
    %34 = tpu.transpose %33, [1, 0] : vector<256x32xf32> -> vector<32x256xf32>
    %35 = arith.truncf %34 : vector<32x256xf32> to vector<32x256xbf16>
    %c0_45 = arith.constant 0 : index
    %c0_46 = arith.constant 0 : index
    %36 = vector.load %arg6[%c0_45, %c0_46] : memref<128x32xbf16, #tpu.memory_space<vmem>>, vector<128x32xbf16>
    %cst_47 = arith.constant dense<0.000000e+00> : vector<128x256xf32>
    %37 = tpu.matmul %36, %35, %cst_47 {dimension_numbers = #tpu.dot_dimension_numbers<[1], [0], [0], [1], [0, 0, 1, 1], [], []>} : vector<128x32xbf16>, vector<32x256xbf16>, vector<128x256xf32> -> vector<128x256xf32>
    %c0_48 = arith.constant 0 : index
    %c0_49 = arith.constant 0 : index
    %38 = vector.load %arg7[%c0_48, %c0_49] : memref<128x1xf32, #tpu.memory_space<vmem>>, vector<128x1xf32>
    %39 = vector.broadcast %38 : vector<128x1xf32> to vector<128x256xf32>
    %40 = arith.addf %37, %39 : vector<128x256xf32>
    %41 = arith.addf %40, %1 : vector<128x256xf32>
    %cst_50 = arith.constant 0.000000e+00 : f32
    %42 = vector.broadcast %cst_50 : f32 to vector<128x256xf32>
    %43 = arith.maximumf %41, %42 : vector<128x256xf32>
    %c0_51 = arith.constant 0 : index
    %c0_52 = arith.constant 0 : index
    %c0_53 = arith.constant 0 : index
    %44 = vector.load %arg8[%c0_51, %c0_52, %c0_53] : memref<1x128x256xf32, #tpu.memory_space<vmem>>, vector<1x128x256xf32>
    %45 = vector.shape_cast %44 : vector<1x128x256xf32> to vector<128x256xf32>
    %46 = vector.shape_cast %43 : vector<128x256xf32> to vector<1x128x256xf32>
    tpu.vector_store %arg8[%c0_51, %c0_52, %c0_53], %46 {strides = array<i32>} : memref<1x128x256xf32, #tpu.memory_space<vmem>>, vector<1x128x256xf32>,
    return
  }
  func.func @transform_0(%arg0: i32) -> (i32, i32, i32) {
    %c0_i32 = arith.constant 0 : i32
    %c0_i32_0 = arith.constant 0 : i32
    %c0_i32_1 = arith.constant 0 : i32
    return %arg0, %c0_i32, %c0_i32_0 : i32, i32, i32
  }
  func.func @transform_1(%arg0: i32) -> (i32, i32) {
    %c0_i32 = arith.constant 0 : i32
    %c0_i32_0 = arith.constant 0 : i32
    %c0_i32_1 = arith.constant 0 : i32
    return %c0_i32, %c0_i32_0 : i32, i32
  }
  func.func @transform_2(%arg0: i32) -> (i32, i32) {
    %c0_i32 = arith.constant 0 : i32
    %c0_i32_0 = arith.constant 0 : i32
    %c0_i32_1 = arith.constant 0 : i32
    return %c0_i32, %c0_i32_0 : i32, i32
  }
  func.func @transform_3(%arg0: i32) -> (i32, i32) {
    %c0_i32 = arith.constant 0 : i32
    %c0_i32_0 = arith.constant 0 : i32
    %c0_i32_1 = arith.constant 0 : i32
    return %c0_i32, %c0_i32_0 : i32, i32
  }
  func.func @transform_4(%arg0: i32) -> (i32, i32) {
    %c0_i32 = arith.constant 0 : i32
    %c0_i32_0 = arith.constant 0 : i32
    %c0_i32_1 = arith.constant 0 : i32
    return %c0_i32, %c0_i32_0 : i32, i32
  }
  func.func @transform_5(%arg0: i32) -> (i32, i32) {
    %c0_i32 = arith.constant 0 : i32
    %c0_i32_0 = arith.constant 0 : i32
    %c0_i32_1 = arith.constant 0 : i32
    return %c0_i32, %c0_i32_0 : i32, i32
  }
  func.func @transform_6(%arg0: i32) -> (i32, i32) {
    %c0_i32 = arith.constant 0 : i32
    %c0_i32_0 = arith.constant 0 : i32
    %c0_i32_1 = arith.constant 0 : i32
    return %c0_i32, %c0_i32_0 : i32, i32
  }
  func.func @transform_7(%arg0: i32) -> (i32, i32, i32) {
    %c0_i32 = arith.constant 0 : i32
    %c0_i32_0 = arith.constant 0 : i32
    %c0_i32_1 = arith.constant 0 : i32
    return %arg0, %c0_i32, %c0_i32_0 : i32, i32, i32
  }
}

</mosaic_0001>

<bundles_post_ra>
// kernel: tpu_custom_call.1
= control target key start
LH: loop header
LB: loop body
LE: loop exit
PB: predicated region body
PF: predicated region fallthrough
CT: control target
= control target key end

     0   :  { %12 = vsyncpa [#allocation4], 0  ;;  %s6221_s0 = inlined_call_operand.hbm [shape: f32[2,128,256], index: 0, kind: input, shape index: {}]   ;;  %s6222_s1 = inlined_call_operand.vmem [shape: bf16[32,128], index: 1, kind: input, shape index: {}]   ;;  %s6223_s2 = inlined_call_operand.vmem [shape: f32[32,1], index: 2, kind: input, shape index: {}]   ;;  %s6224_s3 = inlined_call_operand.vmem [shape: bf16[288,32], index: 3, kind: input, shape index: {}]   ;;  %s6225_s4 = inlined_call_operand.vmem [shape: f32[1,32], index: 4, kind: input, shape index: {}]   ;;  %s6226_s5 = inlined_call_operand.vmem [shape: bf16[128,32], index: 5, kind: input, shape index: {}]   ;;  %s6227_s6 = inlined_call_operand.vmem [shape: f32[128,1], index: 6, kind: input, shape index: {}]   ;;  %s6228_s7 = inlined_call_operand.hbm [shape: f32[2,128,256], index: 7, kind: output, shape index: {}]  }
   0x1   :  { %14 = vsyncpa [#allocation4 + $0x1], 0 }
   0x2   :  { %15 = vsyncpa [#allocation5], 0 }
   0x3   :  { %17 = vsyncpa [#allocation5 + $0x1], 0  ;;  %s4599_s24 = smov 0   ;;  %s4601_s25 = smov 0  }
   0x4   :  { %s4603_s26 = smov 0   ;;  %s4605_s27 = smov 0  }
   0x5 LB: > { %s4620_s28 = sadd.s32 4294967295, %s4549_s27   ;;  %s3927_s29 = sadd.s32 4294967294, %s4549_s27   ;;  %s4549_s27 = sphi %s4605_s27, %s6246_s27   ;;  %s4545_s26 = sphi %s4603_s26, %s6245_s26   ;;  %s4541_s25 = sphi %s4601_s25, %s6244_s25   ;;  %s4537_s24 = sphi %s4599_s24, %s6243_s24  }
   0x6   : > { %s4624_s30 = sadd.s32 1, %s4549_s27   ;;  %s30_s8 = sadd.s32 1, %s4545_s26 }
   0x7   : > { %s27_s9 = ssub.s32 %s4549_s27, %s4624_s30  ;;  %p37_p0 = scmp.ne.s32.totalorder %s4545_s26, %s4541_s25 }
   0x8   : > { %p28_p1 = scmp.eq.s32.totalorder %s27_s9, 0  ;;  %p38_p2 = scmp.eq.s32.totalorder %s4549_s27, 0 }
   0x9   : > { %p43_p3 = scmp.ne.s32.totalorder %s4541_s25, %s4537_s24  ;;  %p44_p4 = scmp.eq.s32.totalorder %s4620_s28, 0 }
   0xa   : > { %s4636_s10 = scalar_select %p28_p1, %s4545_s26, %s30_s8  }
   0xb   : > { %p4638_p5 = por %p38_p2, %p37_p0  ;;  %p4642_p6 = por %p44_p4, %p43_p3 }
   0xc   : > { %6229 = sst [smem:[#allocation9_spill]] %s4636_s10  ;;  %p193_p7 = scmp.eq.s32.totalorder %s4620_s28, 1 }
   0xd   : > { %p199_p8 = scmp.eq.s32.totalorder %s3927_s29, 1  ;;  %p4321_p10 = scmp.lt.s32.totalorder %s4549_s27, 2 }
   0xe   : > { %p4649_p11 = por %p193_p7, %p37_p0  ;;  %s237_s15 = sand.u32 1, %s4545_s26  }
   0xf   : > { %p4653_p12 = por %p199_p8, %p43_p3  ;;  %s4085_s16 = sshll.u32 %s4549_s27, 8 }
  0x10   : > { %s3930_s17 = sshll.u32 %s237_s15, 8  ;;  %s246_s20 = scalar_lea.hbm %s6221_s0, %s4085_s16 }
  0x11   : > { %s247_s21 = sshll.u32 %s246_s20, 4  ;;  %s241_s22 = scalar_lea.vmem [#allocation3], %s3930_s17  ;;  %s248_s21 = int_to_ptr.hbm [resolvable:$true] %s247_s21 }
  0x12   : > { %s249_s23 = sshll.u32 %s241_s22, 4  ;;  %p4664_p13 = pnand %p4321_p10, %p4638_p5  ;;  %s250_s23 = int_to_ptr.vmem [resolvable:$true] %s249_s23 }
  0x13   : > { %p3933_p0 = scmp.ge.s32.totalorder %s4549_s27, 1  ;;  %p257_p1 = scmp.lt.s32.totalorder %s4549_s27, 3 }
  0x14   : > { %s238_s8 = scalar_lea.sflag [#allocation4], %s237_s15  ;;  %s4438_s9 = sshra.s32 %s248_s21, 4  ;;  %s4439_s9 = int_to_ptr.hbm [resolvable:$true] %s4438_s9 }
  0x15   : > { %s4440_s10 = scalar_lea.hbm %s4439_s9, 256  ;;  %p4442_p3 = pneg %p4664_p13 }
  0x16   : > { %p4441_p2 = scmp.ne.s32.totalorder %s4439_s9, %s4440_s10  ;;  %s4445_s11 = scalar_lea.hbm %s6221_s0, 512 }
  0x17   : > { %p4446_p5 = scmp.lt.s32.totalorder %s4439_s9, %s6221_s0  ;;  %p4447_p8 = scmp.lt.s32.totalorder %s4445_s11, %s4440_s10 }
  0x18   : > { %p4443_p4 = pnand %p4442_p3, %p4441_p2 }
  0x19   : > { %p4448_p10 = por %p4447_p8, %p4446_p5 }
  0x1a   : > { %p4444_p7 = pneg %p4443_p4 }
  0x1c   : > { %p4449_p9 = pnand %p4448_p10, %p4444_p7 }
  0x1e   : > { %4452 = shalt.err (!%p4449_p9)
}
  0x1f   : > { %s4551_s15 = smov 256   ;;  %s4552_s20 = smov 16  }
  0x20   : > { %4316 = dma.hbm_to_vmem [thread:$0]  (!%p4664_p13), %s248_s21, 4096, %s250_s23, %s238_s8, %s4551_s15, %s4551_s15, %s4552_s20  }
  0x21   : > { %p258_p2 = pnand %p3933_p0, %p257_p1 }
  0x22   : > { %s4685_s22 = sand.u32 (!%p258_p2), 1, %s4541_s25  }
  0x23   : > { %261 = sbr.rel (%p258_p2) target bundleno = 1567 (0x61f), region = 48  ;;  %s3934_s10 = sshll.u32 (!%p258_p2), %s4685_s22, 8 }
  0x24   : > { %s264_s9 = scalar_lea.sflag (!%p258_p2), [#allocation4], %s4685_s22  ;;  %s4691_s16 = scalar_lea.vmem (!%p258_p2), [#allocation3], %s3934_s10 }
  0x28   : > { %4513 = dma.done.wait (%p4642_p6), %s264_s9, 4096  }
  0x29   : > { %4515 = vsyncadd (%p4642_p6), %s264_s9, 4294963200  ;;  %v328_v0 = vld [vmem:[%s4691_s16 + $0xe0] sm:$0xff]  ;;  %v330_v1 = vld [vmem:[%s4691_s16 + $0xf0] sm:$0xff]  ;;  %v4553_v14 = vmov 0   ;;  %vm434_vm0 = vcmask 257024   ;;  %vm437_vm1 = vcmask 253952  }
  0x2a   : > { %v329_v2 = vld [vmem:[%s4691_s16 + $0xe8] sm:$0xff]  ;;  %v350_v3 = vpack.c.bf16 %v330_v1, %v328_v0  ;;  %v331_v4 = vld [vmem:[%s4691_s16 + $0xf8] sm:$0xff]  ;;  %v324_v5 = vld [vmem:[%s4691_s16 + $0xc0] sm:$0xff]  ;;  %4364 = vset.pattern.permute.xlu0 %v4553_v14  ;;  %4365 = vset.pattern.permute.xlu1 %v4553_v14  ;;  %439 = vst.msk [vmem:[#allocation2 + $0xc] sm:$0xf] %vm434_vm0, %v4553_v14  ;;  %s4554_s12 = smov 32  }
  0x2b   : > { %v326_v6 = vld [vmem:[%s4691_s16 + $0xd0] sm:$0xff]  ;;  %v351_v7 = vpack.c.bf16 %v331_v4, %v329_v2  ;;  %v325_v8 = vld [vmem:[%s4691_s16 + $0xc8] sm:$0xff]  ;;  %v327_v9 = vld [vmem:[%s4691_s16 + $0xd8] sm:$0xff]  ;;  %435 = vst.msk [vmem:[#allocation2] sm:$0xf] %vm434_vm0, %v4553_v14  ;;  %vm1621_vm3 = vcmask 1046528  }
  0x2c   : > { %388 = vmatpush.bf16.msra.mxu0 %v350_v3  ;;  %v348_v10 = vpack.c.bf16 %v326_v6, %v324_v5  ;;  %v349_v11 = vpack.c.bf16 %v327_v9, %v325_v8  ;;  %v320_v12 = vld [vmem:[%s4691_s16 + $0xa0] sm:$0xff]  ;;  %v322_v13 = vld [vmem:[%s4691_s16 + $0xb0] sm:$0xff]  ;;  %v321_v15 = vld [vmem:[%s4691_s16 + $0xa8] sm:$0xff]  ;;  %436 = vst.msk [vmem:[#allocation2 + $0x4] sm:$0xf] %vm434_vm0, %v4553_v14  ;;  %s4555_s21 = smov 64  }
  0x2d   : > { %407 = vmatpush.bf16.msra.mxu1 %v351_v7  ;;  %v323_v16 = vld [vmem:[%s4691_s16 + $0xb8] sm:$0xff]  ;;  %v346_v17 = vpack.c.bf16 %v322_v13, %v320_v12  ;;  %v316_v19 = vld [vmem:[%s4691_s16 + $0x80] sm:$0xff]  ;;  %v318_v20 = vld [vmem:[%s4691_s16 + $0x90] sm:$0xff]  ;;  %440 = vst.msk [vmem:[#allocation2 + $0x10] sm:$0xf] %vm434_vm0, %v4553_v14  ;;  %s4556_s11 = smov 96  }
  0x2e   : > { %v347_v18 = vpack.c.bf16 %v323_v16, %v321_v15  ;;  %v317_v21 = vld [vmem:[%s4691_s16 + $0x88] sm:$0xff]  ;;  %v319_v22 = vld [vmem:[%s4691_s16 + $0x98] sm:$0xff]  ;;  %v344_v23 = vpack.c.bf16 %v318_v20, %v316_v19  ;;  %v312_v26 = vld [vmem:[%s4691_s16 + $0x60] sm:$0xff]  ;;  %442 = vst.msk [vmem:[#allocation2 + $0x18] sm:$0xf] %vm434_vm0, %v4553_v14  ;;  %vm2662_vm10 = vcmask 261120  }
  0x2f   : > { %v352_v24 = vld [vmem:[%s6223_s2] sm:$0xff]  ;;  %v345_v25 = vpack.c.bf16 %v319_v22, %v317_v21  ;;  %v314_v27 = vld [vmem:[%s4691_s16 + $0x70] sm:$0xff]  ;;  %v315_v29 = vld [vmem:[%s4691_s16 + $0x78] sm:$0xff]  ;;  %443 = vst.msk [vmem:[#allocation2 + $0x1c] sm:$0xf] %vm434_vm0, %v4553_v14  ;;  %vm2695_vm11 = vcmask 523264  }
  0x30   : > { %389 = vmatpush.bf16.msra.mxu0 %v348_v10  ;;  %358 = vperm.xlu0 %4364, %v352_v24   ;;  %v313_v28 = vld [vmem:[%s4691_s16 + $0x68] sm:$0xff]  ;;  %v342_v30 = vpack.c.bf16 %v314_v27, %v312_v26  ;;  %v308_v32 = vld [vmem:[%s4691_s16 + $0x40] sm:$0xff]  ;;  %v310_v33 = vld [vmem:[%s4691_s16 + $0x50] sm:$0xff]  ;;  %445 = vst.msk [vmem:[#allocation2 + $0x24] sm:$0xf] %vm434_vm0, %v4553_v14  ;;  %vm2728_vm12 = vcmask 785408  }
  0x31   : > { %408 = vmatpush.bf16.msra.mxu1 %v349_v11  ;;  %v343_v31 = vpack.c.bf16 %v315_v29, %v313_v28  ;;  %v309_v34 = vld [vmem:[%s4691_s16 + $0x48] sm:$0xff]  ;;  %v311_v35 = vld [vmem:[%s4691_s16 + $0x58] sm:$0xff]  ;;  %v353_v36 = vld [vmem:[%s6223_s2 + $0x8] sm:$0xff]  ;;  %v340_v37 = vpack.c.bf16 %v310_v33, %v308_v32  ;;  %446 = vst.msk [vmem:[#allocation2 + $0x28] sm:$0xf] %vm434_vm0, %v4553_v14  ;;  %s4488_s19 = scalar_lea.hbm %s6228_s7, 512 }
  0x32   : > { %v354_v38 = vld [vmem:[%s6223_s2 + $0x10] sm:$0xff]  ;;  %v341_v39 = vpack.c.bf16 %v311_v35, %v309_v34  ;;  %v304_v40 = vld [vmem:[%s4691_s16 + $0x20] sm:$0xff]  ;;  %v306_v41 = vld [vmem:[%s4691_s16 + $0x30] sm:$0xff]  ;;  %448 = vst.msk [vmem:[#allocation2 + $0x30] sm:$0xf] %vm434_vm0, %v4553_v14 }
  0x33   : > { %v305_v42 = vld [vmem:[%s4691_s16 + $0x28] sm:$0xff]  ;;  %v307_v43 = vld [vmem:[%s4691_s16 + $0x38] sm:$0xff]  ;;  %368 = vperm.xlu1 %4365, %v354_v38   ;;  %v338_v44 = vpack.c.bf16 %v306_v41, %v304_v40  ;;  %v300_v46 = vld [vmem:[%s4691_s16] sm:$0xff]  ;;  %449 = vst.msk [vmem:[#allocation2 + $0x34] sm:$0xf] %vm434_vm0, %v4553_v14 }
  0x34   : > { %390 = vmatpush.bf16.msra.mxu0 %v346_v17  ;;  %v339_v45 = vpack.c.bf16 %v307_v43, %v305_v42  ;;  %v302_v47 = vld [vmem:[%s4691_s16 + $0x10] sm:$0xff]  ;;  %v301_v48 = vld [vmem:[%s4691_s16 + $0x8] sm:$0xff]  ;;  %v303_v49 = vld [vmem:[%s4691_s16 + $0x18] sm:$0xff]  ;;  %451 = vst.msk [vmem:[#allocation2 + $0x3c] sm:$0xf] %vm434_vm0, %v4553_v14 }
  0x35   : > { %409 = vmatpush.bf16.msra.mxu1 %v347_v18  ;;  %v355_v50 = vld [vmem:[%s6223_s2 + $0x18] sm:$0xff]  ;;  %v336_v51 = vpack.c.bf16 %v302_v47, %v300_v46  ;;  %v337_v52 = vpack.c.bf16 %v303_v49, %v301_v48  ;;  %v4086_v53 = vld [vmem:[%s6222_s1] sm:$0xff]  ;;  %v4087_v54 = vld [vmem:[%s6222_s1 + $0x8] sm:$0xff]  ;;  %452 = vst.msk [vmem:[#allocation2 + $0x40] sm:$0xf] %vm434_vm0, %v4553_v14 }
  0x36   : > { %454 = vst.msk [vmem:[#allocation2 + $0x48] sm:$0xf] %vm434_vm0, %v4553_v14  ;;  %v4116_v8 = vld [vmem:[#allocation2] sm:$0xff]   ;;  %vm1348_vm2 = vsmask.f32 7424  ;;  %v4883_v35 = vld [vmem:[%s6224_s3 + $0x88] sm:$0xff] }
  0x37   : > { %455 = vst.msk [vmem:[#allocation2 + $0x4c] sm:$0xf] %vm434_vm0, %v4553_v14  ;;  %v1352_v10 = vshll.u32 %v4116_v8, 16  ;;  %v1350_v12 = vshrl.u32 %v4116_v8, 16  ;;  %v4233_v17 = vld [vmem:[#allocation2] sm:$0xf0] }
  0x38   : > { %391 = vmatpush.bf16.msra.mxu0 %v344_v23  ;;  %363 = vperm.xlu0 %4364, %v353_v36   ;;  %457 = vst.msk [vmem:[#allocation2 + $0x54] sm:$0xf] %vm434_vm0, %v4553_v14  ;;  %v4234_v18 = vld [vmem:[#allocation2] sm:$0xe]  ;;  %vm911_vm4 = vsmask.f32 7938 }
  0x39   : > { %410 = vmatpush.bf16.msra.mxu1 %v345_v25  ;;  %458 = vst.msk [vmem:[#allocation2 + $0x58] sm:$0xf] %vm434_vm0, %v4553_v14  ;;  %v1354_v13 = vrot.slane %v1352_v10, 1  ;;  %v4235_v20 = vor.u32 %v4234_v18, %v4233_v17  ;;  %vm4874_vm5 = vmand %vm434_vm0, %vm911_vm4  ;;  %vm586_vm6 = vsmask.f32 256  ;;  %v4898_v42 = vld [vmem:[%s6224_s3 + $0x80] sm:$0xff] }
  0x3a   : > { %460 = vst.msk [vmem:[#allocation2 + $0x60] sm:$0xf] %vm434_vm0, %v4553_v14  ;;  %vm587_vm7 = vsmask.f32 4368  ;;  %vm4891_vm9 = vmand %vm437_vm1, %vm586_vm6 }
  0x3b   : > { %373 = vperm.xlu1 %4365, %v355_v50   ;;  %461 = vst.msk [vmem:[#allocation2 + $0x64] sm:$0xf] %vm434_vm0, %v4553_v14  ;;  %v1355_v16 = vor.u32 %v1354_v13, %v1350_v12  ;;  %v1622_v22 = vrot.slane %v4235_v20, 1  ;;  %vm4886_vm8 = vmor %vm586_vm6, %vm587_vm7 }
  0x3c   : > { %392 = vmatpush.bf16.msra.mxu0 %v342_v30  ;;  %463 = vst.msk [vmem:[#allocation2 + $0x6c] sm:$0xf] %vm434_vm0, %v4553_v14  ;;  %v913_v30 = vld [vmem:[#allocation2 + $0xc] sm:$0xf] }
  0x3d   : > { %411 = vmatpush.bf16.msra.mxu1 %v343_v31  ;;  %464 = vst.msk [vmem:[#allocation2 + $0x70] sm:$0xf] %vm434_vm0, %v4553_v14 }
  0x3e   : > { %466 = vst.msk [vmem:[#allocation2 + $0x78] sm:$0xf] %vm434_vm0, %v4553_v14 }
  0x3f   : > { %467 = vst.msk [vmem:[#allocation2 + $0x7c] sm:$0xf] %vm434_vm0, %v4553_v14 }
  0x40   : > { %393 = vmatpush.bf16.msra.mxu0 %v340_v37  ;;  %469 = vst.msk [vmem:[#allocation2 + $0x84] sm:$0xf] %vm434_vm0, %v4553_v14 }
  0x41   : > { %412 = vmatpush.bf16.msra.mxu1 %v341_v39  ;;  %470 = vst.msk [vmem:[#allocation2 + $0x88] sm:$0xf] %vm434_vm0, %v4553_v14 }
  0x42   : > { %472 = vst.msk [vmem:[#allocation2 + $0x90] sm:$0xf] %vm434_vm0, %v4553_v14 }
  0x43   : > { %473 = vst.msk [vmem:[#allocation2 + $0x94] sm:$0xf] %vm434_vm0, %v4553_v14 }
  0x44   : > { %394 = vmatpush.bf16.msra.mxu0 %v338_v44  ;;  %475 = vst.msk [vmem:[#allocation2 + $0x9c] sm:$0xf] %vm434_vm0, %v4553_v14 }
  0x45   : > { %413 = vmatpush.bf16.msra.mxu1 %v339_v45  ;;  %476 = vst.msk [vmem:[#allocation2 + $0xa0] sm:$0xf] %vm434_vm0, %v4553_v14 }
  0x46   : > { %478 = vst.msk [vmem:[#allocation2 + $0xa8] sm:$0xf] %vm434_vm0, %v4553_v14 }
  0x47   : > { %479 = vst.msk [vmem:[#allocation2 + $0xac] sm:$0xf] %vm434_vm0, %v4553_v14 }
  0x48   : > { %395 = vmatpush.bf16.msra.mxu0 %v336_v51  ;;  %481 = vst.msk [vmem:[#allocation2 + $0xb4] sm:$0xf] %vm434_vm0, %v4553_v14 }
  0x49   : > { %414 = vmatpush.bf16.msra.mxu1 %v337_v52  ;;  %482 = vst.msk [vmem:[#allocation2 + $0xb8] sm:$0xf] %vm434_vm0, %v4553_v14 }
  0x4a   : > { %484 = vst.msk [vmem:[#allocation2 + $0xc0] sm:$0xf] %vm434_vm0, %v4553_v14 }
  0x4b   : > { %396 = vmatmul.bf16.vlgmr.msra.gmra.mxu0 %v4086_v53  ;;  %485 = vst.msk [vmem:[#allocation2 + $0xc4] sm:$0xf] %vm434_vm0, %v4553_v14 }
  0x4c   : > { %415 = vmatmul.bf16.vlgmr.msra.gmra.mxu1 %v4086_v53  ;;  %487 = vst.msk [vmem:[#allocation2 + $0xcc] sm:$0xf] %vm434_vm0, %v4553_v14  ;;  %3285 = vmatpush.bf16.msrb.mxu0 %v4883_v35  ;;  %v922_v53 = vld [vmem:[#allocation2 + $0x18] sm:$0xf] }
  0x4d   : > { %488 = vst.msk [vmem:[#allocation2 + $0xd0] sm:$0xf] %vm434_vm0, %v4553_v14 }
  0x4e   : > { %441 = vst.msk [vmem:[#allocation2 + $0x14] sm:$0x1] %vm437_vm1, %v4553_v14 }
  0x4f   : > { %438 = vst.msk [vmem:[#allocation2 + $0x8] sm:$0x1] %vm437_vm1, %v4553_v14 }
  0x50   : > { %444 = vst.msk [vmem:[#allocation2 + $0x20] sm:$0x1] %vm437_vm1, %v4553_v14  ;;  %3286 = vmatpush.bf16.msrb.mxu0 %v4898_v42 }
  0x51   : > { %447 = vst.msk [vmem:[#allocation2 + $0x2c] sm:$0x1] %vm437_vm1, %v4553_v14 }
  0x52   : > { %450 = vst.msk [vmem:[#allocation2 + $0x38] sm:$0x1] %vm437_vm1, %v4553_v14 }
  0x53   : > { %453 = vst.msk [vmem:[#allocation2 + $0x44] sm:$0x1] %vm437_vm1, %v4553_v14 }
  0x54   : > { %456 = vst.msk [vmem:[#allocation2 + $0x50] sm:$0x1] %vm437_vm1, %v4553_v14 }
  0x55   : > { %459 = vst.msk [vmem:[#allocation2 + $0x5c] sm:$0x1] %vm437_vm1, %v4553_v14  ;;  %v919_v41 = vld [vmem:[#allocation2 + $0x14] sm:$0x1] }
  0x56   : > { %462 = vst.msk [vmem:[#allocation2 + $0x68] sm:$0x1] %vm437_vm1, %v4553_v14  ;;  %v1059_v7 = vld [vmem:[#allocation2 + $0x8] sm:$0x1] }
  0x57   : > { %465 = vst.msk [vmem:[#allocation2 + $0x74] sm:$0x1] %vm437_vm1, %v4553_v14  ;;  %v1316_v9 = vunpack.c.l.b16 %v1059_v7  ;;  %v926_v13 = vld [vmem:[#allocation2 + $0x20] sm:$0x1] }
  0x58   : > { %468 = vst.msk [vmem:[#allocation2 + $0x80] sm:$0x1] %vm437_vm1, %v4553_v14 }
  0x59   : > { %471 = vst.msk [vmem:[#allocation2 + $0x8c] sm:$0x1] %vm437_vm1, %v4553_v14  ;;  %v1332_v11 = vpack.c.b16 %v1316_v9, %v1316_v9 }
  0x5a   : > { %474 = vst.msk [vmem:[#allocation2 + $0x98] sm:$0x1] %vm437_vm1, %v4553_v14 }
  0x5b   : > { %401 = vmatmul.bf16.gmra.mxu0 %v4087_v54  ;;  %477 = vst.msk [vmem:[#allocation2 + $0xa4] sm:$0x1] %vm437_vm1, %v4553_v14  ;;  %v1357_v15 = vshll.u32 %v1332_v11, 16  ;;  %v1623_v23 = vrot.slane %v1332_v11, 1 }
  0x5c   : > { %420 = vmatmul.bf16.gmra.mxu1 %v4087_v54  ;;  %480 = vst.msk [vmem:[#allocation2 + $0xb0] sm:$0x1] %vm437_vm1, %v4553_v14 }
  0x5d   : > { %483 = vst.msk [vmem:[#allocation2 + $0xbc] sm:$0x1] %vm437_vm1, %v4553_v14  ;;  %v1359_v19 = vrot.slane %v1357_v15, 1  ;;  %v1624_v24 = vsel %vm1621_vm3, %v1622_v22, %v1623_v23 }
  0x5e   : > { %486 = vst.msk [vmem:[#allocation2 + $0xc8] sm:$0x1] %vm437_vm1, %v4553_v14  ;;  %1670 = vrot.lane.b32.xlu1 %v1624_v24, %s4555_s21 }
  0x5f   : > { %489 = vst.msk [vmem:[#allocation2 + $0xd4] sm:$0x1] %vm437_vm1, %v4553_v14  ;;  %v1360_v21 = vsel %vm1348_vm2, %v1355_v16, %v1359_v19 }
  0x60   : > { %1541 = vrot.lane.b32.xlu0 %v1360_v21, %s4554_s12 }
  0xa2   : > { %v4749_v55 = vpop.permute.xlu0 %358 }
  0xa5   : > { %v4787_v63 = vpop.permute.xlu1 %368 }
  0xaa   : > { %v4772_v59 = vpop.permute.xlu0 %363 }
  0xad   : > { %v4810_v3 = vpop.permute.xlu1 %373 }
  0xc8   : > { %v397_v56 = vpop.f32.mrf.mxu0 }
  0xc9   : > { %v398_v57 = vadd.f32 %v397_v56, %v4749_v55 }
  0xcb   : > { %v426_v58 = vmax.f32 %v398_v57, 0.0 }
  0xcd   : > { %490 = vxpose.xlu2.b32.start [1/4] (short) %v426_v58, 128 }
  0xd0   : > { %v399_v60 = vpop.f32.mrf.mxu0 }
  0xd1   : > { %v400_v61 = vadd.f32 %v399_v60, %v4772_v59 }
  0xd3   : > { %v428_v62 = vmax.f32 %v400_v61, 0.0 }
  0xd5   : > { %491 = vxpose.xlu2.b32.cont [2/4] (short) %v428_v62, 128 }
  0xd8   : > { %v402_v0 = vpop.f32.mrf.mxu0 }
  0xd9   : > { %v403_v1 = vadd.f32 %v402_v0, %v4787_v63 }
  0xdb   : > { %v430_v2 = vmax.f32 %v403_v1, 0.0 }
  0xdd   : > { %492 = vxpose.xlu2.b32.cont [3/4] (short) %v430_v2, 128 }
  0xe0   : > { %v404_v4 = vpop.f32.mrf.mxu0 }
  0xe1   : > { %v405_v5 = vadd.f32 %v404_v4, %v4810_v3 }
  0xe3   : > { %v432_v6 = vmax.f32 %v405_v5, 0.0 }
  0xe5   : > { %493 = vxpose.xlu2.b32.end [4/4] (short) %v432_v6, 128 }
 0x166   : > { %v506_v25 = vpop.trf.xlu2 }
 0x167   : > { %v554_v26 = vpack.c.bf16 %v506_v25, %v506_v25 }
 0x169   : > { %v590_v27 = vshrl.u32 %v554_v26, 16  ;;  %v593_v29 = vshll.u32 %v554_v26, 16 }
 0x16b   : > { %v592_v28 = vrot.slane %v590_v27, 7 }
 0x16d   : > { %v595_v31 = vor.u32 %v593_v29, %v592_v28  ;;  %v596_v43 = vrot.slane %v592_v28, 4 }
 0x16e   : > { %v507_v32 = vpop.trf.xlu2 }
 0x16f   : > { %v914_v33 = vsel %vm4874_vm5, %v595_v31, %v913_v30  ;;  %v555_v34 = vpack.c.bf16 %v507_v32, %v507_v32 }
 0x170   : > { %915 = vst [vmem:[#allocation2 + $0xc] sm:$0xf] %v914_v33 }
 0x171   : > { %v598_v36 = vshrl.u32 %v555_v34, 16  ;;  %v601_v39 = vshll.u32 %v555_v34, 16 }
 0x173   : > { %v600_v38 = vrot.slane %v598_v36, 7 }
 0x175   : > { %v603_v44 = vor.u32 %v601_v39, %v600_v38  ;;  %v605_v45 = vrot.slane %v600_v38, 4 }
 0x176   : > { %v508_v46 = vpop.trf.xlu2 }
 0x177   : > { %v604_v47 = vsel %vm4886_vm8, %v596_v43, %v603_v44  ;;  %v920_v48 = vsel %vm4891_vm9, %v605_v45, %v919_v41  ;;  %v556_v49 = vpack.c.bf16 %v508_v46, %v508_v46  ;;  %v4403_v54 = vld [vmem:[#allocation2 + $0xc] sm:$0xe]  ;;  %v929_v44 = vld [vmem:[#allocation2 + $0x24] sm:$0xf] }
 0x178   : > { %916 = vst.msk [vmem:[#allocation2 + $0x10] sm:$0xf] %vm434_vm0, %v604_v47  ;;  %v4406_v43 = vld [vmem:[#allocation2 + $0xc] sm:$0xe] }
 0x179   : > { %921 = vst [vmem:[#allocation2 + $0x14] sm:$0x1] %v920_v48  ;;  %v607_v50 = vshrl.u32 %v556_v49, 16  ;;  %v610_v52 = vshll.u32 %v556_v49, 16 }
 0x17b   : > { %v609_v51 = vrot.slane %v607_v50, 7 }
 0x17d   : > { %v612_v56 = vor.u32 %v610_v52, %v609_v51  ;;  %v613_v12 = vrot.slane %v609_v51, 4 }
 0x17e   : > { %v509_v57 = vpop.trf.xlu2 }
 0x17f   : > { %v923_v58 = vsel %vm4874_vm5, %v612_v56, %v922_v53  ;;  %v557_v60 = vpack.c.bf16 %v509_v57, %v509_v57  ;;  %v1091_v61 = vld [vmem:[#allocation2 + $0xc] sm:$0xff]  }
 0x180   : > { %v4402_v62 = vld [vmem:[#allocation2 + $0xc] sm:$0xf0]  ;;  %924 = vst [vmem:[#allocation2 + $0x18] sm:$0xf] %v923_v58  ;;  %v1123_v2 = vld [vmem:[#allocation2 + $0x14] sm:$0x1]  ;;  %1782 = vrot.lane.b32.xlu0 %v1091_v61, %s4556_s11 }
 0x181   : > { %v4908_v0 = vld [vmem:[#allocation2 + $0xc] sm:$0xff]   ;;  %v1060_v4 = vld [vmem:[#allocation2 + $0x14] sm:$0x1]  ;;  %v615_v5 = vshrl.u32 %v557_v60, 16  ;;  %v1830_v6 = vunpack.c.l.b16 %v1123_v2  ;;  %v4404_v8 = vor.u32 %v4403_v54, %v4402_v62  ;;  %v618_v10 = vshll.u32 %v557_v60, 16 }
 0x182   : > { %v4910_v1 = vld [vmem:[#allocation2 + $0xc] sm:$0xf0]  ;;  %v1317_v7 = vunpack.c.l.b16 %v1060_v4  ;;  %v1865_v15 = vshll.u32 %v1091_v61, 16  ;;  %v1364_v21 = vshll.u32 %v4908_v0, 16  ;;  %v1863_v22 = vshrl.u32 %v1091_v61, 16 }
 0x183   : > { %v617_v9 = vrot.slane %v615_v5, 7  ;;  %v1846_v11 = vpack.c.b16 %v1830_v6, %v1830_v6  ;;  %v2102_v16 = vrot.slane %v4404_v8, 1  ;;  %v1362_v29 = vshrl.u32 %v4908_v0, 16 }
 0x184   : > { %v4913_v17 = vpack.c.b16 %v1317_v7, %v1317_v7  ;;  %v1867_v23 = vrot.slane %v1865_v15, 1  ;;  %v1366_v30 = vrot.slane %v1364_v21, 1  ;;  %v4407_v57 = vor.u32 %v4406_v43, %v4910_v1 }
 0x185   : > { %v620_v18 = vor.u32 %v618_v10, %v617_v9  ;;  %v622_v19 = vrot.slane %v617_v9, 4  ;;  %v2103_v20 = vrot.slane %v1846_v11, 1  ;;  %v1870_v31 = vshll.u32 %v1846_v11, 16  ;;  %v933_v9 = vld [vmem:[#allocation2 + $0x2c] sm:$0x1] }
 0x186   : > { %v510_v24 = vpop.trf.xlu2  ;;  %v1369_v34 = vshll.u32 %v4913_v17, 16  ;;  %v1868_v36 = vor.u32 %v1867_v23, %v1863_v22  ;;  %v1367_v41 = vor.u32 %v1366_v30, %v1362_v29  ;;  %v1625_v10 = vrot.slane %v4407_v57, 1 }
 0x187   : > { %v621_v25 = vsel %vm4886_vm8, %v613_v12, %v620_v18  ;;  %v927_v26 = vsel %vm4891_vm9, %v622_v19, %v926_v13  ;;  %v558_v27 = vpack.c.bf16 %v510_v24, %v510_v24  ;;  %v2104_v28 = vsel %vm1621_vm3, %v2102_v16, %v2103_v20  ;;  %v4282_v56 = vld [vmem:[#allocation2 + $0x18] sm:$0xe] }
 0x188   : > { %925 = vst.msk [vmem:[#allocation2 + $0x1c] sm:$0xf] %vm434_vm0, %v621_v25  ;;  %2150 = vrot.lane.b32.xlu1 %v2104_v28, %s4554_s12  ;;  %v1872_v38 = vrot.slane %v1870_v31, 1  ;;  %v1371_v47 = vrot.slane %v1369_v34, 1  ;;  %v1626_v11 = vrot.slane %v4913_v17, 1 }
 0x189   : > { %928 = vst [vmem:[#allocation2 + $0x20] sm:$0x1] %v927_v26  ;;  %v624_v32 = vshrl.u32 %v558_v27, 16  ;;  %v627_v33 = vshll.u32 %v558_v27, 16  ;;  %v4258_v17 = vld [vmem:[#allocation2 + $0x18] sm:$0xe] }
 0x18a   : > { %v4926_v45 = vsel %vm1348_vm2, %v1868_v36, %v1872_v38  ;;  %v1372_v51 = vsel %vm1348_vm2, %v1367_v41, %v1371_v47  ;;  %v1627_v27 = vsel %vm1621_vm3, %v1625_v10, %v1626_v11  ;;  %v936_v41 = vld [vmem:[#allocation2 + $0x30] sm:$0xf] }
 0x18b   : > { %v626_v39 = vrot.slane %v624_v32, 7 }
 0x18d   : > { %v629_v46 = vor.u32 %v627_v33, %v626_v39  ;;  %v630_v6 = vrot.slane %v626_v39, 4 }
 0x18e   : > { %v511_v48 = vpop.trf.xlu2 }
 0x18f   : > { %v930_v49 = vsel %vm4874_vm5, %v629_v46, %v929_v44  ;;  %v559_v50 = vpack.c.bf16 %v511_v48, %v511_v48  ;;  %v4931_v52 = vld [vmem:[#allocation2 + $0x18] sm:$0xff]  }
 0x190   : > { %v4281_v53 = vld [vmem:[#allocation2 + $0x18] sm:$0xf0]  ;;  %931 = vst [vmem:[#allocation2 + $0x24] sm:$0xf] %v930_v49  ;;  %1543 = vrot.lane.b32.xlu1 %v1372_v51, %s4554_s12  ;;  %2262 = vrot.lane.b32.xlu0 %v4931_v52, %s4555_s21  ;;  %v1188_v54 = vld [vmem:[#allocation2 + $0x20] sm:$0x1] }
 0x191   : > { %v632_v58 = vshrl.u32 %v559_v50, 16  ;;  %v635_v60 = vshll.u32 %v559_v50, 16  ;;  %v2310_v61 = vunpack.c.l.b16 %v1188_v54  ;;  %v4283_v62 = vor.u32 %v4282_v56, %v4281_v53  ;;  %v1124_v2 = vld [vmem:[#allocation2 + $0x20] sm:$0x1]  ;;  %v4257_v20 = vld [vmem:[#allocation2 + $0x18] sm:$0xf0] }
 0x192   : > { %v2345_v4 = vshll.u32 %v4931_v52, 16  ;;  %v1831_v5 = vunpack.c.l.b16 %v1124_v2  ;;  %v2343_v26 = vshrl.u32 %v4931_v52, 16  ;;  %v1061_v28 = vld [vmem:[#allocation2 + $0x20] sm:$0x1]  ;;  %v4259_v31 = vor.u32 %v4258_v17, %v4257_v20  ;;  %v4236_v54 = vld [vmem:[#allocation2 + $0x18] sm:$0xf0] }
 0x193   : > { %v634_v7 = vrot.slane %v632_v58, 7  ;;  %v4938_v8 = vpack.c.b16 %v2310_v61, %v2310_v61  ;;  %v2614_v15 = vrot.slane %v4283_v62, 1  ;;  %v1318_v39 = vunpack.c.l.b16 %v1061_v28 }
 0x194   : > { %v1847_v12 = vpack.c.b16 %v1831_v5, %v1831_v5  ;;  %v2347_v18 = vrot.slane %v2345_v4, 1  ;;  %v2105_v46 = vrot.slane %v4259_v31, 1  ;;  %v4237_v5 = vld [vmem:[#allocation2 + $0x18] sm:$0xe] }
 0x195   : > { %v637_v13 = vor.u32 %v635_v60, %v634_v7  ;;  %v639_v1 = vrot.slane %v634_v7, 4  ;;  %v2615_v16 = vrot.slane %v4938_v8, 1  ;;  %v1334_v56 = vpack.c.b16 %v1318_v39, %v1318_v39 }
 0x196   : > { %v512_v19 = vpop.trf.xlu2  ;;  %v1882_v21 = vshll.u32 %v1847_v12, 16  ;;  %v4954_v32 = vor.u32 %v2347_v18, %v2343_v26  ;;  %v2106_v36 = vrot.slane %v1847_v12, 1  ;;  %v2350_v18 = vshll.u32 %v4938_v8, 16 }
 0x197   : > { %v638_v22 = vsel %vm4886_vm8, %v630_v6, %v637_v13  ;;  %v934_v23 = vsel %vm4891_vm9, %v639_v1, %v933_v9  ;;  %v2616_v24 = vsel %vm1621_vm3, %v2614_v15, %v2615_v16  ;;  %v560_v25 = vpack.c.bf16 %v512_v19, %v512_v19  ;;  %v4409_v38 = vld [vmem:[#allocation2 + $0x24] sm:$0xe]  ;;  %v940_v13 = vld [vmem:[#allocation2 + $0x38] sm:$0x1] }
 0x198   : > { %932 = vst.msk [vmem:[#allocation2 + $0x28] sm:$0xf] %vm434_vm0, %v638_v22  ;;  %4016 = vmatmul.msk.bf16.vlgmr.msrb.gmra.mxu0 %vm2662_vm10, %v2616_v24  ;;  %1784 = vrot.lane.b32.xlu1 %v4931_v52, %s4556_s11  ;;  %v1884_v33 = vrot.slane %v1882_v21, 1  ;;  %v2107_v49 = vsel %vm1621_vm3, %v2105_v46, %v2106_v36  ;;  %v4238_v9 = vor.u32 %v4237_v5, %v4236_v54  ;;  %v1629_v15 = vrot.slane %v1334_v56, 1  ;;  %v4521_v54 = vld [vmem:[#allocation2 + $0x24] sm:$0xe] }
 0x199   : > { %935 = vst [vmem:[#allocation2 + $0x2c] sm:$0x1] %v934_v23  ;;  %1672 = vrot.lane.b32.xlu0 %v1627_v27, %s4555_s21  ;;  %v641_v29 = vshrl.u32 %v560_v25, 16  ;;  %v644_v30 = vshll.u32 %v560_v25, 16  ;;  %v4412_v27 = vld [vmem:[#allocation2 + $0x24] sm:$0xe] }
 0x19a   : > { %v4958_v43 = vsel %vm1348_vm2, %v4954_v32, %v1884_v33  ;;  %v1628_v24 = vrot.slane %v4238_v9, 1  ;;  %v2352_v33 = vrot.slane %v2350_v18, 1 }
 0x19b   : > { %v643_v34 = vrot.slane %v641_v29, 7 }
 0x19c   : > { %v1630_v31 = vsel %vm1621_vm3, %v1628_v24, %v1629_v15 }
 0x19d   : > { %v646_v44 = vor.u32 %v644_v30, %v643_v34  ;;  %v647_v10 = vrot.slane %v643_v34, 4  ;;  %v1381_v34 = vshll.u32 %v1334_v56, 16  ;;  %v2353_v56 = vsel %vm1348_vm2, %v4954_v32, %v2352_v33 }
 0x19e   : > { %v513_v47 = vpop.trf.xlu2 }
 0x19f   : > { %v937_v48 = vsel %vm4874_vm5, %v646_v44, %v936_v41  ;;  %v561_v50 = vpack.c.bf16 %v513_v47, %v513_v47  ;;  %v4963_v51 = vld [vmem:[#allocation2 + $0x24] sm:$0xff]  }
 0x1a0   : > { %v4408_v53 = vld [vmem:[#allocation2 + $0x24] sm:$0xf0]  ;;  %938 = vst [vmem:[#allocation2 + $0x30] sm:$0xf] %v937_v48  ;;  %v1189_v60 = vld [vmem:[#allocation2 + $0x2c] sm:$0x1]  ;;  %2264 = vrot.lane.b32.xlu1 %v4963_v51, %s4555_s21 }
 0x1a1   : > { %v1095_v57 = vld [vmem:[#allocation2 + $0x24] sm:$0xff]   ;;  %v1125_v61 = vld [vmem:[#allocation2 + $0x2c] sm:$0x1]  ;;  %2152 = vrot.lane.b32.xlu0 %v2107_v49, %s4554_s12  ;;  %v649_v62 = vshrl.u32 %v561_v50, 16  ;;  %v652_v2 = vshll.u32 %v561_v50, 16  ;;  %v2311_v4 = vunpack.c.l.b16 %v1189_v60  ;;  %v4410_v7 = vor.u32 %v4409_v38, %v4408_v53 }
 0x1a2   : > { %v4965_v58 = vld [vmem:[#allocation2 + $0x24] sm:$0xf0]  ;;  %v1832_v6 = vunpack.c.l.b16 %v1125_v61  ;;  %v1889_v16 = vshll.u32 %v1095_v57, 16  ;;  %v2357_v23 = vshll.u32 %v4963_v51, 16  ;;  %v1887_v25 = vshrl.u32 %v1095_v57, 16 }
 0x1a3   : > { %v651_v11 = vrot.slane %v649_v62, 7  ;;  %v2327_v12 = vpack.c.b16 %v2311_v4, %v2311_v4  ;;  %v2617_v1 = vrot.slane %v4410_v7, 1  ;;  %v2355_v41 = vshrl.u32 %v4963_v51, 16  ;;  %v943_v53 = vld [vmem:[#allocation2 + $0x3c] sm:$0xf] }
 0x1a4   : > { %v4971_v22 = vpack.c.b16 %v1832_v6, %v1832_v6  ;;  %v1891_v17 = vrot.slane %v1889_v16, 1  ;;  %v2359_v44 = vrot.slane %v2357_v23, 1  ;;  %v1383_v50 = vrot.slane %v1381_v34, 1  ;;  %v4520_v51 = vld [vmem:[#allocation2 + $0x24] sm:$0xf0] }
 0x1a5   : > { %v654_v19 = vor.u32 %v652_v2, %v651_v11  ;;  %v656_v20 = vrot.slane %v651_v11, 4  ;;  %v2618_v21 = vrot.slane %v2327_v12, 1  ;;  %v2362_v46 = vshll.u32 %v2327_v12, 16  ;;  %v4989_v2 = vld [vmem:[#allocation2 + $0x24] sm:$0xff]  }
 0x1a6   : > { %v514_v26 = vpop.trf.xlu2  ;;  %v1894_v39 = vshll.u32 %v4971_v22, 16  ;;  %v1892_v49 = vor.u32 %v1891_v17, %v1887_v25  ;;  %v4413_v61 = vor.u32 %v4412_v27, %v4965_v58  ;;  %v2360_v4 = vor.u32 %v2359_v44, %v2355_v41  ;;  %v1062_v58 = vld [vmem:[#allocation2 + $0x2c] sm:$0x1] }
 0x1a7   : > { %v655_v28 = vsel %vm4886_vm8, %v647_v10, %v654_v19  ;;  %v941_v29 = vsel %vm4891_vm9, %v656_v20, %v940_v13  ;;  %v2619_v8 = vsel %vm1621_vm3, %v2617_v1, %v2618_v21  ;;  %v562_v30 = vpack.c.bf16 %v514_v26, %v514_v26  ;;  %v4285_v62 = vld [vmem:[#allocation2 + $0x30] sm:$0xe] }
 0x1a8   : > { %939 = vst.msk [vmem:[#allocation2 + $0x34] sm:$0xf] %vm434_vm0, %v655_v28  ;;  %4017 = vmatmul.msk.bf16.gmra.mxu0 %vm2662_vm10, %v2619_v8  ;;  %v1896_v48 = vrot.slane %v1894_v39, 1  ;;  %1786 = vrot.lane.b32.xlu1 %v1095_v57, %s4556_s11  ;;  %v2364_v5 = vrot.slane %v2362_v46, 1  ;;  %v1384_v12 = vsel %vm1348_vm2, %v4954_v32, %v1383_v50  ;;  %v2108_v16 = vrot.slane %v4413_v61, 1  ;;  %v4095_v50 = vld [vmem:[%s6224_s3 + $0x38] sm:$0xff] }
 0x1a9   : > { %942 = vst [vmem:[#allocation2 + $0x38] sm:$0x1] %v941_v29  ;;  %1674 = vrot.lane.b32.xlu0 %v1630_v31, %s4555_s21  ;;  %v658_v36 = vshrl.u32 %v562_v30, 16  ;;  %v661_v38 = vshll.u32 %v562_v30, 16  ;;  %v2109_v29 = vrot.slane %v4971_v22, 1  ;;  %v1319_v30 = vunpack.c.l.b16 %v1062_v58  ;;  %3101 = vmatpush.bf16.msra.mxu2 %v4095_v50 }
 0x1aa   : > { %v4993_v57 = vsel %vm1348_vm2, %v1892_v49, %v1896_v48  ;;  %v2365_v23 = vsel %vm1348_vm2, %v2360_v4, %v2364_v5  ;;  %v947_v8 = vld [vmem:[#allocation2 + $0x44] sm:$0x1] }
 0x1ab   : > { %v660_v47 = vrot.slane %v658_v36, 7  ;;  %v1335_v48 = vpack.c.b16 %v1319_v30, %v1319_v30 }
 0x1ad   : > { %v663_v60 = vor.u32 %v661_v38, %v660_v47  ;;  %v664_v24 = vrot.slane %v660_v47, 4  ;;  %v4522_v38 = vor.u32 %v4521_v54, %v4520_v51  ;;  %v2110_v47 = vsel %vm1621_vm3, %v2108_v16, %v2109_v29 }
 0x1ae   : > { %2534 = vrot.lane.b32.xlu2 %v2353_v56, %s4556_s11  ;;  %v515_v6 = vpop.trf.xlu2  ;;  %v1388_v51 = vshll.u32 %v4989_v2, 16 }
 0x1af   : > { %v944_v7 = vsel %vm4874_vm5, %v663_v60, %v943_v53  ;;  %v4284_v9 = vld [vmem:[#allocation2 + $0x30] sm:$0xf0]  ;;  %v563_v11 = vpack.c.bf16 %v515_v6, %v515_v6  ;;  %v1631_v56 = vrot.slane %v4522_v38, 1 }
 0x1b0   : > { %v4997_v10 = vld [vmem:[#allocation2 + $0x30] sm:$0xff]   ;;  %945 = vst [vmem:[#allocation2 + $0x3c] sm:$0xf] %v944_v7  ;;  %v1190_v13 = vld [vmem:[#allocation2 + $0x38] sm:$0x1]  ;;  %v4286_v1 = vor.u32 %v4285_v62, %v4284_v9  ;;  %2536 = vrot.lane.b32.xlu1 %v2365_v23, %s4556_s11  ;;  %v1632_v62 = vrot.slane %v1335_v48, 1 }
 0x1b1   : > { %v2369_v15 = vshll.u32 %v4997_v10, 16  ;;  %1545 = vrot.lane.b32.xlu0 %v1384_v12, %s4554_s12  ;;  %v2312_v18 = vunpack.c.l.b16 %v1190_v13  ;;  %v666_v19 = vshrl.u32 %v563_v11, 16  ;;  %v669_v20 = vshll.u32 %v563_v11, 16  ;;  %v1126_v21 = vld [vmem:[#allocation2 + $0x38] sm:$0x1]  ;;  %v4094_v6 = vld [vmem:[%s6224_s3 + $0x30] sm:$0xff] }
 0x1b2   : > { %v2367_v25 = vshrl.u32 %v4997_v10, 16  ;;  %v1833_v17 = vunpack.c.l.b16 %v1126_v21  ;;  %v2620_v32 = vrot.slane %v4286_v1, 1  ;;  %v1386_v9 = vshrl.u32 %v4989_v2, 16  ;;  %v950_v13 = vld [vmem:[#allocation2 + $0x48] sm:$0xf]  ;;  %3102 = vmatpush.bf16.msra.mxu2 %v4094_v6 }
 0x1b3   : > { %v5005_v26 = vpack.c.b16 %v2312_v18, %v2312_v18  ;;  %v2371_v27 = vrot.slane %v2369_v15, 1  ;;  %v668_v28 = vrot.slane %v666_v19, 7  ;;  %v1393_v11 = vshll.u32 %v1335_v48, 16 }
 0x1b4   : > { %v5009_v31 = vpack.c.b16 %v1833_v17, %v1833_v17  ;;  %v1633_v16 = vsel %vm1621_vm3, %v1631_v56, %v1632_v62  ;;  %v1390_v18 = vrot.slane %v1388_v51, 1 }
 0x1b5   : > { %v2621_v33 = vrot.slane %v5005_v26, 1  ;;  %v671_v34 = vor.u32 %v669_v20, %v668_v28  ;;  %v673_v36 = vrot.slane %v668_v28, 4  ;;  %v5014_v44 = vor.u32 %v2371_v27, %v2367_v25 }
 0x1b6   : > { %v1906_v39 = vshll.u32 %v5009_v31, 16  ;;  %v516_v49 = vpop.trf.xlu2  ;;  %v1395_v28 = vrot.slane %v1393_v11, 1  ;;  %v2374_v29 = vshll.u32 %v5005_v26, 16 }
 0x1b7   : > { %v2622_v41 = vsel %vm1621_vm3, %v2620_v32, %v2621_v33  ;;  %v672_v46 = vsel %vm4886_vm8, %v664_v24, %v671_v34  ;;  %v948_v22 = vsel %vm4891_vm9, %v673_v36, %v947_v8  ;;  %v564_v54 = vpack.c.bf16 %v516_v49, %v516_v49  ;;  %v4524_v60 = vld [vmem:[#allocation2 + $0x3c] sm:$0xe]  ;;  %v4093_v24 = vld [vmem:[%s6224_s3 + $0x28] sm:$0xff]  ;;  %v4261_v8 = vld [vmem:[#allocation2 + $0x30] sm:$0xe] }
 0x1b8   : > { %4018 = vmatmul.msk.bf16.gmra.mxu0 %vm2662_vm10, %v2622_v41  ;;  %946 = vst.msk [vmem:[#allocation2 + $0x40] sm:$0xf] %vm434_vm0, %v672_v46  ;;  %v1908_v53 = vrot.slane %v1906_v39, 1  ;;  %2266 = vrot.lane.b32.xlu1 %v4997_v10, %s4555_s21  ;;  %v1391_v33 = vor.u32 %v1390_v18, %v1386_v9  ;;  %v4260_v34 = vld [vmem:[#allocation2 + $0x30] sm:$0xf0]  ;;  %v4092_v41 = vld [vmem:[%s6224_s3 + $0x20] sm:$0xff] }
 0x1b9   : > { %2154 = vrot.lane.b32.xlu0 %v2110_v47, %s4554_s12  ;;  %949 = vst [vmem:[#allocation2 + $0x44] sm:$0x1] %v948_v22  ;;  %v675_v4 = vshrl.u32 %v564_v54, 16  ;;  %v678_v5 = vshll.u32 %v564_v54, 16  ;;  %3103 = vmatpush.bf16.msra.mxu2 %v4093_v24  ;;  %v2376_v49 = vrot.slane %v2374_v29, 1  ;;  %v4262_v50 = vor.u32 %v4261_v8, %v4260_v34  ;;  %v4103_v9 = vld [vmem:[%s6224_s3 + $0x78] sm:$0xff] }
 0x1ba   : > { %v5029_v61 = vsel %vm1348_vm2, %v5014_v44, %v1908_v53  ;;  %v954_v54 = vld [vmem:[#allocation2 + $0x50] sm:$0x1]  ;;  %v1396_v56 = vsel %vm1348_vm2, %v1391_v33, %v1395_v28  ;;  %3190 = vmatpush.bf16.msra.mxu3 %v4103_v9  ;;  %v957_v8 = vld [vmem:[#allocation2 + $0x54] sm:$0xf] }
 0x1bb   : > { %v677_v7 = vrot.slane %v675_v4, 7  ;;  %v2111_v18 = vrot.slane %v4262_v50, 1  ;;  %v4090_v24 = vld [vmem:[%s6224_s3 + $0x10] sm:$0xff] }
 0x1bd   : > { %v680_v20 = vor.u32 %v678_v5, %v677_v7  ;;  %v681_v47 = vrot.slane %v677_v7, 4  ;;  %3104 = vmatpush.bf16.msra.mxu2 %v4092_v41  ;;  %v4091_v7 = vld [vmem:[%s6224_s3 + $0x18] sm:$0xff]  ;;  %v4089_v41 = vld [vmem:[%s6224_s3 + $0x8] sm:$0xff] }
 0x1be   : > { %v517_v23 = vpop.trf.xlu2 }
 0x1bf   : > { %v5038_v58 = vld [vmem:[#allocation2 + $0x3c] sm:$0xff]   ;;  %v951_v17 = vsel %vm4874_vm5, %v680_v20, %v950_v13  ;;  %v565_v32 = vpack.c.bf16 %v517_v23, %v517_v23  ;;  %v1063_v20 = vld [vmem:[#allocation2 + $0x38] sm:$0x1] }
 0x1c0   : > { %v4523_v12 = vld [vmem:[#allocation2 + $0x3c] sm:$0xf0]  ;;  %v1191_v19 = vld [vmem:[#allocation2 + $0x44] sm:$0x1]  ;;  %952 = vst [vmem:[#allocation2 + $0x48] sm:$0xf] %v951_v17  ;;  %1788 = vrot.lane.b32.xlu1 %v4997_v10, %s4556_s11  ;;  %v1320_v28 = vunpack.c.l.b16 %v1063_v20 }
 0x1c1   : > { %v5040_v1 = vld [vmem:[#allocation2 + $0x3c] sm:$0xff]   ;;  %1676 = vrot.lane.b32.xlu0 %v1633_v16, %s4555_s21  ;;  %v2313_v21 = vunpack.c.l.b16 %v1191_v19  ;;  %v4525_v25 = vor.u32 %v4524_v60, %v4523_v12  ;;  %v1127_v27 = vld [vmem:[#allocation2 + $0x44] sm:$0x1]  ;;  %v683_v38 = vshrl.u32 %v565_v32, 16  ;;  %v686_v39 = vshll.u32 %v565_v32, 16  ;;  %3105 = vmatpush.bf16.msra.mxu2 %v4091_v7 }
 0x1c2   : > { %v5042_v15 = vld [vmem:[#allocation2 + $0x3c] sm:$0xf0]  ;;  %v1913_v26 = vshll.u32 %v5040_v1, 16  ;;  %v1834_v22 = vunpack.c.l.b16 %v1127_v27  ;;  %v1911_v51 = vshrl.u32 %v5040_v1, 16  ;;  %v2377_v16 = vsel %vm1348_vm2, %v5014_v44, %v2376_v49  ;;  %v4239_v17 = vld [vmem:[#allocation2 + $0x30] sm:$0xf0] }
 0x1c3   : > { %v5052_v30 = vpack.c.b16 %v2313_v21, %v2313_v21  ;;  %v2623_v36 = vrot.slane %v4525_v25, 1  ;;  %v685_v48 = vrot.slane %v683_v38, 7  ;;  %v2112_v19 = vrot.slane %v5009_v31, 1  ;;  %v4102_v25 = vld [vmem:[%s6224_s3 + $0x70] sm:$0xff]  ;;  %v961_v7 = vld [vmem:[#allocation2 + $0x5c] sm:$0x1] }
 0x1c4   : > { %v1915_v4 = vrot.slane %v1913_v26, 1  ;;  %v5066_v5 = vpack.c.b16 %v1834_v22, %v1834_v22  ;;  %v4240_v31 = vld [vmem:[#allocation2 + $0x30] sm:$0xe]  ;;  %3191 = vmatpush.bf16.msra.mxu3 %v4102_v25  ;;  %v1336_v22 = vpack.c.b16 %v1320_v28, %v1320_v28 }
 0x1c5   : > { %v2624_v46 = vrot.slane %v5052_v30, 1  ;;  %v688_v60 = vor.u32 %v686_v39, %v685_v48  ;;  %v690_v62 = vrot.slane %v685_v48, 4  ;;  %3106 = vmatpush.bf16.msra.mxu2 %v4090_v24  ;;  %v2113_v34 = vsel %vm1621_vm3, %v2111_v18, %v2112_v19  ;;  %v4417_v18 = vld [vmem:[#allocation2 + $0x3c] sm:$0xf0] }
 0x1c6   : > { %v518_v6 = vpop.trf.xlu2  ;;  %v1918_v32 = vshll.u32 %v5066_v5, 16  ;;  %v1916_v27 = vor.u32 %v1915_v4, %v1911_v51  ;;  %v1635_v50 = vrot.slane %v1336_v22, 1  ;;  %v4100_v4 = vld [vmem:[%s6224_s3 + $0x60] sm:$0xff] }
 0x1c7   : > { %v2625_v53 = vsel %vm1621_vm3, %v2623_v36, %v2624_v46  ;;  %v689_v11 = vsel %vm4886_vm8, %v681_v47, %v688_v60  ;;  %v955_v12 = vsel %vm4891_vm9, %v690_v62, %v954_v54  ;;  %v566_v13 = vpack.c.bf16 %v518_v6, %v518_v6  ;;  %v4101_v46 = vld [vmem:[%s6224_s3 + $0x68] sm:$0xff] }
 0x1c8   : > { %4019 = vmatmul.msk.bf16.gmra.mxu0 %vm2662_vm10, %v2625_v53  ;;  %953 = vst.msk [vmem:[#allocation2 + $0x4c] sm:$0xf] %vm434_vm0, %v689_v11  ;;  %2538 = vrot.lane.b32.xlu1 %v2377_v16, %s4556_s11  ;;  %v1920_v33 = vrot.slane %v1918_v32, 1  ;;  %v4241_v36 = vor.u32 %v4240_v31, %v4239_v17  ;;  %v1405_v60 = vshll.u32 %v1336_v22, 16  ;;  %v2381_v6 = vshll.u32 %v5038_v58, 16  ;;  %v5115_v16 = vld [vmem:[#allocation2 + $0x3c] sm:$0xff]  }
 0x1c9   : > { %1547 = vrot.lane.b32.xlu0 %v1396_v56, %s4554_s12  ;;  %956 = vst [vmem:[#allocation2 + $0x50] sm:$0x1] %v955_v12  ;;  %v692_v21 = vshrl.u32 %v566_v13, 16  ;;  %v695_v23 = vshll.u32 %v566_v13, 16  ;;  %3107 = vmatpush.bf16.msra.mxu2 %v4089_v41  ;;  %v4088_v56 = vld [vmem:[%s6224_s3] sm:$0xff]  ;;  %v2379_v17 = vshrl.u32 %v5038_v58, 16 }
 0x1ca   : > { %v5099_v26 = vsel %vm1348_vm2, %v1916_v27, %v1920_v33  ;;  %3192 = vmatpush.bf16.msra.mxu3 %v4101_v46  ;;  %v1634_v49 = vrot.slane %v4241_v36, 1  ;;  %v4415_v11 = vld [vmem:[#allocation2 + $0x3c] sm:$0xe]  ;;  %v1407_v20 = vrot.slane %v1405_v60, 1  ;;  %v2383_v31 = vrot.slane %v2381_v6, 1 }
 0x1cb   : > { %v694_v29 = vrot.slane %v692_v21, 7  ;;  %v4418_v21 = vld [vmem:[#allocation2 + $0x3c] sm:$0xe]  ;;  %v1064_v27 = vld [vmem:[#allocation2 + $0x44] sm:$0x1]  ;;  %v2115_v41 = vrot.slane %v5066_v5, 1 }
 0x1cc   : > { %v1636_v9 = vsel %vm1621_vm3, %v1634_v49, %v1635_v50  ;;  %v4099_v32 = vld [vmem:[%s6224_s3 + $0x58] sm:$0xff]  ;;  %v1321_v36 = vunpack.c.l.b16 %v1064_v27  ;;  %v4419_v49 = vor.u32 %v4418_v21, %v4417_v18  ;;  %v1412_v50 = vshll.u32 %v5115_v16, 16  ;;  %v1542_v21 = vpop.permute.xlu0 %1541 }
 0x1cd   : > { %v697_v38 = vor.u32 %v695_v23, %v694_v29  ;;  %v698_v62 = vrot.slane %v694_v29, 4  ;;  %3108 = vmatpush.bf16.msra.mxu2 %v4088_v56  ;;  %v1410_v6 = vshrl.u32 %v5115_v16, 16 }
 0x1ce   : > { %v519_v39 = vpop.trf.xlu2  ;;  %3193 = vmatpush.bf16.msra.mxu3 %v4100_v4 }
 0x1cf   : > { %v958_v47 = vsel %vm4874_vm5, %v697_v38, %v957_v8  ;;  %v567_v48 = vpack.c.bf16 %v519_v39, %v519_v39  ;;  %v2384_v8 = vor.u32 %v2383_v31, %v2379_v17  ;;  %v964_v38 = vld [vmem:[#allocation2 + $0x60] sm:$0xf]  ;;  %v1671_v17 = vpop.permute.xlu1 %1670  ;;  %v5161_v31 = vld [vmem:[#allocation2 + $0x48] sm:$0xff]  }
 0x1d0   : > { %959 = vst [vmem:[#allocation2 + $0x54] sm:$0xf] %v958_v47  ;;  %2268 = vrot.lane.b32.xlu1 %v5038_v58, %s4555_s21  ;;  %v4098_v58 = vld [vmem:[%s6224_s3 + $0x50] sm:$0xff] }
 0x1d1   : > { %2156 = vrot.lane.b32.xlu0 %v2113_v34, %s4554_s12  ;;  %v700_v53 = vshrl.u32 %v567_v48, 16  ;;  %v703_v54 = vshll.u32 %v567_v48, 16  ;;  %4305 = vmatpush.bf16.msrb.mxu2 %v4883_v35  ;;  %v2386_v35 = vshll.u32 %v5052_v30, 16  ;;  %v4416_v34 = vor.u32 %v4415_v11, %v5042_v15 }
 0x1d2   : > { %3194 = vmatpush.bf16.msra.mxu3 %v4099_v32  ;;  %v1337_v15 = vpack.c.b16 %v1321_v36, %v1321_v36  ;;  %v4367_v32 = vld [vmem:[#allocation2] sm:$0xff]  }
 0x1d3   : > { %v702_v51 = vrot.slane %v700_v53, 7  ;;  %v2388_v33 = vrot.slane %v2386_v35, 1  ;;  %v2114_v48 = vrot.slane %v4416_v34, 1  ;;  %v1128_v35 = vld [vmem:[#allocation2 + $0x50] sm:$0x1]  ;;  %v2664_v27 = vsel %vm2662_vm10, %v4367_v32, %v1542_v21 }
 0x1d4   : > { %v1638_v4 = vrot.slane %v1337_v15, 1  ;;  %v1417_v11 = vshll.u32 %v1337_v15, 16 }
 0x1d5   : > { %v705_v12 = vor.u32 %v703_v54, %v702_v51  ;;  %v707_v13 = vrot.slane %v702_v51, 4  ;;  %4306 = vmatpush.bf16.msrb.mxu2 %v4898_v42  ;;  %v2389_v47 = vsel %vm1348_vm2, %v2384_v8, %v2388_v33  ;;  %v4096_v54 = vld [vmem:[%s6224_s3 + $0x40] sm:$0xff]  ;;  %v1637_v51 = vrot.slane %v4419_v49, 1  ;;  %v4264_v8 = vld [vmem:[#allocation2 + $0x48] sm:$0xe] }
 0x1d6   : > { %v520_v19 = vpop.trf.xlu2  ;;  %3195 = vmatpush.bf16.msra.mxu3 %v4098_v58 }
 0x1d7   : > { %v706_v23 = vsel %vm4886_vm8, %v698_v62, %v705_v12  ;;  %v962_v24 = vsel %vm4891_vm9, %v707_v13, %v961_v7  ;;  %v568_v25 = vpack.c.bf16 %v520_v19, %v520_v19  ;;  %v2116_v62 = vsel %vm1621_vm3, %v2114_v48, %v2115_v41  ;;  %v968_v7 = vld [vmem:[#allocation2 + $0x68] sm:$0x1] }
 0x1d8   : > { %960 = vst.msk [vmem:[#allocation2 + $0x58] sm:$0xf] %vm434_vm0, %v706_v23  ;;  %1790 = vrot.lane.b32.xlu1 %v5040_v1, %s4556_s11  ;;  %v1408_v1 = vsel %vm1348_vm2, %v5014_v44, %v1407_v20  ;;  %v4097_v44 = vld [vmem:[%s6224_s3 + $0x48] sm:$0xff]  ;;  %v1639_v20 = vsel %vm1621_vm3, %v1637_v51, %v1638_v4  ;;  %v2391_v4 = vshrl.u32 %v5161_v31, 16 }
 0x1d9   : > { %1678 = vrot.lane.b32.xlu0 %v1636_v9, %s4555_s21  ;;  %963 = vst [vmem:[#allocation2 + $0x5c] sm:$0x1] %v962_v24  ;;  %v709_v28 = vshrl.u32 %v568_v25, 16  ;;  %v712_v29 = vshll.u32 %v568_v25, 16  ;;  %v1414_v9 = vrot.slane %v1412_v50, 1  ;;  %v1419_v24 = vrot.slane %v1417_v11, 1 }
 0x1da   : > { %3196 = vmatpush.bf16.msra.mxu3 %v4097_v44 }
 0x1db   : > { %v711_v30 = vrot.slane %v709_v28, 7  ;;  %v1415_v23 = vor.u32 %v1414_v9, %v1410_v6  ;;  %v1835_v28 = vunpack.c.l.b16 %v1128_v35 }
 0x1dd   : > { %v714_v39 = vor.u32 %v712_v29, %v711_v30  ;;  %v715_v56 = vrot.slane %v711_v30, 4  ;;  %v1420_v25 = vsel %vm1348_vm2, %v1415_v23, %v1419_v24  ;;  %v2697_v29 = vsel %vm2695_vm11, %v2664_v27, %v1671_v17  ;;  %v4263_v30 = vld [vmem:[#allocation2 + $0x48] sm:$0xf0] }
 0x1de   : > { %v521_v42 = vpop.trf.xlu2  ;;  %3197 = vmatpush.bf16.msra.mxu3 %v4096_v54  ;;  %v5168_v34 = vpack.c.b16 %v1835_v28, %v1835_v28  ;;  %v4265_v36 = vor.u32 %v4264_v8, %v4263_v30  ;;  %v2393_v54 = vshll.u32 %v5161_v31, 16 }
 0x1df   : > { %v965_v46 = vsel %vm4874_vm5, %v714_v39, %v964_v38  ;;  %v569_v22 = vpack.c.bf16 %v521_v42, %v521_v42 }
 0x1e0   : > { %966 = vst [vmem:[#allocation2 + $0x60] sm:$0xf] %v965_v46  ;;  %2540 = vrot.lane.b32.xlu1 %v2389_v47, %s4556_s11  ;;  %v2117_v39 = vrot.slane %v4265_v36, 1  ;;  %v2118_v42 = vrot.slane %v5168_v34, 1  ;;  %v4242_v46 = vld [vmem:[#allocation2 + $0x48] sm:$0xf0] }
 0x1e1   : > { %1549 = vrot.lane.b32.xlu0 %v1408_v1, %s4554_s12  ;;  %v717_v53 = vshrl.u32 %v569_v22, 16  ;;  %v720_v5 = vshll.u32 %v569_v22, 16  ;;  %v1065_v1 = vld [vmem:[#allocation2 + $0x50] sm:$0x1]  ;;  %v4243_v22 = vld [vmem:[#allocation2 + $0x48] sm:$0xe] }
 0x1e2   : > { %v1322_v41 = vunpack.c.l.b16 %v1065_v1  ;;  %v1192_v47 = vld [vmem:[#allocation2 + $0x50] sm:$0x1]  ;;  %v2119_v48 = vsel %vm1621_vm3, %v2117_v39, %v2118_v42  ;;  %v4244_v49 = vor.u32 %v4243_v22, %v4242_v46  ;;  %v2395_v9 = vrot.slane %v2393_v54, 1  ;;  %v5201_v36 = vld [vmem:[#allocation2 + $0x54] sm:$0xf0] }
 0x1e3   : > { %v719_v60 = vrot.slane %v717_v53, 7  ;;  %v2314_v44 = vunpack.c.l.b16 %v1192_v47 }
 0x1e4   : > { %v1338_v15 = vpack.c.b16 %v1322_v41, %v1322_v41  ;;  %v5190_v23 = vor.u32 %v2395_v9, %v2391_v4  ;;  %v5207_v41 = vld [vmem:[#allocation2 + $0x54] sm:$0xf0] }
 0x1e5   : > { %v722_v12 = vor.u32 %v720_v5, %v719_v60  ;;  %v724_v13 = vrot.slane %v719_v60, 4  ;;  %v416_v5 = vpop.f32.mrf.mxu1 }
 0x1e6   : > { %v1641_v60 = vrot.slane %v1338_v15, 1  ;;  %v417_v21 = vadd.f32 %v416_v5, %v4749_v55 }
 0x1e7   : > { %v723_v18 = vsel %vm4886_vm8, %v715_v56, %v722_v12  ;;  %v969_v19 = vsel %vm4891_vm9, %v724_v13, %v968_v7  ;;  %v1640_v56 = vrot.slane %v4244_v49, 1 }
 0x1e8   : > { %967 = vst.msk [vmem:[#allocation2 + $0x64] sm:$0xf] %vm434_vm0, %v723_v18  ;;  %1680 = vrot.lane.b32.xlu1 %v1639_v20, %s4555_s21  ;;  %v427_v35 = vmax.f32 %v417_v21, 0.0 }
 0x1e9   : > { %2158 = vrot.lane.b32.xlu0 %v2116_v62, %s4554_s12  ;;  %970 = vst [vmem:[#allocation2 + $0x68] sm:$0x1] %v969_v19  ;;  %v5176_v62 = vpack.c.b16 %v2314_v44, %v2314_v44  ;;  %v1642_v12 = vsel %vm1621_vm3, %v1640_v56, %v1641_v60 }
 0x1eb   : > { %v2398_v13 = vshll.u32 %v5176_v62, 16 }
 0x1ed   : > { %v418_v17 = vpop.f32.mrf.mxu1 }
 0x1ee   : > { %v419_v28 = vadd.f32 %v418_v17, %v4772_v59  ;;  %v5205_v59 = vld [vmem:[#allocation2 + $0x54] sm:$0xff]  }
 0x1f0   : > { %2270 = vrot.lane.b32.xlu1 %v5161_v31, %s4555_s21  ;;  %v429_v30 = vmax.f32 %v419_v28, 0.0  ;;  %v4288_v28 = vld [vmem:[#allocation2 + $0x48] sm:$0xe] }
 0x1f1   : > { %1551 = vrot.lane.b32.xlu0 %v1420_v25, %s4554_s12  ;;  %v2400_v25 = vrot.slane %v2398_v13, 1 }
 0x1f2   : > { %v1783_v58 = vpop.permute.xlu0 %1782 }
 0x1f3   : > { %v2730_v33 = vsel %vm2728_vm12, %v2697_v29, %v1783_v58  ;;  %v2401_v32 = vsel %vm1348_vm2, %v5190_v23, %v2400_v25 }
 0x1f4   : > { %3109 = vmatmul.bf16.vlgmr.msra.gmra.mxu2 %v2730_v33  ;;  %v5199_v33 = vld [vmem:[#allocation2 + $0x54] sm:$0xff]  }
 0x1f5   : > { %v421_v58 = vpop.f32.mrf.mxu1 }
 0x1f6   : > { %v422_v1 = vadd.f32 %v421_v58, %v4787_v63 }
 0x1f8   : > { %1792 = vrot.lane.b32.xlu1 %v5161_v31, %s4556_s11  ;;  %v431_v42 = vmax.f32 %v422_v1, 0.0 }
 0x1fa   : > { %v2151_v38 = vpop.permute.xlu1 %2150 }
 0x1fb   : > { %v2779_v51 = vsel %vm2662_vm10, %v4926_v45, %v2151_v38 }
 0x1fd   : > { %v423_v46 = vpop.f32.mrf.mxu1 }
 0x200   : > { %2160 = vrot.lane.b32.xlu1 %v2119_v48, %s4554_s12  ;;  %v424_v48 = vadd.f32 %v423_v46, %v4810_v3 }
 0x202   : > { %v1544_v50 = vpop.permute.xlu1 %1543  ;;  %v2263_v53 = vpop.permute.xlu0 %2262 }
 0x203   : > { %v2826_v6 = vsel %vm2695_vm11, %v2779_v51, %v2263_v53  ;;  %v2666_v18 = vsel %vm2662_vm10, %v4908_v0, %v1544_v50  ;;  %v1429_v0 = vshll.u32 %v1338_v15, 16 }
 0x205   : > { %v1431_v29 = vrot.slane %v1429_v0, 1 }
 0x207   : > { %v1432_v8 = vsel %vm1348_vm2, %v5190_v23, %v1431_v29  ;;  %v2627_v29 = vrot.slane %v5176_v62, 1 }
 0x208   : > { %v2535_v7 = vpop.permute.xlu2 %2534  ;;  %1682 = vrot.lane.b32.xlu1 %v1642_v12, %s4555_s21 }
 0x209   : > { %v2858_v11 = vsel %vm2728_vm12, %v2826_v6, %v2535_v7 }
 0x20a   : > { %3198 = vmatmul.bf16.vlgmr.msra.gmra.mxu3 %v2858_v11  ;;  %v1785_v20 = vpop.permute.xlu1 %1784 }
 0x20b   : > { %v1673_v19 = vpop.permute.xlu0 %1672 }
 0x20c   : > { %v2699_v45 = vsel %vm2695_vm11, %v2666_v18, %v1673_v19 }
 0x20d   : > { %v2733_v24 = vsel %vm2728_vm12, %v2699_v45, %v1785_v20 }
 0x20e   : > { %3114 = vmatmul.bf16.gmra.mxu2 %v2733_v24 }
 0x210   : > { %2542 = vrot.lane.b32.xlu1 %v2401_v32, %s4556_s11 }
 0x212   : > { %v2265_v55 = vpop.permute.xlu1 %2264 }
 0x213   : > { %v2153_v27 = vpop.permute.xlu0 %2152  ;;  %522 = vxpose.xlu0.b32.start [1/4] (short) %v427_v35, 128 }
 0x214   : > { %v2782_v63 = vsel %vm2662_vm10, %v4958_v43, %v2153_v27  ;;  %v4287_v27 = vld [vmem:[#allocation2 + $0x48] sm:$0xf0] }
 0x215   : > { %v2828_v49 = vsel %vm2695_vm11, %v2782_v63, %v2265_v55 }
 0x218   : > { %1553 = vrot.lane.b32.xlu1 %v1432_v8, %s4554_s12 }
 0x21a   : > { %v1787_v39 = vpop.permute.xlu1 %1786 }
 0x21b   : > { %v1675_v38 = vpop.permute.xlu0 %1674  ;;  %523 = vxpose.xlu0.b32.cont [2/4] (short) %v429_v30, 128 }
 0x220   : > { %2272 = vrot.lane.b32.xlu1 %v5199_v33, %s4555_s21 }
 0x222   : > { %v2537_v50 = vpop.permute.xlu1 %2536 }
 0x223   : > { %v1546_v22 = vpop.permute.xlu0 %1545  ;;  %524 = vxpose.xlu0.b32.cont [3/4] (short) %v431_v42, 128  ;;  %v2861_v53 = vsel %vm2728_vm12, %v2828_v49, %v2537_v50  ;;  %v4421_v49 = vld [vmem:[#allocation2 + $0x54] sm:$0xe] }
 0x224   : > { %v2668_v47 = vsel %vm2662_vm10, %v4931_v52, %v1546_v22  ;;  %3203 = vmatmul.bf16.gmra.mxu3 %v2861_v53  ;;  %v433_v52 = vmax.f32 %v424_v48, 0.0 }
 0x225   : > { %v2701_v15 = vsel %vm2695_vm11, %v2668_v47, %v1675_v38  ;;  %v1930_v47 = vshll.u32 %v5168_v34, 16 }
 0x226   : > { %v2736_v44 = vsel %vm2728_vm12, %v2701_v15, %v1787_v39  ;;  %v1193_v15 = vld [vmem:[#allocation2 + $0x5c] sm:$0x1] }
 0x227   : > { %3119 = vmatmul.bf16.gmra.mxu2 %v2736_v44  ;;  %v1932_v63 = vrot.slane %v1930_v47, 1  ;;  %v2315_v50 = vunpack.c.l.b16 %v1193_v15 }
 0x228   : > { %1794 = vrot.lane.b32.xlu1 %v5205_v59, %s4556_s11 }
 0x229   : > { %v1933_v44 = vsel %vm1348_vm2, %v5190_v23, %v1932_v63  ;;  %v5252_v53 = vpack.c.b16 %v2315_v50, %v2315_v50 }
 0x22a   : > { %v2267_v3 = vpop.permute.xlu1 %2266 }
 0x22b   : > { %v2155_v5 = vpop.permute.xlu0 %2154  ;;  %525 = vxpose.xlu0.b32.end [4/4] (short) %v433_v52, 128  ;;  %v2630_v34 = vrot.slane %v5252_v53, 1 }
 0x22c   : > { %v2785_v51 = vsel %vm2662_vm10, %v4993_v57, %v2155_v5 }
 0x22d   : > { %v2830_v6 = vsel %vm2695_vm11, %v2785_v51, %v2267_v3  ;;  %v1194_v51 = vld [vmem:[#allocation2 + $0x68] sm:$0x1] }
 0x232   : > { %v1789_v43 = vpop.permute.xlu1 %1788 }
 0x233   : > { %v1677_v54 = vpop.permute.xlu0 %1676 }
 0x23a   : > { %v2539_v9 = vpop.permute.xlu1 %2538 }
 0x23b   : > { %v1548_v56 = vpop.permute.xlu0 %1547  ;;  %v2864_v11 = vsel %vm2728_vm12, %v2830_v6, %v2539_v9  ;;  %v4290_v6 = vld [vmem:[#allocation2 + $0x60] sm:$0xf0] }
 0x23c   : > { %v2670_v60 = vsel %vm2662_vm10, %v4989_v2, %v1548_v56  ;;  %3208 = vmatmul.bf16.gmra.mxu3 %v2864_v11 }
 0x23d   : > { %v2703_v4 = vsel %vm2695_vm11, %v2670_v60, %v1677_v54 }
 0x23e   : > { %v2739_v7 = vsel %vm2728_vm12, %v2703_v4, %v1789_v43  ;;  %v2316_v4 = vunpack.c.l.b16 %v1194_v51 }
 0x23f   : > { %3124 = vmatmul.bf16.gmra.mxu2 %v2739_v7  ;;  %v4291_v7 = vld [vmem:[#allocation2 + $0x60] sm:$0xe] }
 0x240   : > { %v5266_v9 = vpack.c.b16 %v2316_v4, %v2316_v4  ;;  %v4292_v11 = vor.u32 %v4291_v7, %v4290_v6 }
 0x242   : > { %v2269_v13 = vpop.permute.xlu1 %2268 }
 0x243   : > { %v2157_v12 = vpop.permute.xlu0 %2156 }
 0x244   : > { %v2788_v57 = vsel %vm2662_vm10, %v5029_v61, %v2157_v12  ;;  %v2632_v12 = vrot.slane %v4292_v11, 1 }
 0x245   : > { %v2832_v21 = vsel %vm2695_vm11, %v2788_v57, %v2269_v13  ;;  %v2633_v13 = vrot.slane %v5266_v9, 1  ;;  %v1935_v57 = vshrl.u32 %v5205_v59, 16 }
 0x24a   : > { %v1791_v19 = vpop.permute.xlu1 %1790 }
 0x24b   : > { %v1679_v18 = vpop.permute.xlu0 %1678 }
 0x252   : > { %v2541_v25 = vpop.permute.xlu1 %2540 }
 0x253   : > { %v1550_v20 = vpop.permute.xlu0 %1549  ;;  %v2867_v17 = vsel %vm2728_vm12, %v2832_v21, %v2541_v25 }
 0x254   : > { %v2672_v2 = vsel %vm2662_vm10, %v4997_v10, %v1550_v20  ;;  %3213 = vmatmul.bf16.gmra.mxu3 %v2867_v17  ;;  %v4289_v10 = vor.u32 %v4288_v28, %v4287_v27  ;;  %v1937_v20 = vshll.u32 %v5205_v59, 16 }
 0x255   : > { %v2705_v45 = vsel %vm2695_vm11, %v2672_v2, %v1679_v18  ;;  %v1129_v18 = vld [vmem:[#allocation2 + $0x5c] sm:$0x1] }
 0x256   : > { %v2742_v24 = vsel %vm2728_vm12, %v2705_v45, %v1791_v19  ;;  %v2626_v55 = vrot.slane %v4289_v10, 1  ;;  %v2634_v19 = vsel %vm1621_vm3, %v2632_v12, %v2633_v13  ;;  %v1939_v45 = vrot.slane %v1937_v20, 1  ;;  %v971_v10 = vld [vmem:[#allocation2 + $0x6c] sm:$0xf] }
 0x257   : > { %3129 = vmatmul.bf16.gmra.mxu2 %v2742_v24 }
 0x258   : > { %v2628_v30 = vsel %vm1621_vm3, %v2626_v55, %v2627_v29  ;;  %v1940_v17 = vor.u32 %v1939_v45, %v1935_v57 }
 0x259   : > { %4020 = vmatmul.msk.bf16.gmra.mxu0 %vm2662_vm10, %v2628_v30 }
 0x25a   : > { %v1681_v32 = vpop.permute.xlu1 %1680 }
 0x25b   : > { %v2159_v35 = vpop.permute.xlu0 %2158 }
 0x25c   : > { %v2791_v62 = vsel %vm2662_vm10, %v5099_v26, %v2159_v35  ;;  %v4422_v26 = vor.u32 %v4421_v49, %v5201_v36  ;;  %v978_v49 = vld [vmem:[#allocation2 + $0x78] sm:$0xf] }
 0x25e   : > { %v2629_v54 = vrot.slane %v4422_v26, 1 }
 0x260   : > { %v2631_v43 = vsel %vm1621_vm3, %v2629_v54, %v2630_v34 }
 0x262   : > { %v2271_v0 = vpop.permute.xlu1 %2270 }
 0x263   : > { %v1552_v61 = vpop.permute.xlu0 %1551  ;;  %v2834_v46 = vsel %vm2695_vm11, %v2791_v62, %v2271_v0 }
 0x264   : > { %v2674_v58 = vsel %vm2662_vm10, %v5115_v16, %v1552_v61 }
 0x265   : > { %v2707_v38 = vsel %vm2695_vm11, %v2674_v58, %v1681_v32 }
 0x269   : > { %4021 = vmatmul.msk.bf16.gmra.mxu0 %vm2662_vm10, %v2631_v43 }
 0x26a   : > { %v1793_v8 = vpop.permute.xlu1 %1792 }
 0x26b   : > { %v2745_v1 = vsel %vm2728_vm12, %v2707_v38, %v1793_v8  ;;  %v975_v38 = vld [vmem:[#allocation2 + $0x74] sm:$0x1] }
 0x26c   : > { %3134 = vmatmul.bf16.gmra.mxu2 %v2745_v1 }
 0x272   : > { %v2161_v39 = vpop.permute.xlu1 %2160 }
 0x273   : > { %v2794_v52 = vsel %vm2662_vm10, %v1933_v44, %v2161_v39 }
 0x279   : > { %4022 = vmatmul.msk.bf16.gmra.mxu0 %vm2662_vm10, %v2634_v19 }
 0x27a   : > { %v1683_v42 = vpop.permute.xlu1 %1682 }
 0x282   : > { %v2543_v22 = vpop.permute.xlu1 %2542 }
 0x283   : > { %v2870_v16 = vsel %vm2728_vm12, %v2834_v46, %v2543_v22 }
 0x284   : > { %3218 = vmatmul.bf16.gmra.mxu3 %v2870_v16 }
 0x28a   : > { %v1554_v48 = vpop.permute.xlu1 %1553 }
 0x28b   : > { %v2676_v23 = vsel %vm2662_vm10, %v5161_v31, %v1554_v48  ;;  %v1836_v31 = vunpack.c.l.b16 %v1129_v18 }
 0x28c   : > { %v2709_v60 = vsel %vm2695_vm11, %v2676_v23, %v1683_v42 }
 0x28d   : > { %v5272_v2 = vpack.c.b16 %v1836_v31, %v1836_v31 }
 0x28f   : > { %v1942_v21 = vshll.u32 %v5272_v2, 16 }
 0x291   : > { %v1944_v25 = vrot.slane %v1942_v21, 1 }
 0x292   : > { %v2273_v5 = vpop.permute.xlu1 %2272 }
 0x293   : > { %v5257_v3 = vsel %vm2695_vm11, %v2794_v52, %v2273_v5  ;;  %v5277_v32 = vsel %vm1348_vm2, %v1940_v17, %v1944_v25  ;;  %v982_v25 = vld [vmem:[#allocation2 + $0x80] sm:$0x1] }
 0x29a   : > { %v1795_v56 = vpop.permute.xlu1 %1794 }
 0x29b   : > { %v2748_v36 = vsel %vm2728_vm12, %v2709_v60, %v1795_v56 }
 0x29c   : > { %3139 = vmatmul.bf16.gmra.mxu2 %v2748_v36 }
 0x2b7   : > { %v538_v24 = vpop.trf.xlu0 }
 0x2b8   : > { %v570_v35 = vpack.c.bf16 %v538_v24, %v538_v24 }
 0x2ba   : > { %v726_v0 = vshrl.u32 %v570_v35, 16  ;;  %v729_v28 = vshll.u32 %v570_v35, 16 }
 0x2bc   : > { %v728_v27 = vrot.slane %v726_v0, 7 }
 0x2be   : > { %v731_v29 = vor.u32 %v729_v28, %v728_v27  ;;  %v732_v1 = vrot.slane %v728_v27, 4 }
 0x2bf   : > { %v539_v61 = vpop.trf.xlu0 }
 0x2c0   : > { %v972_v55 = vsel %vm4874_vm5, %v731_v29, %v971_v10  ;;  %v571_v59 = vpack.c.bf16 %v539_v61, %v539_v61 }
 0x2c1   : > { %973 = vst [vmem:[#allocation2 + $0x6c] sm:$0xf] %v972_v55 }
 0x2c2   : > { %v734_v58 = vshrl.u32 %v571_v59, 16  ;;  %v737_v8 = vshll.u32 %v571_v59, 16 }
 0x2c4   : > { %v736_v30 = vrot.slane %v734_v58, 7 }
 0x2c6   : > { %v739_v39 = vor.u32 %v737_v8, %v736_v30  ;;  %v741_v42 = vrot.slane %v736_v30, 4 }
 0x2c7   : > { %v540_v62 = vpop.trf.xlu0 }
 0x2c8   : > { %v740_v46 = vsel %vm4886_vm8, %v732_v1, %v739_v39  ;;  %v976_v22 = vsel %vm4891_vm9, %v741_v42, %v975_v38  ;;  %v572_v16 = vpack.c.bf16 %v540_v62, %v540_v62  ;;  %v1147_v15 = vld [vmem:[#allocation2 + $0x6c] sm:$0xe] }
 0x2c9   : > { %974 = vst.msk [vmem:[#allocation2 + $0x70] sm:$0xf] %vm434_vm0, %v740_v46  ;;  %v4424_v44 = vld [vmem:[#allocation2 + $0x6c] sm:$0xe]  ;;  %v2078_v52 = vunpack.c.l.b16 %v1147_v15 }
 0x2ca   : > { %977 = vst [vmem:[#allocation2 + $0x74] sm:$0x1] %v976_v22  ;;  %v743_v47 = vshrl.u32 %v572_v16, 16  ;;  %v746_v48 = vshll.u32 %v572_v16, 16  ;;  %v1084_v16 = vld [vmem:[#allocation2 + $0x6c] sm:$0xe] }
 0x2cc   : > { %v745_v63 = vrot.slane %v743_v47, 7 }
 0x2ce   : > { %v748_v50 = vor.u32 %v746_v48, %v745_v63  ;;  %v749_v5 = vrot.slane %v745_v63, 4 }
 0x2cf   : > { %v541_v26 = vpop.trf.xlu0 }
 0x2d0   : > { %v979_v54 = vsel %vm4874_vm5, %v748_v50, %v978_v49  ;;  %v573_v34 = vpack.c.bf16 %v541_v26, %v541_v26  ;;  %v1170_v43 = vld [vmem:[#allocation2 + $0x6c] sm:$0xff]  }
 0x2d1   : > { %v4423_v23 = vld [vmem:[#allocation2 + $0x6c] sm:$0xf0]  ;;  %980 = vst [vmem:[#allocation2 + $0x78] sm:$0xf] %v979_v54  ;;  %v1131_v36 = vld [vmem:[#allocation2 + $0x74] sm:$0x1]  ;;  %2276 = vrot.lane.b32.xlu1 %v1170_v43, %s4555_s21  ;;  %v1598_v54 = vunpack.c.l.b16 %v1084_v16 }
 0x2d2   : > { %v5288_v56 = vld [vmem:[#allocation2 + $0x6c] sm:$0xff]   ;;  %v1195_v4 = vld [vmem:[#allocation2 + $0x74] sm:$0x1]  ;;  %v751_v7 = vshrl.u32 %v573_v34, 16  ;;  %v754_v11 = vshll.u32 %v573_v34, 16  ;;  %v1838_v12 = vunpack.c.l.b16 %v1131_v36  ;;  %v4425_v31 = vor.u32 %v4424_v44, %v4423_v23 }
 0x2d3   : > { %v5290_v60 = vld [vmem:[#allocation2 + $0x6c] sm:$0xff]   ;;  %v1751_v51 = vunpack.c.h.b16 %v5288_v56  ;;  %v1270_v6 = vunpack.c.l.b16 %v5288_v56  ;;  %v2317_v13 = vunpack.c.l.b16 %v1195_v4  ;;  %v1068_v18 = vld [vmem:[#allocation2 + $0x74] sm:$0x1]  ;;  %v2429_v17 = vshll.u32 %v1170_v43, 16 }
 0x2d4   : > { %v1271_v20 = vunpack.c.h.b16 %v5290_v60  ;;  %v753_v57 = vrot.slane %v751_v7, 7  ;;  %v5295_v45 = vpack.c.b16 %v1838_v12, %v1838_v12  ;;  %v1325_v24 = vunpack.c.l.b16 %v1068_v18 }
 0x2d5   : > { %v2094_v19 = vpack.c.b16 %v1751_v51, %v2078_v52  ;;  %v2333_v21 = vpack.c.b16 %v2317_v13, %v2317_v13  ;;  %v2635_v0 = vrot.slane %v4425_v31, 1  ;;  %v2427_v27 = vshrl.u32 %v1170_v43, 16 }
 0x2d6   : > { %v756_v28 = vor.u32 %v754_v11, %v753_v57  ;;  %v758_v10 = vrot.slane %v753_v57, 4  ;;  %v2127_v29 = vrot.slane %v5295_v45, 1  ;;  %v2431_v59 = vrot.slane %v2429_v17, 1 }
 0x2d7   : > { %v2126_v35 = vrot.slane %v2094_v19, 1  ;;  %v2636_v61 = vrot.slane %v2333_v21, 1  ;;  %v542_v55 = vpop.trf.xlu0  ;;  %v2434_v58 = vshll.u32 %v2333_v21, 16  ;;  %v5299_v30 = vpack.c.b16 %v1271_v20, %v1270_v6 }
 0x2d8   : > { %v5301_v8 = vpack.c.b16 %v1325_v24, %v1325_v24  ;;  %v757_v38 = vsel %vm4886_vm8, %v749_v5, %v756_v28  ;;  %v983_v1 = vsel %vm4891_vm9, %v758_v10, %v982_v25  ;;  %v574_v39 = vpack.c.bf16 %v542_v55, %v542_v55  ;;  %v985_v5 = vld [vmem:[#allocation2 + $0x84] sm:$0xf]  ;;  %v4294_v56 = vld [vmem:[#allocation2 + $0x78] sm:$0xe] }
 0x2d9   : > { %v2128_v42 = vsel %vm1621_vm3, %v2126_v35, %v2127_v29  ;;  %981 = vst.msk [vmem:[#allocation2 + $0x7c] sm:$0xf] %vm434_vm0, %v757_v38  ;;  %v2637_v62 = vsel %vm1621_vm3, %v2635_v0, %v2636_v61  ;;  %v2432_v46 = vor.u32 %v2431_v59, %v2427_v27  ;;  %v2436_v22 = vrot.slane %v2434_v58, 1  ;;  %v989_v29 = vld [vmem:[#allocation2 + $0x8c] sm:$0x1] }
 0x2da   : > { %2166 = vrot.lane.b32.xlu2 %v2128_v42, %s4554_s12  ;;  %984 = vst [vmem:[#allocation2 + $0x80] sm:$0x1] %v983_v1  ;;  %v760_v47 = vshrl.u32 %v574_v39, 16  ;;  %v763_v48 = vshll.u32 %v574_v39, 16  ;;  %4023 = vmatmul.msk.bf16.gmra.mxu0 %vm2662_vm10, %v2637_v62  ;;  %v1460_v63 = vshll.u32 %v5299_v30, 16  ;;  %v1465_v15 = vshll.u32 %v5301_v8, 16 }
 0x2db   : > { %v2437_v49 = vsel %vm1348_vm2, %v2432_v46, %v2436_v22  ;;  %v1750_v44 = vunpack.c.l.b16 %v5290_v60  ;;  %v1458_v26 = vshrl.u32 %v5299_v30, 16  ;;  %v1614_v6 = vpack.c.b16 %v1271_v20, %v1598_v54  ;;  %v4270_v20 = vld [vmem:[#allocation2 + $0x78] sm:$0xe]  ;;  %v4427_v38 = vld [vmem:[#allocation2 + $0x54] sm:$0xe] }
 0x2dc   : > { %v762_v50 = vrot.slane %v760_v47, 7  ;;  %v1462_v52 = vrot.slane %v1460_v63, 1  ;;  %2548 = vrot.lane.b32.xlu1 %v2437_v49, %s4556_s11  ;;  %v1467_v23 = vrot.slane %v1465_v15, 1  ;;  %v1966_v49 = vshll.u32 %v5295_v45, 16 }
 0x2dd   : > { %v1774_v4 = vpack.c.b16 %v1751_v51, %v1750_v44  ;;  %v1649_v25 = vrot.slane %v1614_v6, 1  ;;  %v1650_v51 = vrot.slane %v5301_v8, 1  ;;  %v4428_v45 = vor.u32 %v4427_v38, %v5207_v41 }
 0x2de   : > { %v765_v34 = vor.u32 %v763_v48, %v762_v50  ;;  %v1463_v43 = vor.u32 %v1462_v52, %v1458_v26  ;;  %v766_v17 = vrot.slane %v762_v50, 4 }
 0x2df   : > { %v543_v36 = vpop.trf.xlu0  ;;  %v1961_v24 = vshll.u32 %v1774_v4, 16  ;;  %v1651_v42 = vsel %vm1621_vm3, %v1649_v25, %v1650_v51  ;;  %v1959_v63 = vshrl.u32 %v1774_v4, 16  ;;  %v2120_v51 = vrot.slane %v4428_v45, 1 }
 0x2e0   : > { %v986_v7 = vsel %vm4874_vm5, %v765_v34, %v985_v5  ;;  %v575_v11 = vpack.c.bf16 %v543_v36, %v543_v36  ;;  %v1468_v60 = vsel %vm1348_vm2, %v1463_v43, %v1467_v23  ;;  %v4293_v12 = vld [vmem:[#allocation2 + $0x78] sm:$0xf0]  ;;  %v992_v36 = vld [vmem:[#allocation2 + $0x90] sm:$0xf] }
 0x2e1   : > { %987 = vst [vmem:[#allocation2 + $0x84] sm:$0xf] %v986_v7  ;;  %v1196_v13 = vld [vmem:[#allocation2 + $0x80] sm:$0x1]  ;;  %v4295_v18 = vor.u32 %v4294_v56, %v4293_v12  ;;  %v4269_v27 = vld [vmem:[#allocation2 + $0x78] sm:$0xf0] }
 0x2e2   : > { %1559 = vrot.lane.b32.xlu2 %v1468_v60, %s4554_s12  ;;  %v768_v19 = vshrl.u32 %v575_v11, 16  ;;  %v771_v31 = vshll.u32 %v575_v11, 16  ;;  %v2318_v57 = vunpack.c.l.b16 %v1196_v13  ;;  %v1132_v21 = vld [vmem:[#allocation2 + $0x80] sm:$0x1]  ;;  %v1963_v1 = vrot.slane %v1961_v24, 1  ;;  %v5325_v8 = vld [vmem:[#allocation2 + $0x78] sm:$0xff]  }
 0x2e3   : > { %v1839_v28 = vunpack.c.l.b16 %v1132_v21  ;;  %v1069_v10 = vld [vmem:[#allocation2 + $0x80] sm:$0x1]  ;;  %v2638_v61 = vrot.slane %v4295_v18, 1  ;;  %v4271_v62 = vor.u32 %v4270_v20, %v4269_v27  ;;  %v2441_v26 = vshll.u32 %v5325_v8, 16  ;;  %v1130_v60 = vld [vmem:[#allocation2 + $0x68] sm:$0x1] }
 0x2e4   : > { %v770_v35 = vrot.slane %v768_v19, 7  ;;  %v2334_v0 = vpack.c.b16 %v2318_v57, %v2318_v57  ;;  %1798 = vrot.lane.b32.xlu1 %v1774_v4, %s4556_s11  ;;  %v1326_v46 = vunpack.c.l.b16 %v1069_v10  ;;  %v1964_v5 = vor.u32 %v1963_v1, %v1959_v63 }
 0x2e5   : > { %v5331_v48 = vpack.c.b16 %v1839_v28, %v1839_v28  ;;  %v2129_v34 = vrot.slane %v4271_v62, 1  ;;  %v1968_v4 = vrot.slane %v1966_v49, 1  ;;  %v2439_v7 = vshrl.u32 %v5325_v8, 16 }
 0x2e6   : > { %v773_v55 = vor.u32 %v771_v31, %v770_v35  ;;  %v775_v59 = vrot.slane %v770_v35, 4  ;;  %v2639_v58 = vrot.slane %v2334_v0, 1  ;;  %v5339_v52 = vpack.c.b16 %v1326_v46, %v1326_v46 }
 0x2e7   : > { %v544_v39 = vpop.trf.xlu0  ;;  %v2130_v43 = vrot.slane %v5331_v48, 1  ;;  %v2446_v23 = vshll.u32 %v2334_v0, 16  ;;  %v2443_v11 = vrot.slane %v2441_v26, 1  ;;  %v5348_v18 = vsel %vm1348_vm2, %v1964_v5, %v1968_v4 }
 0x2e8   : > { %v774_v22 = vsel %vm4886_vm8, %v766_v17, %v773_v55  ;;  %v990_v16 = vsel %vm4891_vm9, %v775_v59, %v989_v29  ;;  %v576_v47 = vpack.c.bf16 %v544_v39, %v544_v39  ;;  %v2640_v15 = vsel %vm1621_vm3, %v2638_v61, %v2639_v58  ;;  %v4527_v56 = vld [vmem:[#allocation2 + $0x84] sm:$0xe]  ;;  %v4267_v55 = vld [vmem:[#allocation2 + $0x60] sm:$0xe]  ;;  %v996_v39 = vld [vmem:[#allocation2 + $0x98] sm:$0x1] }
 0x2e9   : > { %988 = vst.msk [vmem:[#allocation2 + $0x88] sm:$0xf] %vm434_vm0, %v774_v22  ;;  %v1477_v13 = vshll.u32 %v5339_v52, 16  ;;  %v2131_v57 = vsel %vm1621_vm3, %v2129_v34, %v2130_v43  ;;  %v2448_v21 = vrot.slane %v2446_v23, 1  ;;  %v1837_v20 = vunpack.c.l.b16 %v1130_v60  ;;  %v4266_v61 = vld [vmem:[#allocation2 + $0x60] sm:$0xf0] }
 0x2ea   : > { %1688 = vrot.lane.b32.xlu2 %v1651_v42, %s4555_s21  ;;  %991 = vst [vmem:[#allocation2 + $0x8c] sm:$0x1] %v990_v16  ;;  %v777_v44 = vshrl.u32 %v576_v47, 16  ;;  %v780_v50 = vshll.u32 %v576_v47, 16  ;;  %4024 = vmatmul.msk.bf16.gmra.mxu0 %vm2662_vm10, %v2640_v15  ;;  %v5356_v17 = vor.u32 %v2443_v11, %v2439_v7  ;;  %v2121_v29 = vrot.slane %v5272_v2, 1 }
 0x2eb   : > { %v1479_v28 = vrot.slane %v1477_v13, 1  ;;  %v5364_v62 = vpack.c.b16 %v1837_v20, %v1837_v20  ;;  %v4268_v2 = vor.u32 %v4267_v55, %v4266_v61  ;;  %v1067_v47 = vld [vmem:[#allocation2 + $0x68] sm:$0x1]  ;;  %v4246_v34 = vld [vmem:[#allocation2 + $0x60] sm:$0xe]  ;;  %v1978_v60 = vshll.u32 %v5331_v48, 16 }
 0x2ec   : > { %v779_v54 = vrot.slane %v777_v44, 7  ;;  %2278 = vrot.lane.b32.xlu1 %v5325_v8, %s4555_s21  ;;  %v2449_v38 = vsel %vm1348_vm2, %v5356_v17, %v2448_v21  ;;  %v2122_v49 = vsel %vm1621_vm3, %v2120_v51, %v2121_v29  ;;  %v1324_v43 = vunpack.c.l.b16 %v1067_v47  ;;  %v1066_v20 = vld [vmem:[#allocation2 + $0x5c] sm:$0x1] }
 0x2ed   : > { %v1480_v15 = vsel %vm1348_vm2, %v5356_v17, %v1479_v28  ;;  %v2124_v45 = vrot.slane %v5364_v62, 1 }
 0x2ee   : > { %v782_v6 = vor.u32 %v780_v50, %v779_v54  ;;  %v783_v59 = vrot.slane %v779_v54, 4  ;;  %v4245_v54 = vld [vmem:[#allocation2 + $0x60] sm:$0xf0]  ;;  %v1340_v7 = vpack.c.b16 %v1324_v43, %v1324_v43 }
 0x2ef   : > { %v545_v12 = vpop.trf.xlu0  ;;  %v4247_v11 = vor.u32 %v4246_v34, %v4245_v54 }
 0x2f0   : > { %v993_v19 = vsel %vm4874_vm5, %v782_v6, %v992_v36  ;;  %v577_v31 = vpack.c.bf16 %v545_v12, %v545_v12  ;;  %v5353_v41 = vld [vmem:[#allocation2 + $0x84] sm:$0xff]   ;;  %v2123_v36 = vrot.slane %v4268_v2, 1  ;;  %v999_v6 = vld [vmem:[#allocation2 + $0x9c] sm:$0xf]  ;;  %v1647_v51 = vrot.slane %v1340_v7, 1 }
 0x2f1   : > { %v4526_v24 = vld [vmem:[#allocation2 + $0x84] sm:$0xf0]  ;;  %994 = vst [vmem:[#allocation2 + $0x90] sm:$0xf] %v993_v19  ;;  %v1197_v25 = vld [vmem:[#allocation2 + $0x8c] sm:$0x1] }
 0x2f2   : > { %2168 = vrot.lane.b32.xlu2 %v2131_v57, %s4554_s12  ;;  %v785_v35 = vshrl.u32 %v577_v31, 16  ;;  %v788_v0 = vshll.u32 %v577_v31, 16  ;;  %v2319_v27 = vunpack.c.l.b16 %v1197_v25  ;;  %v4528_v10 = vor.u32 %v4527_v56, %v4526_v24  ;;  %v5385_v57 = vld [vmem:[#allocation2 + $0x60] sm:$0xff]  }
 0x2f3   : > { %v2125_v13 = vsel %vm1621_vm3, %v2123_v36, %v2124_v45  ;;  %v2453_v31 = vshll.u32 %v5353_v41, 16  ;;  %v1980_v25 = vrot.slane %v1978_v60, 1  ;;  %v2451_v28 = vshrl.u32 %v5353_v41, 16  ;;  %v4248_v36 = vld [vmem:[#allocation2 + $0x78] sm:$0xf0] }
 0x2f4   : > { %v787_v58 = vrot.slane %v785_v35, 7  ;;  %v5361_v1 = vpack.c.b16 %v2319_v27, %v2319_v27  ;;  %2550 = vrot.lane.b32.xlu1 %v2449_v38, %s4556_s11  ;;  %v2641_v42 = vrot.slane %v4528_v10, 1  ;;  %v4530_v27 = vld [vmem:[#allocation2 + $0x54] sm:$0xe]  ;;  %v4529_v38 = vld [vmem:[#allocation2 + $0x54] sm:$0xf0] }
 0x2f5   : > { %v2455_v10 = vrot.slane %v2453_v31, 1  ;;  %v5394_v29 = vsel %vm1348_vm2, %v5356_v17, %v1980_v25  ;;  %v1453_v47 = vshll.u32 %v1340_v7, 16  ;;  %v4249_v45 = vld [vmem:[#allocation2 + $0x78] sm:$0xe]  ;;  %v1149_v25 = vld [vmem:[#allocation2 + $0x84] sm:$0xe] }
 0x2f6   : > { %v790_v46 = vor.u32 %v788_v0, %v787_v58  ;;  %v792_v22 = vrot.slane %v787_v58, 4  ;;  %v2642_v16 = vrot.slane %v5361_v1, 1  ;;  %v1448_v0 = vshll.u32 %v5385_v57, 16  ;;  %v5397_v58 = vld [vmem:[#allocation2 + $0x54] sm:$0xff]  }
 0x2f7   : > { %v546_v63 = vpop.trf.xlu0  ;;  %v1455_v43 = vrot.slane %v1453_v47, 1 }
 0x2f8   : > { %v791_v44 = vsel %vm4886_vm8, %v783_v59, %v790_v46  ;;  %v997_v50 = vsel %vm4891_vm9, %v792_v22, %v996_v39  ;;  %v578_v26 = vpack.c.bf16 %v546_v63, %v546_v63  ;;  %v2643_v5 = vsel %vm1621_vm3, %v2641_v42, %v2642_v16  ;;  %v1003_v39 = vld [vmem:[#allocation2 + $0xa4] sm:$0x1]  ;;  %v4252_v40 = vld [vmem:[#allocation2 + $0x90] sm:$0xe] }
 0x2f9   : > { %995 = vst.msk [vmem:[#allocation2 + $0x94] sm:$0xf] %vm434_vm0, %v791_v44  ;;  %2162 = vrot.lane.b32.xlu0 %v2122_v49, %s4554_s12  ;;  %v2458_v59 = vshll.u32 %v5361_v1, 16  ;;  %v1446_v46 = vshrl.u32 %v5385_v57, 16  ;;  %v1323_v22 = vunpack.c.l.b16 %v1066_v20  ;;  %v1450_v17 = vrot.slane %v1448_v0, 1  ;;  %v5423_v20 = vld [vmem:[#allocation2 + $0x84] sm:$0xff]  }
 0x2fa   : > { %1561 = vrot.lane.b32.xlu2 %v1480_v15, %s4554_s12  ;;  %998 = vst [vmem:[#allocation2 + $0x98] sm:$0x1] %v997_v50  ;;  %v794_v23 = vshrl.u32 %v578_v26, 16  ;;  %v797_v56 = vshll.u32 %v578_v26, 16  ;;  %4025 = vmatmul.msk.bf16.gmra.mxu0 %vm2662_vm10, %v2643_v5  ;;  %v2456_v15 = vor.u32 %v2455_v10, %v2451_v28  ;;  %v4531_v26 = vor.u32 %v4530_v27, %v4529_v38 }
 0x2fb   : > { %v2460_v50 = vrot.slane %v2458_v59, 1  ;;  %v5411_v34 = vor.u32 %v1450_v17, %v1446_v46  ;;  %v2410_v28 = vshll.u32 %v5252_v53, 16  ;;  %v2080_v59 = vunpack.c.l.b16 %v1149_v25 }
 0x2fc   : > { %v796_v4 = vrot.slane %v794_v23, 7  ;;  %1800 = vrot.lane.b32.xlu1 %v5325_v8, %s4556_s11  ;;  %v1646_v8 = vrot.slane %v4247_v11, 1  ;;  %v1643_v60 = vrot.slane %v4531_v26, 1 }
 0x2fd   : > { %v1456_v11 = vsel %vm1348_vm2, %v5411_v34, %v1455_v43 }
 0x2fe   : > { %v799_v12 = vor.u32 %v797_v56, %v796_v4  ;;  %v800_v61 = vrot.slane %v796_v4, 4  ;;  %v1648_v42 = vsel %vm1621_vm3, %v1646_v8, %v1647_v51  ;;  %v2461_v56 = vsel %vm1348_vm2, %v2456_v15, %v2460_v50 }
 0x2ff   : > { %v547_v19 = vpop.trf.xlu0  ;;  %v2405_v4 = vshll.u32 %v5199_v33, 16  ;;  %v2403_v8 = vshrl.u32 %v5199_v33, 16  ;;  %v1274_v33 = vunpack.c.l.b16 %v5423_v20 }
 0x300   : > { %v1000_v21 = vsel %vm4874_vm5, %v799_v12, %v999_v6  ;;  %v579_v24 = vpack.c.bf16 %v547_v19, %v547_v19  ;;  %v1006_v6 = vld [vmem:[#allocation2 + $0xa8] sm:$0xf]  ;;  %v4250_v19 = vor.u32 %v4249_v45, %v4248_v36 }
 0x301   : > { %1001 = vst [vmem:[#allocation2 + $0x9c] sm:$0xf] %v1000_v21  ;;  %v2407_v51 = vrot.slane %v2405_v4, 1 }
 0x302   : > { %2164 = vrot.lane.b32.xlu2 %v2125_v13, %s4554_s12  ;;  %v802_v48 = vshrl.u32 %v579_v24, 16  ;;  %v805_v35 = vshll.u32 %v579_v24, 16  ;;  %v1133_v24 = vld [vmem:[#allocation2 + $0x8c] sm:$0x1]  ;;  %v1652_v10 = vrot.slane %v4250_v19, 1  ;;  %v1954_v19 = vshll.u32 %v5364_v62, 16 }
 0x303   : > { %v2408_v47 = vor.u32 %v2407_v51, %v2403_v8 }
 0x304   : > { %v804_v55 = vrot.slane %v802_v48, 7  ;;  %2280 = vrot.lane.b32.xlu1 %v5353_v41, %s4555_s21  ;;  %v5409_v41 = vpack.c.b16 %v1323_v22, %v1323_v22  ;;  %v5425_v48 = vld [vmem:[#allocation2 + $0x84] sm:$0xff]   ;;  %v1010_v22 = vld [vmem:[#allocation2 + $0xb0] sm:$0x1]  ;;  %v1956_v51 = vrot.slane %v1954_v19, 1 }
 0x305   : > { %v1275_v46 = vunpack.c.h.b16 %v5425_v48  ;;  %v1020_v19 = vld [vmem:[#allocation2 + $0xc0] sm:$0xf] }
 0x306   : > { %v807_v16 = vor.u32 %v805_v35, %v804_v55  ;;  %v809_v2 = vrot.slane %v804_v55, 4  ;;  %v1644_v12 = vrot.slane %v5409_v41, 1  ;;  %v1840_v55 = vunpack.c.l.b16 %v1133_v24 }
 0x307   : > { %v548_v63 = vpop.trf.xlu0  ;;  %v5467_v62 = vsel %vm1348_vm2, %v5411_v34, %v1956_v51 }
 0x308   : > { %v808_v1 = vsel %vm4886_vm8, %v800_v61, %v807_v16  ;;  %v1004_v49 = vsel %vm4891_vm9, %v809_v2, %v1003_v39  ;;  %v580_v44 = vpack.c.bf16 %v548_v63, %v548_v63  ;;  %v1645_v27 = vsel %vm1621_vm3, %v1643_v60, %v1644_v12 }
 0x309   : > { %1002 = vst.msk [vmem:[#allocation2 + $0xa0] sm:$0xf] %vm434_vm0, %v808_v1  ;;  %v1653_v61 = vrot.slane %v5339_v52, 1  ;;  %v1755_v16 = vunpack.c.h.b16 %v5423_v20  ;;  %v1436_v2 = vshll.u32 %v5397_v58, 16  ;;  %v2412_v52 = vrot.slane %v2410_v28, 1 }
 0x30a   : > { %1686 = vrot.lane.b32.xlu2 %v1648_v42, %s4555_s21  ;;  %1005 = vst [vmem:[#allocation2 + $0xa4] sm:$0x1] %v1004_v49  ;;  %v811_v5 = vshrl.u32 %v580_v44, 16  ;;  %v814_v54 = vshll.u32 %v580_v44, 16  ;;  %v1070_v42 = vld [vmem:[#allocation2 + $0x8c] sm:$0x1]  ;;  %v5436_v1 = vpack.c.b16 %v1840_v55, %v1840_v55 }
 0x30b   : > { %v1654_v15 = vsel %vm1621_vm3, %v1652_v10, %v1653_v61  ;;  %v2096_v49 = vpack.c.b16 %v1755_v16, %v2080_v59  ;;  %v1327_v44 = vunpack.c.l.b16 %v1070_v42  ;;  %v1438_v36 = vrot.slane %v1436_v2, 1  ;;  %v1086_v10 = vld [vmem:[#allocation2 + $0x84] sm:$0xe] }
 0x30c   : > { %v813_v23 = vrot.slane %v811_v5, 7  ;;  %2552 = vrot.lane.b32.xlu1 %v2461_v56, %s4556_s11  ;;  %v1434_v56 = vshrl.u32 %v5397_v58, 16  ;;  %v2133_v4 = vrot.slane %v5436_v1, 1 }
 0x30d   : > { %v2132_v45 = vrot.slane %v2096_v49, 1  ;;  %v5454_v60 = vpack.c.b16 %v1327_v44, %v1327_v44  ;;  %v4272_v49 = vld [vmem:[#allocation2 + $0x90] sm:$0xf0]  ;;  %v4273_v44 = vld [vmem:[#allocation2 + $0x90] sm:$0xe] }
 0x30e   : > { %v816_v7 = vor.u32 %v814_v54, %v813_v23  ;;  %v817_v38 = vrot.slane %v813_v23, 4  ;;  %v5446_v54 = vpack.c.b16 %v1275_v46, %v1274_v33 }
 0x30f   : > { %v549_v13 = vpop.trf.xlu0  ;;  %v2134_v25 = vsel %vm1621_vm3, %v2132_v45, %v2133_v4  ;;  %v1489_v28 = vshll.u32 %v5454_v60, 16  ;;  %v4274_v4 = vor.u32 %v4273_v44, %v4272_v49  ;;  %v1024_v44 = vld [vmem:[#allocation2 + $0xc8] sm:$0x1] }
 0x310   : > { %v1007_v31 = vsel %vm4874_vm5, %v816_v7, %v1006_v6  ;;  %v581_v21 = vpack.c.bf16 %v549_v13, %v549_v13  ;;  %v1441_v6 = vshll.u32 %v5409_v41, 16  ;;  %v1484_v12 = vshll.u32 %v5446_v54, 16  ;;  %v1013_v13 = vld [vmem:[#allocation2 + $0xb4] sm:$0xf] }
 0x311   : > { %1008 = vst [vmem:[#allocation2 + $0xa8] sm:$0xf] %v1007_v31  ;;  %v1482_v41 = vshrl.u32 %v5446_v54, 16  ;;  %v1491_v2 = vrot.slane %v1489_v28, 1 }
 0x312   : > { %1557 = vrot.lane.b32.xlu2 %v1456_v11, %s4554_s12  ;;  %v819_v35 = vshrl.u32 %v581_v21, 16  ;;  %v822_v0 = vshll.u32 %v581_v21, 16  ;;  %v2413_v11 = vsel %vm1348_vm2, %v2408_v47, %v2412_v52  ;;  %v1439_v21 = vor.u32 %v1438_v36, %v1434_v56  ;;  %v1071_v56 = vld [vmem:[#allocation2 + $0x98] sm:$0x1] }
 0x313   : > { %v1443_v8 = vrot.slane %v1441_v6, 1 }
 0x314   : > { %v821_v39 = vrot.slane %v819_v35, 7  ;;  %1684 = vrot.lane.b32.xlu1 %v1645_v27, %s4555_s21  ;;  %v1486_v27 = vrot.slane %v1484_v12, 1  ;;  %v1328_v12 = vunpack.c.l.b16 %v1071_v56 }
 0x315   : > { %v1444_v59 = vsel %vm1348_vm2, %v1439_v21, %v1443_v8  ;;  %v2135_v21 = vrot.slane %v4274_v4, 1 }
 0x316   : > { %v824_v53 = vor.u32 %v822_v0, %v821_v39  ;;  %v826_v17 = vrot.slane %v821_v39, 4  ;;  %v1134_v39 = vld [vmem:[#allocation2 + $0x98] sm:$0x1] }
 0x317   : > { %v550_v63 = vpop.trf.xlu0  ;;  %v1841_v52 = vunpack.c.l.b16 %v1134_v39 }
 0x318   : > { %v825_v50 = vsel %vm4886_vm8, %v817_v38, %v824_v53  ;;  %v1011_v26 = vsel %vm4891_vm9, %v826_v17, %v1010_v22  ;;  %v582_v5 = vpack.c.bf16 %v550_v63, %v550_v63  ;;  %v1600_v38 = vunpack.c.l.b16 %v1086_v10  ;;  %v1017_v53 = vld [vmem:[#allocation2 + $0xbc] sm:$0x1] }
 0x319   : > { %1009 = vst.msk [vmem:[#allocation2 + $0xac] sm:$0xf] %vm434_vm0, %v825_v50  ;;  %v1487_v22 = vor.u32 %v1486_v27, %v1482_v41  ;;  %v5482_v45 = vpack.c.b16 %v1841_v52, %v1841_v52  ;;  %v2422_v41 = vshll.u32 %v5266_v9, 16 }
 0x31a   : > { %1690 = vrot.lane.b32.xlu2 %v1654_v15, %s4555_s21  ;;  %1012 = vst [vmem:[#allocation2 + $0xb0] sm:$0x1] %v1011_v26  ;;  %v828_v43 = vshrl.u32 %v582_v5, 16  ;;  %v831_v23 = vshll.u32 %v582_v5, 16  ;;  %v1616_v15 = vpack.c.b16 %v1275_v46, %v1600_v38  ;;  %v1198_v38 = vld [vmem:[#allocation2 + $0x98] sm:$0x1] }
 0x31b   : > { %v1492_v5 = vsel %vm1348_vm2, %v1487_v22, %v1491_v2  ;;  %v4296_v2 = vld [vmem:[#allocation2 + $0x90] sm:$0xf0] }
 0x31c   : > { %v830_v7 = vrot.slane %v828_v43, 7  ;;  %2544 = vrot.lane.b32.xlu1 %v2413_v11, %s4556_s11  ;;  %v1655_v6 = vrot.slane %v1616_v15, 1 }
 0x31e   : > { %v833_v31 = vor.u32 %v831_v23, %v830_v7  ;;  %v834_v42 = vrot.slane %v830_v7, 4  ;;  %v5480_v23 = vld [vmem:[#allocation2 + $0x90] sm:$0xff]   ;;  %v1656_v7 = vrot.slane %v5454_v60, 1 }
 0x31f   : > { %v551_v24 = vpop.trf.xlu0  ;;  %v1494_v51 = vshrl.u32 %v5480_v23, 16  ;;  %v5492_v60 = vld [vmem:[#allocation2 + $0xcc] sm:$0xff]  }
 0x320   : > { %v1014_v35 = vsel %vm4874_vm5, %v833_v31, %v1013_v13  ;;  %v583_v0 = vpack.c.bf16 %v551_v24, %v551_v24  ;;  %v1496_v13 = vshll.u32 %v5480_v23, 16  ;;  %v2136_v24 = vrot.slane %v5482_v45, 1 }
 0x321   : > { %1015 = vst [vmem:[#allocation2 + $0xb4] sm:$0xf] %v1014_v35  ;;  %v5494_v35 = vld [vmem:[#allocation2 + $0xcc] sm:$0xf0] }
 0x322   : > { %2170 = vrot.lane.b32.xlu2 %v2134_v25, %s4554_s12  ;;  %v836_v61 = vshrl.u32 %v583_v0, 16  ;;  %v839_v55 = vshll.u32 %v583_v0, 16  ;;  %v1657_v25 = vsel %vm1621_vm3, %v1655_v6, %v1656_v7  ;;  %v1498_v9 = vrot.slane %v1496_v13, 1 }
 0x323   : > { %v2424_v6 = vrot.slane %v2422_v41, 1  ;;  %v4251_v41 = vld [vmem:[#allocation2 + $0x90] sm:$0xf0] }
 0x324   : > { %v838_v33 = vrot.slane %v836_v61, 7  ;;  %1555 = vrot.lane.b32.xlu1 %v1444_v59, %s4554_s12  ;;  %v5506_v59 = vpack.c.b16 %v1328_v12, %v1328_v12 }
 0x326   : > { %v841_v17 = vor.u32 %v839_v55, %v838_v33  ;;  %v843_v47 = vrot.slane %v838_v33, 4  ;;  %v2137_v33 = vsel %vm1621_vm3, %v2135_v21, %v2136_v24  ;;  %v5533_v24 = vor.u32 %v1498_v9, %v1494_v51 }
 0x327   : > { %v552_v63 = vpop.trf.xlu0  ;;  %v2525_v51 = vshll.u32 %v5492_v60, 16  ;;  %v2002_v9 = vshll.u32 %v5482_v45, 16 }
 0x328   : > { %v842_v50 = vsel %vm4886_vm8, %v834_v42, %v841_v17  ;;  %v1018_v26 = vsel %vm4891_vm9, %v843_v47, %v1017_v53  ;;  %v584_v43 = vpack.c.bf16 %v552_v63, %v552_v63  ;;  %v4297_v53 = vld [vmem:[#allocation2 + $0x90] sm:$0xe]  ;;  %v2320_v47 = vunpack.c.l.b16 %v1198_v38 }
 0x329   : > { %1016 = vst.msk [vmem:[#allocation2 + $0xb8] sm:$0xf] %vm434_vm0, %v842_v50  ;;  %v2527_v45 = vrot.slane %v2525_v51, 1 }
 0x32a   : > { %1563 = vrot.lane.b32.xlu2 %v1492_v5, %s4554_s12  ;;  %1019 = vst [vmem:[#allocation2 + $0xbc] sm:$0x1] %v1018_v26  ;;  %v845_v46 = vshrl.u32 %v584_v43, 16  ;;  %v848_v36 = vshll.u32 %v584_v43, 16  ;;  %v1203_v5 = vld [vmem:[#allocation2 + $0xd4] sm:$0x1]  ;;  %v4298_v43 = vor.u32 %v4297_v53, %v4296_v2  ;;  %v5524_v7 = vpack.c.b16 %v2320_v47, %v2320_v47 }
 0x32b   : > { %v2325_v13 = vunpack.c.l.b16 %v1203_v5  ;;  %v5551_v2 = vld [vmem:[#allocation2 + $0x9c] sm:$0xff]   ;;  %v2004_v53 = vrot.slane %v2002_v9, 1  ;;  %v2523_v47 = vshrl.u32 %v5492_v60, 16 }
 0x32c   : > { %v847_v11 = vrot.slane %v845_v46, 7  ;;  %2274 = vrot.lane.b32.xlu1 %v5385_v57, %s4555_s21  ;;  %v2645_v21 = vrot.slane %v5524_v7, 1 }
 0x32d   : > { %v5539_v38 = vpack.c.b16 %v2325_v13, %v2325_v13 }
 0x32e   : > { %v850_v31 = vor.u32 %v848_v36, %v847_v11  ;;  %v851_v52 = vrot.slane %v847_v11, 4  ;;  %v1501_v36 = vshll.u32 %v5506_v59, 16 }
 0x32f   : > { %v553_v8 = vpop.trf.xlu0 }
 0x330   : > { %v1021_v0 = vsel %vm4874_vm5, %v850_v31, %v1020_v19  ;;  %v585_v27 = vpack.c.bf16 %v553_v8, %v553_v8  ;;  %v5498_v28 = vld [vmem:[#allocation2 + $0xb4] sm:$0xff]   ;;  %v2644_v31 = vrot.slane %v4298_v43, 1  ;;  %v1279_v43 = vunpack.c.h.b16 %v5551_v2 }
 0x331   : > { %v5500_v10 = vld [vmem:[#allocation2 + $0xb4] sm:$0xf0]  ;;  %1022 = vst [vmem:[#allocation2 + $0xc0] sm:$0xf] %v1021_v0  ;;  %v1074_v39 = vld [vmem:[#allocation2 + $0xbc] sm:$0x1]  ;;  %1810 = vrot.lane.b32.xlu0 %v5498_v28, %s4556_s11 }
 0x332   : > { %v5502_v61 = vld [vmem:[#allocation2 + $0xb4] sm:$0xff]   ;;  %1692 = vrot.lane.b32.xlu2 %v1657_v25, %s4555_s21  ;;  %v853_v42 = vshrl.u32 %v585_v27, 16  ;;  %v856_v14 = vshll.u32 %v585_v27, 16  ;;  %v1331_v22 = vunpack.c.l.b16 %v1074_v39  ;;  %v1503_v25 = vrot.slane %v1501_v36, 1  ;;  %v1072_v36 = vld [vmem:[#allocation2 + $0xa4] sm:$0x1] }
 0x333   : > { %v5504_v55 = vld [vmem:[#allocation2 + $0xb4] sm:$0xf0]  ;;  %v1530_v50 = vshrl.u32 %v5502_v61, 16  ;;  %v1532_v26 = vshll.u32 %v5502_v61, 16  ;;  %v2646_v0 = vsel %vm1621_vm3, %v2644_v31, %v2645_v21  ;;  %v2425_v27 = vsel %vm1348_vm2, %v5411_v34, %v2424_v6  ;;  %v1151_v34 = vld [vmem:[#allocation2 + $0x9c] sm:$0xe] }
 0x334   : > { %v2167_v17 = vpop.permute.xlu2 %2166  ;;  %v855_v15 = vrot.slane %v853_v42, 7  ;;  %v5514_v49 = vpack.c.b16 %v1331_v22, %v1331_v22  ;;  %1796 = vrot.lane.b32.xlu1 %v5385_v57, %s4556_s11  ;;  %4026 = vmatmul.msk.bf16.gmra.mxu0 %vm2662_vm10, %v2646_v0  ;;  %v1504_v39 = vsel %vm1348_vm2, %v5533_v24, %v1503_v25  ;;  %v4253_v42 = vor.u32 %v4252_v40, %v4251_v41  ;;  %v1215_v31 = vld [vmem:[#allocation2 + $0x9c] sm:$0xe]  ;;  %v1199_v21 = vld [vmem:[#allocation2 + $0xa4] sm:$0x1] }
 0x335   : > { %v5512_v63 = vsel %vm2662_vm10, %v5348_v18, %v2167_v17  ;;  %v1534_v4 = vrot.slane %v1532_v26, 1  ;;  %v1754_v22 = vunpack.c.l.b16 %v5425_v48  ;;  %v1659_v17 = vrot.slane %v5506_v59, 1 }
 0x336   : > { %v858_v56 = vor.u32 %v856_v14, %v855_v15  ;;  %v860_v46 = vrot.slane %v855_v15, 4  ;;  %v1537_v18 = vshll.u32 %v5514_v49, 16  ;;  %v5548_v14 = vld [vmem:[#allocation2 + $0x9c] sm:$0xff]   ;;  %v1658_v5 = vrot.slane %v4253_v42, 1 }
 0x337   : > { %v1535_v19 = vor.u32 %v1534_v4, %v1530_v50  ;;  %v1759_v15 = vunpack.c.h.b16 %v5548_v14  ;;  %v2082_v50 = vunpack.c.l.b16 %v1151_v34  ;;  %v1278_v48 = vunpack.c.l.b16 %v5548_v14 }
 0x338   : > { %v859_v11 = vsel %vm4886_vm8, %v851_v52, %v858_v56  ;;  %v1025_v57 = vsel %vm4891_vm9, %v860_v46, %v1024_v44  ;;  %v1539_v12 = vrot.slane %v1537_v18, 1  ;;  %v2530_v52 = vshll.u32 %v5539_v38, 16 }
 0x339   : > { %1023 = vst.msk [vmem:[#allocation2 + $0xc4] sm:$0xf] %vm434_vm0, %v859_v11  ;;  %v5564_v59 = vsel %vm1348_vm2, %v5533_v24, %v2004_v53  ;;  %v5570_v18 = vpack.c.b16 %v1755_v16, %v1754_v22  ;;  %v2528_v6 = vor.u32 %v2527_v45, %v2523_v47  ;;  %v5582_v20 = vpack.c.b16 %v1279_v43, %v1278_v48 }
 0x33a   : > { %2172 = vrot.lane.b32.xlu2 %v2137_v33, %s4554_s12  ;;  %1026 = vst [vmem:[#allocation2 + $0xc8] sm:$0x1] %v1025_v57  ;;  %v1540_v37 = vsel %vm1348_vm2, %v1535_v19, %v1539_v12  ;;  %v1135_v33 = vld [vmem:[#allocation2 + $0xa4] sm:$0x1]  ;;  %v2532_v11 = vrot.slane %v2530_v52, 1  ;;  %v2098_v12 = vpack.c.b16 %v1759_v15, %v2082_v50  ;;  %v1329_v16 = vunpack.c.l.b16 %v1072_v36  ;;  %v5586_v19 = vld [vmem:[#allocation2 + $0x9c] sm:$0xff]  }
 0x33b   : > { %1571 = vrot.lane.b32.xlu0 %v1540_v37, %s4554_s12  ;;  %v1842_v44 = vunpack.c.l.b16 %v1135_v33  ;;  %v2237_v25 = vunpack.c.h.b16 %v5586_v19  ;;  %v2321_v37 = vunpack.c.l.b16 %v1199_v21  ;;  %v1508_v51 = vshll.u32 %v5582_v20, 16 }
 0x33c   : > { %v1560_v8 = vpop.permute.xlu2 %1559  ;;  %2546 = vrot.lane.b32.xlu1 %v2425_v27, %s4556_s11  ;;  %v2533_v41 = vsel %vm1348_vm2, %v2528_v6, %v2532_v11  ;;  %v2138_v40 = vrot.slane %v2098_v12, 1  ;;  %v5591_v27 = vpack.c.b16 %v1329_v16, %v1329_v16  ;;  %v2470_v33 = vshll.u32 %v5524_v7, 16 }
 0x33d   : > { %v2682_v56 = vsel %vm2662_vm10, %v5299_v30, %v1560_v8  ;;  %v1858_v57 = vpack.c.b16 %v1842_v44, %v1842_v44  ;;  %v1660_v30 = vsel %vm1621_vm3, %v1658_v5, %v1659_v17  ;;  %v2593_v8 = vunpack.c.l.b16 %v1215_v31  ;;  %v1088_v44 = vld [vmem:[#allocation2 + $0x9c] sm:$0xe]  ;;  %v3484_v5 = vld [vmem:[%s6227_s6] sm:$0xff]  ;;  %v1136_v31 = vld [vmem:[#allocation2 + $0xb0] sm:$0x1] }
 0x33e   : > { %v1506_v53 = vshrl.u32 %v5582_v20, 16  ;;  %v1510_v47 = vrot.slane %v1508_v51, 1  ;;  %v1513_v52 = vshll.u32 %v5591_v27, 16  ;;  %v2472_v7 = vrot.slane %v2470_v33, 1  ;;  %v4276_v51 = vld [vmem:[#allocation2 + $0xa8] sm:$0xe] }
 0x33f   : > { %v2139_v0 = vrot.slane %v1858_v57, 1  ;;  %v2609_v9 = vpack.c.b16 %v2237_v25, %v2593_v8  ;;  %v1758_v50 = vunpack.c.l.b16 %v5586_v19  ;;  %v1602_v6 = vunpack.c.l.b16 %v1088_v44 }
 0x340   : > { %v5558_v26 = vld [vmem:[#allocation2 + $0xc0] sm:$0xff]   ;;  %v1511_v48 = vor.u32 %v1510_v47, %v1506_v53  ;;  %v2473_v11 = vsel %vm1348_vm2, %v5533_v24, %v2472_v7  ;;  %v2014_v16 = vshll.u32 %v1858_v57, 16  ;;  %v2236_v24 = vunpack.c.l.b16 %v5551_v2  ;;  %v3485_v57 = vld [vmem:[%s6227_s6 + $0x8] sm:$0xff]  ;;  %v5640_v53 = vpop.f32.mrf.mxu0 }
 0x341   : > { %v2647_v34 = vrot.slane %v2609_v9, 1  ;;  %v2140_v17 = vsel %vm1621_vm3, %v2138_v40, %v2139_v0  ;;  %v1618_v8 = vpack.c.b16 %v1279_v43, %v1602_v6  ;;  %v1843_v40 = vunpack.c.l.b16 %v1136_v31  ;;  %v4275_v0 = vld [vmem:[#allocation2 + $0xa8] sm:$0xf0] }
 0x342   : > { %1565 = vrot.lane.b32.xlu2 %v1504_v39, %s4554_s12  ;;  %v5594_v39 = vpack.c.b16 %v2321_v37, %v2321_v37  ;;  %v2016_v37 = vrot.slane %v2014_v16, 1  ;;  %v1662_v43 = vrot.slane %v5591_v27, 1  ;;  %v4277_v47 = vor.u32 %v4276_v51, %v4275_v0 }
 0x343   : > { %1812 = vrot.lane.b32.xlu0 %v5558_v26, %s4556_s11  ;;  %v5584_v13 = vpop.permute.xlu1 %2276  ;;  %v1661_v33 = vrot.slane %v1618_v8, 1 }
 0x344   : > { %v1689_v46 = vpop.permute.xlu2 %1688  ;;  %1802 = vrot.lane.b32.xlu1 %v5570_v18, %s4556_s11  ;;  %v2648_v22 = vrot.slane %v5594_v39, 1 }
 0x345   : > { %v5573_v4 = vsel %vm2695_vm11, %v2682_v56, %v1689_v46  ;;  %v1515_v56 = vrot.slane %v1513_v52, 1  ;;  %v5615_v46 = vpack.c.b16 %v1759_v15, %v1758_v50  ;;  %v1200_v50 = vld [vmem:[#allocation2 + $0xb0] sm:$0x1] }
 0x346   : > { %v2322_v6 = vunpack.c.l.b16 %v1200_v50 }
 0x347   : > { %v2009_v12 = vshll.u32 %v5615_v46, 16  ;;  %v1516_v19 = vsel %vm1348_vm2, %v1511_v48, %v1515_v56 }
 0x348   : > { %v5667_v51 = vpop.f32.mrf.mxu0 }
 0x349   : > { %v2011_v21 = vrot.slane %v2009_v12, 1 }
 0x34a   : > { %1694 = vrot.lane.b32.xlu2 %v1660_v30, %s4555_s21  ;;  %v2007_v30 = vshrl.u32 %v5615_v46, 16 }
 0x34b   : > { %2564 = vrot.lane.b32.xlu0 %v2533_v41, %s4556_s11 }
 0x34c   : > { %v2169_v42 = vpop.permute.xlu2 %2168  ;;  %2282 = vrot.lane.b32.xlu1 %v5480_v23, %s4555_s21  ;;  %v2012_v41 = vor.u32 %v2011_v21, %v2007_v30 }
 0x34d   : > { %v5598_v14 = vsel %vm2662_vm10, %v5394_v29, %v2169_v42  ;;  %v2649_v29 = vsel %vm1621_vm3, %v2647_v34, %v2648_v22  ;;  %v1073_v34 = vld [vmem:[#allocation2 + $0xb0] sm:$0x1]  ;;  %v2257_v22 = vpack.c.b16 %v2237_v25, %v2236_v24  ;;  %v4299_v25 = vld [vmem:[#allocation2 + $0xa8] sm:$0xf0] }
 0x34e   : > { %v2549_v45 = vpop.permute.xlu1 %2548  ;;  %4027 = vmatmul.msk.bf16.gmra.mxu0 %vm2662_vm10, %v2649_v29  ;;  %v5635_v9 = vsel %vm1348_vm2, %v2012_v41, %v2016_v37  ;;  %v5646_v29 = vld [vmem:[#allocation2 + $0xa8] sm:$0xff]   ;;  %v1330_v7 = vunpack.c.l.b16 %v1073_v34 }
 0x34f   : > { %v2477_v56 = vshll.u32 %v2257_v22, 16  ;;  %v1520_v16 = vshll.u32 %v5646_v29, 16  ;;  %v2475_v21 = vshrl.u32 %v2257_v22, 16  ;;  %v1518_v41 = vshrl.u32 %v5646_v29, 16 }
 0x350   : > { %v1346_v30 = vpack.c.b16 %v1330_v7, %v1330_v7  ;;  %v1668_v7 = vrot.slane %v5514_v49, 1 }
 0x351   : > { %v2479_v8 = vrot.slane %v2477_v56, 1 }
 0x352   : > { %2174 = vrot.lane.b32.xlu2 %v2140_v17, %s4554_s12  ;;  %v1859_v17 = vpack.c.b16 %v1843_v40, %v1843_v40  ;;  %v1522_v40 = vrot.slane %v1520_v16, 1  ;;  %v5694_v16 = vpop.f32.mrf.mxu0 }
 0x353   : > { %3502 = vperm.xlu0 %4364, %v3484_v5   ;;  %v4300_v5 = vld [vmem:[#allocation2 + $0xa8] sm:$0xe] }
 0x354   : > { %v5617_v36 = vpop.permute.xlu2 %1561  ;;  %2554 = vrot.lane.b32.xlu1 %v2473_v11, %s4556_s11  ;;  %v4301_v11 = vor.u32 %v4300_v5, %v4299_v25  ;;  %v2142_v12 = vrot.slane %v1859_v17, 1  ;;  %v2026_v5 = vshll.u32 %v1859_v17, 16  ;;  %v3488_v17 = vld [vmem:[%s6227_s6 + $0x20] sm:$0xff] }
 0x356   : > { %v5625_v15 = vpop.permute.xlu1 %1798  ;;  %v2650_v31 = vrot.slane %v4301_v11, 1  ;;  %v2028_v11 = vrot.slane %v2026_v5, 1 }
 0x35a   : > { %1567 = vrot.lane.b32.xlu2 %v1516_v19, %s4554_s12  ;;  %v5659_v19 = vpack.c.b16 %v2322_v6, %v2322_v6 }
 0x35b   : > { %3507 = vperm.xlu0 %4364, %v3485_v57   ;;  %v1525_v57 = vshll.u32 %v1346_v30, 16 }
 0x35c   : > { %v2165_v42 = vpop.permute.xlu2 %2164  ;;  %1804 = vrot.lane.b32.xlu1 %v5480_v23, %s4556_s11  ;;  %v2651_v37 = vrot.slane %v5659_v19, 1 }
 0x35d   : > { %v2800_v2 = vsel %vm2662_vm10, %v5467_v62, %v2165_v42  ;;  %v1663_v62 = vsel %vm1621_vm3, %v1661_v33, %v1662_v43  ;;  %v4430_v33 = vld [vmem:[#allocation2 + $0xb4] sm:$0xe] }
 0x35e   : > { %v2840_v52 = vsel %vm2695_vm11, %v2800_v2, %v5584_v13  ;;  %v2279_v44 = vpop.permute.xlu1 %2278  ;;  %v2141_v13 = vrot.slane %v4277_v47, 1  ;;  %v2652_v0 = vsel %vm1621_vm3, %v2650_v31, %v2651_v37  ;;  %v3487_v2 = vld [vmem:[%s6227_s6 + $0x18] sm:$0xff]  ;;  %v1527_v47 = vrot.slane %v1525_v57, 1 }
 0x35f   : > { %v5649_v27 = vsel %vm2728_vm12, %v2840_v52, %v2549_v45  ;;  %v2842_v48 = vsel %vm2695_vm11, %v5512_v63, %v2279_v44  ;;  %v3486_v45 = vld [vmem:[%s6227_s6 + $0x10] sm:$0xff]  ;;  %v2482_v63 = vshll.u32 %v5594_v39, 16  ;;  %4028 = vmatmul.msk.bf16.gmra.mxu0 %vm2662_vm10, %v2652_v0  ;;  %v2480_v39 = vor.u32 %v2479_v8, %v2475_v21  ;;  %v4254_v44 = vld [vmem:[#allocation2 + $0xa8] sm:$0xf0]  ;;  %v4532_v21 = vld [vmem:[#allocation2 + $0xb4] sm:$0xf0] }
 0x360   : > { %v2143_v24 = vsel %vm1621_vm3, %v2141_v13, %v2142_v12  ;;  %v4431_v52 = vor.u32 %v4430_v33, %v5504_v55  ;;  %v5698_v31 = vld [vmem:[#allocation2 + $0xb4] sm:$0xff]  }
 0x361   : > { %v2484_v43 = vrot.slane %v2482_v63, 1  ;;  %v4533_v8 = vld [vmem:[#allocation2 + $0xb4] sm:$0xe] }
 0x362   : > { %1696 = vrot.lane.b32.xlu2 %v1663_v62, %s4555_s21  ;;  %v4255_v62 = vld [vmem:[#allocation2 + $0xa8] sm:$0xe]  ;;  %v1667_v50 = vrot.slane %v4431_v52, 1 }
 0x363   : > { %3512 = vperm.xlu0 %4364, %v3486_v45   ;;  %v2485_v25 = vsel %vm1348_vm2, %v2480_v39, %v2484_v43  ;;  %v4256_v56 = vor.u32 %v4255_v62, %v4254_v44  ;;  %v1665_v45 = vrot.slane %v1346_v30, 1  ;;  %v5712_v39 = vpop.f32.mrf.mxu0  ;;  %v3490_v44 = vld [vmem:[%s6227_s6 + $0x30] sm:$0xff]  ;;  %v2031_v62 = vshrl.u32 %v5498_v28, 16 }
 0x364   : > { %2284 = vrot.lane.b32.xlu1 %v2257_v22, %s4555_s21  ;;  %v1523_v22 = vor.u32 %v1522_v40, %v1518_v41  ;;  %v1669_v6 = vsel %vm1621_vm3, %v1667_v50, %v1668_v7  ;;  %v4534_v40 = vor.u32 %v4533_v8, %v4532_v21  ;;  %v5723_v7 = vpop.permute.xlu2 %1686 }
 0x365   : > { %v1664_v12 = vrot.slane %v4256_v56, 1 }
 0x366   : > { %v2551_v42 = vpop.permute.xlu1 %2550  ;;  %v5684_v55 = vsel %vm1348_vm2, %v1523_v22, %v2028_v11  ;;  %v2653_v57 = vrot.slane %v4534_v40, 1 }
 0x367   : > { %v5671_v34 = vsel %vm2728_vm12, %v2842_v48, %v2551_v42  ;;  %v1528_v48 = vsel %vm1348_vm2, %v1523_v22, %v1527_v47  ;;  %v1666_v63 = vsel %vm1621_vm3, %v1664_v12, %v1665_v45  ;;  %v2494_v42 = vshll.u32 %v5659_v19, 16  ;;  %v1137_v47 = vld [vmem:[#allocation2 + $0xbc] sm:$0x1]  ;;  %v4303_v12 = vld [vmem:[#allocation2 + $0xc0] sm:$0xe] }
 0x368   : > { %v1844_v19 = vunpack.c.l.b16 %v1137_v47  ;;  %v3492_v47 = vld [vmem:[%s6227_s6 + $0x40] sm:$0xff] }
 0x36a   : > { %2176 = vrot.lane.b32.xlu2 %v2143_v24, %s4554_s12  ;;  %v5729_v50 = vpack.c.b16 %v1844_v19, %v1844_v19 }
 0x36b   : > { %3517 = vperm.xlu0 %4364, %v3487_v2   ;;  %v2496_v2 = vrot.slane %v2494_v42, 1 }
 0x36c   : > { %2556 = vrot.lane.b32.xlu1 %v2485_v25, %s4556_s11  ;;  %v2038_v56 = vshll.u32 %v5729_v50, 16 }
 0x36d   : > { %v2497_v5 = vsel %vm1348_vm2, %v1523_v22, %v2496_v2  ;;  %v3491_v22 = vld [vmem:[%s6227_s6 + $0x38] sm:$0xff] }
 0x36e   : > { %v1801_v13 = vpop.permute.xlu1 %1800  ;;  %v2040_v8 = vrot.slane %v2038_v56, 1 }
 0x36f   : > { %v5688_v49 = vsel %vm2728_vm12, %v5573_v4, %v1801_v13  ;;  %v1201_v4 = vld [vmem:[#allocation2 + $0xbc] sm:$0x1]  ;;  %v4302_v13 = vld [vmem:[#allocation2 + $0xc0] sm:$0xf0] }
 0x370   : > { %v2323_v37 = vunpack.c.l.b16 %v1201_v4 }
 0x372   : > { %1569 = vrot.lane.b32.xlu2 %v1528_v48, %s4554_s12  ;;  %v5703_v30 = vpack.c.b16 %v2323_v37, %v2323_v37  ;;  %v5732_v48 = vpop.f32.mrf.mxu0 }
 0x373   : > { %3522 = vperm.xlu0 %4364, %v3488_v17   ;;  %v1202_v17 = vld [vmem:[#allocation2 + $0xc8] sm:$0x1] }
 0x374   : > { %1806 = vrot.lane.b32.xlu1 %v5615_v46, %s4556_s11  ;;  %v3489_v46 = vld [vmem:[%s6227_s6 + $0x28] sm:$0xff]  ;;  %v2654_v0 = vrot.slane %v5703_v30, 1  ;;  %v2324_v21 = vunpack.c.l.b16 %v1202_v17 }
 0x376   : > { %v2281_v24 = vpop.permute.xlu1 %2280  ;;  %v2655_v33 = vsel %vm1621_vm3, %v2653_v57, %v2654_v0  ;;  %v2340_v4 = vpack.c.b16 %v2324_v21, %v2324_v21  ;;  %v2043_v57 = vshrl.u32 %v5558_v26, 16  ;;  %v3493_v21 = vld [vmem:[%s6227_s6 + $0x48] sm:$0xff] }
 0x377   : > { %v2844_v41 = vsel %vm2695_vm11, %v5598_v14, %v2281_v24  ;;  %4029 = vmatmul.msk.bf16.gmra.mxu0 %vm2662_vm10, %v2655_v33  ;;  %v2033_v14 = vshll.u32 %v5498_v28, 16  ;;  %v4304_v28 = vor.u32 %v4303_v12, %v4302_v13  ;;  %v2045_v24 = vshll.u32 %v5558_v26, 16  ;;  %v1138_v33 = vld [vmem:[#allocation2 + $0xc8] sm:$0x1] }
 0x378   : > { %v2657_v40 = vrot.slane %v2340_v4, 1  ;;  %v1845_v2 = vunpack.c.l.b16 %v1138_v33  ;;  %v4278_v33 = vld [vmem:[#allocation2 + $0xc0] sm:$0xf0] }
 0x379   : > { %v2035_v25 = vrot.slane %v2033_v14, 1  ;;  %v2047_v0 = vrot.slane %v2045_v24, 1  ;;  %v3494_v24 = vld [vmem:[%s6227_s6 + $0x50] sm:$0xff] }
 0x37a   : > { %1698 = vrot.lane.b32.xlu2 %v1666_v63, %s4555_s21  ;;  %v2656_v63 = vrot.slane %v4304_v28, 1 }
 0x37b   : > { %3527 = vperm.xlu0 %4364, %v3489_v46   ;;  %v2036_v45 = vor.u32 %v2035_v25, %v2031_v62  ;;  %v5751_v46 = vpop.f32.mrf.mxu0  ;;  %v2048_v19 = vor.u32 %v2047_v0, %v2043_v57  ;;  %v2506_v25 = vshll.u32 %v5703_v30, 16 }
 0x37c   : > { %2286 = vrot.lane.b32.xlu1 %v5646_v29, %s4555_s21 }
 0x37d   : > { %v5743_v37 = vsel %vm1348_vm2, %v2036_v45, %v2040_v8  ;;  %v2508_v12 = vrot.slane %v2506_v25, 1 }
 0x37e   : > { %v2553_v43 = vpop.permute.xlu1 %2552 }
 0x37f   : > { %v5719_v52 = vsel %vm2728_vm12, %v2844_v41, %v2553_v43  ;;  %v5746_v41 = vpop.permute.xlu2 %1557  ;;  %v2501_v43 = vshll.u32 %v5698_v31, 16 }
 0x381   : > { %v2503_v62 = vrot.slane %v2501_v43, 1 }
 0x382   : > { %2290 = vrot.lane.b32.xlu2 %v5558_v26, %s4555_s21  ;;  %v1861_v26 = vpack.c.b16 %v1845_v2, %v1845_v2 }
 0x383   : > { %3532 = vperm.xlu0 %4364, %v3490_v44   ;;  %v2499_v44 = vshrl.u32 %v5698_v31, 16 }
 0x384   : > { %2558 = vrot.lane.b32.xlu1 %v2497_v5, %s4556_s11  ;;  %v2050_v5 = vshll.u32 %v1861_v26, 16 }
 0x385   : > { %v2504_v17 = vor.u32 %v2503_v62, %v2499_v44 }
 0x386   : > { %v5736_v11 = vpop.permute.xlu1 %1684 }
 0x387   : > { %v5767_v56 = vpop.permute.xlu2 %1690  ;;  %v2509_v28 = vsel %vm1348_vm2, %v2504_v17, %v2508_v12  ;;  %v3496_v17 = vld [vmem:[%s6227_s6 + $0x60] sm:$0xff] }
 0x38a   : > { %1700 = vrot.lane.b32.xlu2 %v1669_v6, %s4555_s21  ;;  %v2658_v6 = vsel %vm1621_vm3, %v2656_v63, %v2657_v40  ;;  %v2145_v63 = vrot.slane %v5729_v50, 1 }
 0x38b   : > { %3537 = vperm.xlu0 %4364, %v3491_v22   ;;  %4030 = vmatmul.msk.bf16.gmra.mxu0 %vm2662_vm10, %v2658_v6  ;;  %v2518_v6 = vshll.u32 %v2340_v4, 16  ;;  %v2163_v4 = vpop.permute.xlu0 %2162 }
 0x38c   : > { %1808 = vrot.lane.b32.xlu1 %v5646_v29, %s4556_s11  ;;  %v2797_v44 = vsel %vm2662_vm10, %v5277_v32, %v2163_v4  ;;  %v5841_v4 = vld [vmem:[%s6225_s4] ss:$0 sm:$0xff] }
 0x38d   : > { %v2520_v50 = vrot.slane %v2518_v6, 1  ;;  %v3499_v6 = vld [vmem:[%s6227_s6 + $0x78] sm:$0xff] }
 0x38e   : > { %v2545_v42 = vpop.permute.xlu1 %2544 }
 0x38f   : > { %v2873_v14 = vsel %vm2728_vm12, %v5257_v3, %v2545_v42  ;;  %v4433_v3 = vld [vmem:[#allocation2 + $0xb4] sm:$0xe]  ;;  %v5778_v8 = vpop.permute.xlu2 %2170  ;;  %v2521_v2 = vsel %vm1348_vm2, %v2048_v19, %v2520_v50  ;;  %v4369_v50 = vld [vmem:[#allocation2 + $0x78] sm:$0xff]  }
 0x390   : > { %3223 = vmatmul.bf16.gmra.mxu3 %v2873_v14  ;;  %v4434_v30 = vor.u32 %v4433_v3, %v5500_v10  ;;  %v4279_v14 = vld [vmem:[#allocation2 + $0xc0] sm:$0xe] }
 0x392   : > { %2292 = vrot.lane.b32.xlu2 %v5492_v60, %s4555_s21  ;;  %v2052_v60 = vrot.slane %v2050_v5, 1  ;;  %v2144_v22 = vrot.slane %v4434_v30, 1 }
 0x393   : > { %3542 = vperm.xlu0 %4364, %v3492_v47   ;;  %v4280_v47 = vor.u32 %v4279_v14, %v4278_v33  ;;  %v2684_v33 = vsel %vm2662_vm10, %v4369_v50, %v5617_v36 }
 0x394   : > { %2288 = vrot.lane.b32.xlu1 %v5698_v31, %s4555_s21  ;;  %v5770_v45 = vsel %vm1348_vm2, %v2048_v19, %v2052_v60  ;;  %v2146_v10 = vsel %vm1621_vm3, %v2144_v22, %v2145_v63  ;;  %v2148_v60 = vrot.slane %v1861_v26, 1  ;;  %s3839_s21 = scalar_lea.sflag [#allocation5], %s4685_s22 }
 0x395   : > { %v2147_v3 = vrot.slane %v4280_v47, 1 }
 0x396   : > { %v1556_v13 = vpop.permute.xlu1 %1555 }
 0x397   : > { %v2678_v40 = vsel %vm2662_vm10, %v5397_v58, %v1556_v13  ;;  %v5791_v43 = vpop.permute.xlu2 %1563  ;;  %v3495_v58 = vld [vmem:[%s6227_s6 + $0x58] sm:$0xff]  ;;  %v4368_v13 = vld [vmem:[#allocation2 + $0x60] sm:$0xff]  }
 0x398   : > { %v2711_v0 = vsel %vm2695_vm11, %v2678_v40, %v5736_v11  ;;  %v3110_v11 = vpop.f32.mrf.mxu2  ;;  %v2680_v19 = vsel %vm2662_vm10, %v4368_v13, %v5746_v41  ;;  %v3497_v41 = vld [vmem:[%s6227_s6 + $0x68] sm:$0xff]  ;;  %v1983_v13 = vshrl.u32 %v5570_v18, 16 }
 0x399   : > { %v2713_v32 = vsel %vm2695_vm11, %v2680_v19, %v5723_v7  ;;  %v3498_v7 = vld [vmem:[%s6227_s6 + $0x70] sm:$0xff]  ;;  %v3111_v36 = vadd.f32 %v5841_v4, %v3110_v11 }
 0x39b   : > { %3547 = vperm.xlu0 %4364, %v3493_v21   ;;  %v2149_v21 = vsel %vm1621_vm3, %v2147_v3, %v2148_v60  ;;  %v5853_v60 = vpop.f32.mrf.mxu0 }
 0x39c   : > { %2560 = vrot.lane.b32.xlu1 %v2509_v28, %s4556_s11  ;;  %v2754_v28 = vsel %vm2728_vm12, %v2713_v32, %v5625_v15 }
 0x39e   : > { %v2275_v31 = vpop.permute.xlu1 %2274 }
 0x39f   : > { %v2838_v62 = vsel %vm2695_vm11, %v2797_v44, %v2275_v31  ;;  %v1693_v12 = vpop.permute.xlu2 %1692 }
 0x3a0   : > { %v3112_v26 = vpop.f32.mrf.mxu2 }
 0x3a1   : > { %v3113_v11 = vadd.f32 %v5841_v4, %v3112_v26 }
 0x3a3   : > { %3552 = vperm.xlu0 %4364, %v3494_v24   ;;  %v3199_v24 = vpop.f32.mrf.mxu3 }
 0x3a4   : > { %2178 = vrot.lane.b32.xlu1 %v2146_v10, %s4554_s12 }
 0x3a6   : > { %v1797_v57 = vpop.permute.xlu1 %1796 }
 0x3a7   : > { %v2751_v42 = vsel %vm2728_vm12, %v2711_v0, %v1797_v57  ;;  %v5816_v31 = vpop.permute.xlu2 %2172 }
 0x3a8   : > { %3144 = vmatmul.bf16.gmra.mxu2 %v2751_v42  ;;  %v3115_v63 = vpop.f32.mrf.mxu2 }
 0x3ab   : > { %3557 = vperm.xlu0 %4364, %v3495_v58   ;;  %v3201_v0 = vpop.f32.mrf.mxu3 }
 0x3ac   : > { %2562 = vrot.lane.b32.xlu1 %v2521_v2, %s4556_s11  ;;  %s6077_s11 = scalar_lea.vmem [#allocation6], %s3934_s10  ;;  %s4114_s10 = sshll.u32 %s4620_s28, 8 }
 0x3ad   : > { %s3850_s9 = scalar_lea.hbm %s6228_s7, %s4114_s10  ;;  %s3851_s23 = sshll.u32 %s6077_s11, 4  ;;  %s3852_s23 = int_to_ptr.vmem [resolvable:$true] %s3851_s23 }
 0x3ae   : > { %v2547_v25 = vpop.permute.xlu1 %2546  ;;  %s3853_s29 = sshll.u32 %s3850_s9, 4  ;;  %s3854_s29 = int_to_ptr.hbm [resolvable:$true] %s3853_s29 }
 0x3af   : > { %v2876_v5 = vsel %vm2728_vm12, %v2838_v62, %v2547_v25  ;;  %v5822_v15 = vpop.permute.xlu2 %1565  ;;  %v3200_v62 = vadd.f32 %v3199_v24, %v3111_v36  ;;  %s4482_s28 = sshra.s32 %s3854_s29, 4  ;;  %s4483_s28 = int_to_ptr.hbm [resolvable:$true] %s4482_s28 }
 0x3b0   : > { %3228 = vmatmul.bf16.gmra.mxu3 %v2876_v5  ;;  %v3117_v10 = vpop.f32.mrf.mxu2  ;;  %s4484_s8 = scalar_lea.hbm %s4483_s28, 256  ;;  %p4489_p0 = scmp.lt.s32.totalorder %s4483_s28, %s6228_s7 }
 0x3b1   : > { %v3289_v25 = vadd.f32 %v5640_v53, %v3200_v62  ;;  %p4485_p6 = scmp.ne.s32.totalorder %s4483_s28, %s4484_s8  ;;  %p4490_p1 = scmp.lt.s32.totalorder %s4488_s19, %s4484_s8 }
 0x3b3   : > { %3562 = vperm.xlu0 %4364, %v3496_v17   ;;  %v1990_v17 = vshll.u32 %v5436_v1, 16  ;;  %p4486_p9 = pnand %p4485_p6, %p4649_p11  ;;  %p4491_p3 = por %p4490_p1, %p4489_p0 }
 0x3b4   : > { %2180 = vrot.lane.b32.xlu1 %v2149_v21, %s4554_s12  ;;  %v2686_v21 = vsel %vm2662_vm10, %v5446_v54, %v5791_v43 }
 0x3b5   : > { %v1992_v24 = vrot.slane %v1990_v17, 1  ;;  %p4487_p13 = pneg %p4486_p9 }
 0x3b6   : > { %v1803_v30 = vpop.permute.xlu1 %1802 }
 0x3b7   : > { %v1695_v42 = vpop.permute.xlu2 %1694  ;;  %p4492_p4 = pnand %p4491_p3, %p4487_p13 }
 0x3b8   : > { %3149 = vmatmul.bf16.gmra.mxu2 %v2754_v28  ;;  %v3202_v28 = vadd.f32 %v3201_v0, %v3113_v11 }
 0x3ba   : > { %v3291_v1 = vadd.f32 %v5667_v51, %v3202_v28 }
 0x3bb   : > { %3567 = vperm.xlu0 %4364, %v3497_v41  }
 0x3bc   : > { %v3369_v0 = vmax.f32 %v3291_v1, 0.0 }
 0x3be   : > { %v2283_v22 = vpop.permute.xlu1 %2282 }
 0x3bf   : > { %v5845_v47 = vpop.permute.xlu2 %2174 }
 0x3c0   : > { %3233 = vmatmul.bf16.gmra.mxu3 %v5649_v27  ;;  %v5829_v27 = vpop.f32.mrf.mxu2 }
 0x3c3   : > { %3572 = vperm.xlu0 %4364, %v3498_v7  }
 0x3c6   : > { %v2555_v40 = vpop.permute.xlu1 %2554 }
 0x3c7   : > { %v1568_v32 = vpop.permute.xlu2 %1567 }
 0x3c8   : > { %3154 = vmatmul.bf16.gmra.mxu2 %v5688_v49  ;;  %v2717_v49 = vsel %vm2695_vm11, %v2684_v33, %v5767_v56  ;;  %v5843_v2 = vpop.f32.mrf.mxu2  ;;  %v1985_v56 = vshll.u32 %v5570_v18, 16 }
 0x3c9   : > { %v2760_v58 = vsel %vm2728_vm12, %v2717_v49, %v1803_v30  ;;  %v3368_v30 = vmax.f32 %v3289_v25, 0.0 }
 0x3ca   : > { %v1987_v19 = vrot.slane %v1985_v56, 1 }
 0x3cb   : > { %3577 = vperm.xlu0 %4364, %v3499_v6   ;;  %v3116_v6 = vadd.f32 %v5841_v4, %v3115_v63  ;;  %v3118_v63 = vadd.f32 %v5841_v4, %v3117_v10 }
 0x3cc   : > { %v1988_v7 = vor.u32 %v1987_v19, %v1983_v13  ;;  %v3121_v19 = vadd.f32 %v5841_v4, %v5829_v27 }
 0x3ce   : > { %v1805_v57 = vpop.permute.xlu1 %1804  ;;  %v1993_v26 = vsel %vm1348_vm2, %v1988_v7, %v1992_v24 }
 0x3cf   : > { %v2809_v43 = vsel %vm2662_vm10, %v1993_v26, %v5778_v8  ;;  %v1697_v33 = vpop.permute.xlu2 %1696  ;;  %v2688_v8 = vsel %vm2662_vm10, %v5480_v23, %v5822_v15  ;;  %v2812_v23 = vsel %vm2662_vm10, %v5564_v59, %v5816_v31  ;;  %v3123_v59 = vadd.f32 %v5841_v4, %v5843_v2 }
 0x3d0   : > { %3238 = vmatmul.bf16.gmra.mxu3 %v5671_v34  ;;  %v3204_v34 = vpop.f32.mrf.mxu3  ;;  %v5851_v3 = vpop.f32.mrf.mxu2  ;;  %v2690_v31 = vsel %vm2662_vm10, %v5582_v20, %v1568_v32  ;;  %v2815_v20 = vsel %vm2662_vm10, %v5635_v9, %v5845_v47 }
 0x3d1   : > { %v3205_v50 = vadd.f32 %v3204_v34, %v3116_v6  ;;  %v2721_v34 = vsel %vm2695_vm11, %v2688_v8, %v1695_v42  ;;  %v3126_v2 = vadd.f32 %v5841_v4, %v5851_v3  ;;  %v1811_v3 = vpop.permute.xlu0 %1810 }
 0x3d6   : > { %v5835_v14 = vpop.permute.xlu1 %2284 }
 0x3d7   : > { %v2177_v13 = vpop.permute.xlu2 %2176  ;;  %v2848_v15 = vsel %vm2695_vm11, %v2812_v23, %v5835_v14  ;;  %v2723_v14 = vsel %vm2695_vm11, %v2690_v31, %v1697_v33 }
 0x3d8   : > { %3159 = vmatmul.bf16.gmra.mxu2 %v2760_v58  ;;  %v3206_v5 = vpop.f32.mrf.mxu3  ;;  %v5866_v54 = vpop.f32.mrf.mxu2  ;;  %v3294_v58 = vadd.f32 %v5694_v16, %v3205_v50 }
 0x3d9   : > { %v3128_v33 = vadd.f32 %v5841_v4, %v5866_v54  ;;  %v2818_v54 = vsel %vm2662_vm10, %v5684_v55, %v2177_v13 }
 0x3da   : > { %v3370_v56 = vmax.f32 %v3294_v58, 0.0 }
 0x3de   : > { %v2557_v44 = vpop.permute.xlu1 %2556 }
 0x3df   : > { %v1570_v27 = vpop.permute.xlu2 %1569 }
 0x3e0   : > { %3243 = vmatmul.bf16.gmra.mxu3 %v5719_v52  ;;  %v2719_v52 = vsel %vm2695_vm11, %v2686_v21, %v1693_v12  ;;  %v3209_v18 = vpop.f32.mrf.mxu3  ;;  %v5870_v12 = vpop.f32.mrf.mxu0  ;;  %v2891_v21 = vsel %vm2728_vm12, %v2848_v15, %v2557_v44  ;;  %v2692_v9 = vsel %vm2662_vm10, %v5646_v29, %v1570_v27 }
 0x3e1   : > { %v2763_v41 = vsel %vm2728_vm12, %v2719_v52, %v1805_v57  ;;  %v2846_v57 = vsel %vm2695_vm11, %v2809_v43, %v2283_v22  ;;  %v5876_v62 = vpop.f32.mrf.mxu2 }
 0x3e2   : > { %v2888_v49 = vsel %vm2728_vm12, %v2846_v57, %v2555_v40  ;;  %v3207_v40 = vadd.f32 %v3206_v5, %v3118_v63  ;;  %v3210_v5 = vadd.f32 %v3209_v18, %v3121_v19 }
 0x3e4   : > { %v3296_v10 = vadd.f32 %v5712_v39, %v3207_v40  ;;  %v3299_v39 = vadd.f32 %v5732_v48, %v3210_v5  ;;  %v3131_v40 = vadd.f32 %v5841_v4, %v5876_v62 }
 0x3e6   : > { %v1807_v53 = vpop.permute.xlu1 %1806  ;;  %v3371_v42 = vmax.f32 %v3296_v10, 0.0 }
 0x3e7   : > { %v2766_v25 = vsel %vm2728_vm12, %v2721_v34, %v1807_v53  ;;  %v1699_v32 = vpop.permute.xlu2 %1698 }
 0x3e8   : > { %3164 = vmatmul.bf16.gmra.mxu2 %v2763_v41  ;;  %v3211_v36 = vpop.f32.mrf.mxu3  ;;  %v5881_v22 = vpop.f32.mrf.mxu0  ;;  %v2725_v47 = vsel %vm2695_vm11, %v2692_v9, %v1699_v32 }
 0x3e9   : > { %3400 = vxpose.xlu1.b32.start [1/16] (narrow) %v3368_v30, 32  ;;  %v5893_v11 = vpop.f32.mrf.mxu2  ;;  %v3372_v30 = vmax.f32 %v3299_v39, 0.0  ;;  %v3212_v28 = vadd.f32 %v3211_v36, %v3123_v59  ;;  %v2772_v63 = vsel %vm2728_vm12, %v2725_v47, %v1811_v3  ;;  %v4436_v39 = vld [vmem:[#allocation2 + $0xcc] sm:$0xe] }
 0x3ea   : > { %v3133_v13 = vadd.f32 %v5841_v4, %v5893_v11  ;;  %v4437_v11 = vor.u32 %v4436_v39, %v5494_v35 }
 0x3eb   : > { %v3301_v48 = vadd.f32 %v5751_v46, %v3212_v28 }
 0x3ed   : > { %v3373_v26 = vmax.f32 %v3301_v48, 0.0 }
 0x3ee   : > { %v2287_v51 = vpop.permute.xlu1 %2286 }
 0x3ef   : > { %v2850_v1 = vsel %vm2695_vm11, %v2815_v20, %v2287_v51  ;;  %v2291_v58 = vpop.permute.xlu2 %2290 }
 0x3f0   : > { %3248 = vmatmul.bf16.gmra.mxu3 %v2888_v49  ;;  %v3214_v17 = vpop.f32.mrf.mxu3  ;;  %v5896_v52 = vpop.f32.mrf.mxu0 }
 0x3f1   : > { %3401 = vxpose.xlu1.b32.cont [2/16] (narrow) %v3369_v0, 32  ;;  %v5904_v44 = vpop.f32.mrf.mxu2  ;;  %v3215_v6 = vadd.f32 %v3214_v17, %v3126_v2 }
 0x3f2   : > { %v3136_v28 = vadd.f32 %v5841_v4, %v5904_v44 }
 0x3f3   : > { %v3304_v50 = vadd.f32 %v5853_v60, %v3215_v6 }
 0x3f5   : > { %v3374_v49 = vmax.f32 %v3304_v50, 0.0 }
 0x3f6   : > { %v2559_v16 = vpop.permute.xlu1 %2558 }
 0x3f7   : > { %v2894_v57 = vsel %vm2728_vm12, %v2850_v1, %v2559_v16  ;;  %v1701_v17 = vpop.permute.xlu2 %1700 }
 0x3f8   : > { %3169 = vmatmul.bf16.gmra.mxu2 %v2766_v25  ;;  %v3216_v41 = vpop.f32.mrf.mxu3  ;;  %v5907_v24 = vpop.f32.mrf.mxu0 }
 0x3f9   : > { %3402 = vxpose.xlu1.b32.cont [3/16] (narrow) %v3370_v56, 32  ;;  %v5917_v0 = vpop.f32.mrf.mxu2  ;;  %v3217_v51 = vadd.f32 %v3216_v41, %v3128_v33  ;;  %v1572_v56 = vpop.permute.xlu0 %1571 }
 0x3fa   : > { %v2694_v62 = vsel %vm2662_vm10, %v5502_v61, %v1572_v56  ;;  %v3138_v44 = vadd.f32 %v5841_v4, %v5917_v0 }
 0x3fb   : > { %v3306_v29 = vadd.f32 %v5870_v12, %v3217_v51  ;;  %v2727_v55 = vsel %vm2695_vm11, %v2694_v62, %v1701_v17 }
 0x3fd   : > { %v3375_v16 = vmax.f32 %v3306_v29, 0.0 }
 0x3fe   : > { %v1809_v53 = vpop.permute.xlu1 %1808 }
 0x3ff   : > { %v2769_v7 = vsel %vm2728_vm12, %v2723_v14, %v1809_v53  ;;  %v2293_v50 = vpop.permute.xlu2 %2292 }
 0x400   : > { %3253 = vmatmul.bf16.gmra.mxu3 %v2891_v21  ;;  %v3219_v43 = vpop.f32.mrf.mxu3  ;;  %v5919_v46 = vpop.f32.mrf.mxu0 }
 0x401   : > { %3403 = vxpose.xlu1.b32.cont [4/16] (narrow) %v3371_v42, 32  ;;  %v5928_v34 = vpop.f32.mrf.mxu2  ;;  %v3220_v10 = vadd.f32 %v3219_v43, %v3131_v40  ;;  %v1813_v21 = vpop.permute.xlu0 %1812 }
 0x402   : > { %v2775_v59 = vsel %vm2728_vm12, %v2727_v55, %v1813_v21  ;;  %v3141_v0 = vadd.f32 %v5841_v4, %v5928_v34 }
 0x403   : > { %v3309_v12 = vadd.f32 %v5881_v22, %v3220_v10 }
 0x405   : > { %v3376_v27 = vmax.f32 %v3309_v12, 0.0 }
 0x406   : > { %v2289_v18 = vpop.permute.xlu1 %2288 }
 0x407   : > { %v2852_v25 = vsel %vm2695_vm11, %v2818_v54, %v2289_v18 }
 0x408   : > { %3174 = vmatmul.bf16.gmra.mxu2 %v2769_v7  ;;  %v3221_v8 = vpop.f32.mrf.mxu3  ;;  %v5930_v60 = vpop.f32.mrf.mxu0 }
 0x409   : > { %3404 = vxpose.xlu1.b32.cont [5/16] (narrow) %v3372_v30, 32  ;;  %v3142_v42 = vpop.f32.mrf.mxu2  ;;  %v3222_v53 = vadd.f32 %v3221_v8, %v3133_v13  ;;  %v2565_v33 = vpop.permute.xlu0 %2564 }
 0x40b   : > { %v3311_v22 = vadd.f32 %v5896_v52, %v3222_v53  ;;  %v2659_v52 = vrot.slane %v4437_v11, 1 }
 0x40d   : > { %v3377_v48 = vmax.f32 %v3311_v22, 0.0 }
 0x40e   : > { %v2561_v36 = vpop.permute.xlu1 %2560 }
 0x40f   : > { %v2897_v19 = vsel %vm2728_vm12, %v2852_v25, %v2561_v36 }
 0x410   : > { %3258 = vmatmul.bf16.gmra.mxu3 %v2894_v57  ;;  %v3320_v5 = vpop.f32.mrf.mxu0 }
 0x411   : > { %3405 = vxpose.xlu1.b32.cont [6/16] (narrow) %v3373_v26, 32 }
 0x413   : > { %v3224_v23 = vpop.f32.mrf.mxu3 }
 0x414   : > { %v3225_v2 = vadd.f32 %v3224_v23, %v3136_v28 }
 0x416   : > { %v2179_v15 = vpop.permute.xlu1 %2178  ;;  %v3314_v32 = vadd.f32 %v5907_v24, %v3225_v2 }
 0x417   : > { %v2821_v31 = vsel %vm2662_vm10, %v5743_v37, %v2179_v15  ;;  %v2660_v37 = vrot.slane %v5539_v38, 1 }
 0x418   : > { %3179 = vmatmul.bf16.gmra.mxu2 %v2772_v63  ;;  %v3323_v41 = vpop.f32.mrf.mxu0  ;;  %v2854_v7 = vsel %vm2695_vm11, %v2821_v31, %v2291_v58  ;;  %v3378_v6 = vmax.f32 %v3314_v32, 0.0 }
 0x419   : > { %3406 = vxpose.xlu1.b32.cont [7/16] (narrow) %v3374_v49, 32  ;;  %v2661_v35 = vsel %vm1621_vm3, %v2659_v52, %v2660_v37 }
 0x41b   : > { %v3226_v61 = vpop.f32.mrf.mxu3 }
 0x41c   : > { %v3227_v43 = vadd.f32 %v3226_v61, %v3138_v44 }
 0x41e   : > { %v2563_v30 = vpop.permute.xlu1 %2562  ;;  %v3316_v38 = vadd.f32 %v5919_v46, %v3227_v43  ;;  %v3143_v46 = vadd.f32 %v5841_v4, %v3142_v42 }
 0x41f   : > { %v2900_v20 = vsel %vm2728_vm12, %v2854_v7, %v2563_v30 }
 0x420   : > { %3263 = vmatmul.bf16.gmra.mxu3 %v2897_v19  ;;  %v3325_v57 = vpop.f32.mrf.mxu0  ;;  %v3379_v49 = vmax.f32 %v3316_v38, 0.0 }
 0x421   : > { %3407 = vxpose.xlu1.b32.cont [8/16] (narrow) %v3375_v16, 32 }
 0x426   : > { %v2181_v26 = vpop.permute.xlu1 %2180 }
 0x427   : > { %v2824_v3 = vsel %vm2662_vm10, %v5770_v45, %v2181_v26 }
 0x428   : > { %3184 = vmatmul.bf16.gmra.mxu2 %v2775_v59  ;;  %v2856_v47 = vsel %vm2695_vm11, %v2824_v3, %v2293_v50  ;;  %v3328_v63 = vpop.f32.mrf.mxu0 }
 0x429   : > { %3408 = vxpose.xlu1.b32.cont [9/16] (narrow) %v3376_v27, 32  ;;  %v2903_v58 = vsel %vm2728_vm12, %v2856_v47, %v2565_v33 }
 0x42b   : > { %v3145_v14 = vpop.f32.mrf.mxu2 }
 0x42c   : > { %v3146_v16 = vadd.f32 %v5841_v4, %v3145_v14 }
 0x430   : > { %3268 = vmatmul.bf16.gmra.mxu3 %v2900_v20  ;;  %v3330_v25 = vpop.f32.mrf.mxu0 }
 0x431   : > { %3409 = vxpose.xlu1.b32.cont [10/16] (narrow) %v3377_v48, 32 }
 0x433   : > { %v3147_v1 = vpop.f32.mrf.mxu2  ;;  %v3229_v18 = vpop.f32.mrf.mxu3 }
 0x434   : > { %v3230_v51 = vadd.f32 %v3229_v18, %v3141_v0  ;;  %v3148_v42 = vadd.f32 %v5841_v4, %v3147_v1 }
 0x436   : > { %v3319_v45 = vadd.f32 %v5930_v60, %v3230_v51 }
 0x438   : > { %4031 = vmatmul.msk.bf16.vlgmr.msrb.gmra.mxu2 %vm2662_vm10, %v2661_v35  ;;  %v3380_v29 = vmax.f32 %v3319_v45, 0.0  ;;  %v3333_v62 = vpop.f32.mrf.mxu0 }
 0x439   : > { %3410 = vxpose.xlu1.b32.cont [11/16] (narrow) %v3378_v6, 32 }
 0x43b   : > { %v3150_v24 = vpop.f32.mrf.mxu2  ;;  %v3231_v9 = vpop.f32.mrf.mxu3 }
 0x43c   : > { %v3232_v56 = vadd.f32 %v3231_v9, %v3143_v46  ;;  %v3151_v17 = vadd.f32 %v5841_v4, %v3150_v24 }
 0x43e   : > { %v3321_v40 = vadd.f32 %v3320_v5, %v3232_v56 }
 0x440   : > { %3273 = vmatmul.bf16.gmra.mxu3 %v2903_v58  ;;  %v3381_v10 = vmax.f32 %v3321_v40, 0.0  ;;  %v3335_v14 = vpop.f32.mrf.mxu0 }
 0x441   : > { %3411 = vxpose.xlu1.b32.cont [12/16] (narrow) %v3379_v49, 32 }
 0x443   : > { %v3152_v36 = vpop.f32.mrf.mxu2  ;;  %v3234_v8 = vpop.f32.mrf.mxu3 }
 0x444   : > { %v3235_v19 = vadd.f32 %v3234_v8, %v3146_v16  ;;  %v3153_v39 = vadd.f32 %v5841_v4, %v3152_v36 }
 0x446   : > { %v3324_v23 = vadd.f32 %v3323_v41, %v3235_v19 }
 0x448   : > { %v3382_v13 = vmax.f32 %v3324_v23, 0.0  ;;  %v3338_v2 = vpop.f32.mrf.mxu0 }
 0x449   : > { %3412 = vxpose.xlu1.b32.cont [13/16] (narrow) %v3380_v29, 32 }
 0x44b   : > { %v3155_v54 = vpop.f32.mrf.mxu2  ;;  %v3236_v34 = vpop.f32.mrf.mxu3 }
 0x44c   : > { %v3237_v5 = vadd.f32 %v3236_v34, %v3148_v42  ;;  %v3156_v28 = vadd.f32 %v5841_v4, %v3155_v54 }
 0x44e   : > { %v3326_v27 = vadd.f32 %v3325_v57, %v3237_v5 }
 0x450   : > { %v3383_v61 = vmax.f32 %v3326_v27, 0.0  ;;  %v3340_v35 = vpop.f32.mrf.mxu0 }
 0x451   : > { %3413 = vxpose.xlu1.b32.cont [14/16] (narrow) %v3381_v10, 32 }
 0x453   : > { %v3157_v60 = vpop.f32.mrf.mxu2  ;;  %v3239_v15 = vpop.f32.mrf.mxu3 }
 0x454   : > { %v3240_v12 = vadd.f32 %v3239_v15, %v3151_v17  ;;  %v3158_v52 = vadd.f32 %v5841_v4, %v3157_v60 }
 0x456   : > { %v3329_v55 = vadd.f32 %v3328_v63, %v3240_v12 }
 0x458   : > { %v3384_v21 = vmax.f32 %v3329_v55, 0.0  ;;  %v3343_v38 = vpop.f32.mrf.mxu0 }
 0x459   : > { %3414 = vxpose.xlu1.b32.cont [15/16] (narrow) %v3382_v13, 32 }
 0x45a   : > { %3432 = vxpose.xlu2.b32.start [1/16] (narrow) %v3384_v21, 32 }
 0x45b   : > { %v3160_v53 = vpop.f32.mrf.mxu2  ;;  %v3241_v59 = vpop.f32.mrf.mxu3 }
 0x45c   : > { %v3242_v22 = vadd.f32 %v3241_v59, %v3153_v39  ;;  %v3161_v26 = vadd.f32 %v5841_v4, %v3160_v53 }
 0x45e   : > { %v3331_v31 = vadd.f32 %v3330_v25, %v3242_v22 }
 0x460   : > { %v3385_v30 = vmax.f32 %v3331_v31, 0.0  ;;  %v3345_v36 = vpop.f32.mrf.mxu0 }
 0x461   : > { %3415 = vxpose.xlu1.b32.end [16/16] (narrow) %v3383_v61, 32  ;;  %v5982_v61 = vpop.permute.xlu0 %3502 }
 0x462   : > { %3433 = vxpose.xlu2.b32.cont [2/16] (narrow) %v3385_v30, 32 }
 0x463   : > { %v3162_v11 = vpop.f32.mrf.mxu2  ;;  %v3244_v41 = vpop.f32.mrf.mxu3 }
 0x464   : > { %v3245_v7 = vadd.f32 %v3244_v41, %v3156_v28  ;;  %v3163_v24 = vadd.f32 %v5841_v4, %v3162_v11 }
 0x466   : > { %v3334_v48 = vadd.f32 %v3333_v62, %v3245_v7 }
 0x468   : > { %v3386_v20 = vmax.f32 %v3334_v48, 0.0  ;;  %v3348_v34 = vpop.f32.mrf.mxu0 }
 0x46a   : > { %3434 = vxpose.xlu2.b32.cont [3/16] (narrow) %v3386_v20, 32 }
 0x46b   : > { %v3165_v37 = vpop.f32.mrf.mxu2  ;;  %v3246_v32 = vpop.f32.mrf.mxu3 }
 0x46c   : > { %v3247_v1 = vadd.f32 %v3246_v32, %v3158_v52  ;;  %v3166_v51 = vadd.f32 %v5841_v4, %v3165_v37  ;;  %v5988_v37 = vld [vmem:[%s6226_s5] sm:$0xff]  ;;  %v5993_v32 = vld [vmem:[%s6226_s5 + $0x38] sm:$0xff] }
 0x46e   : > { %v3336_v18 = vadd.f32 %v3335_v14, %v3247_v1 }
 0x470   : > { %v3387_v44 = vmax.f32 %v3336_v18, 0.0  ;;  %v3350_v42 = vpop.f32.mrf.mxu0  ;;  %v5995_v18 = vpop.permute.xlu0 %3507 }
 0x472   : > { %3435 = vxpose.xlu2.b32.cont [4/16] (narrow) %v3387_v44, 32 }
 0x473   : > { %v3167_v6 = vpop.f32.mrf.mxu2  ;;  %v3249_v43 = vpop.f32.mrf.mxu3 }
 0x474   : > { %v3250_v57 = vadd.f32 %v3249_v43, %v3161_v26  ;;  %v3168_v29 = vadd.f32 %v5841_v4, %v3167_v6 }
 0x476   : > { %v3339_v3 = vadd.f32 %v3338_v2, %v3250_v57 }
 0x478   : > { %v3388_v50 = vmax.f32 %v3339_v3, 0.0  ;;  %v3353_v53 = vpop.f32.mrf.mxu0 }
 0x47a   : > { %3436 = vxpose.xlu2.b32.cont [5/16] (narrow) %v3388_v50, 32 }
 0x47b   : > { %v3170_v9 = vpop.f32.mrf.mxu2  ;;  %v3251_v47 = vpop.f32.mrf.mxu3 }
 0x47c   : > { %v3252_v0 = vadd.f32 %v3251_v47, %v3163_v24  ;;  %v3171_v19 = vadd.f32 %v5841_v4, %v3170_v9 }
 0x47e   : > { %v3341_v33 = vadd.f32 %v3340_v35, %v3252_v0 }
 0x480   : > { %v3389_v49 = vmax.f32 %v3341_v33, 0.0  ;;  %v3355_v48 = vpop.f32.mrf.mxu0  ;;  %v4107_v33 = vld [vmem:[%s6226_s5 + $0x8] sm:$0xff] }
 0x482   : > { %3437 = vxpose.xlu2.b32.cont [6/16] (narrow) %v3389_v49, 32 }
 0x483   : > { %v3172_v58 = vpop.f32.mrf.mxu2  ;;  %v3254_v63 = vpop.f32.mrf.mxu3 }
 0x484   : > { %v3255_v45 = vadd.f32 %v3254_v63, %v3166_v51  ;;  %v3173_v55 = vadd.f32 %v5841_v4, %v3172_v58 }
 0x486   : > { %v3344_v8 = vadd.f32 %v3343_v38, %v3255_v45  ;;  %v6002_v38 = vpop.permute.xlu0 %3512 }
 0x488   : > { %v3390_v46 = vmax.f32 %v3344_v8, 0.0  ;;  %v3358_v43 = vpop.f32.mrf.mxu0 }
 0x48a   : > { %3438 = vxpose.xlu2.b32.cont [7/16] (narrow) %v3390_v46, 32 }
 0x48b   : > { %v3175_v56 = vpop.f32.mrf.mxu2  ;;  %v3256_v40 = vpop.f32.mrf.mxu3 }
 0x48c   : > { %v3257_v54 = vadd.f32 %v3256_v40, %v3168_v29  ;;  %v3176_v22 = vadd.f32 %v5841_v4, %v3175_v56 }
 0x48d   : > { %v3416_v25 = vpop.trf.xlu1 }
 0x48e   : > { %v3346_v16 = vadd.f32 %v3345_v36, %v3257_v54  ;;  %v6009_v36 = vpop.permute.xlu0 %3517 }
 0x490   : > { %v3391_v10 = vmax.f32 %v3346_v16, 0.0  ;;  %v3360_v51 = vpop.f32.mrf.mxu0  ;;  %v6016_v16 = vld [vmem:[%s6226_s5 + $0x10] sm:$0xff] }
 0x492   : > { %3439 = vxpose.xlu2.b32.cont [8/16] (narrow) %v3391_v10, 32 }
 0x493   : > { %v3177_v17 = vpop.f32.mrf.mxu2  ;;  %v3259_v23 = vpop.f32.mrf.mxu3 }
 0x494   : > { %v3260_v60 = vadd.f32 %v3259_v23, %v3171_v19  ;;  %v3178_v2 = vadd.f32 %v5841_v4, %v3177_v17 }
 0x495   : > { %v3417_v15 = vpop.trf.xlu1 }
 0x496   : > { %v3349_v12 = vadd.f32 %v3348_v34, %v3260_v60  ;;  %v3464_v20 = vpack.c.bf16 %v3417_v15, %v3416_v25  ;;  %v6018_v10 = vpop.permute.xlu0 %3522 }
 0x498   : > { %v3392_v62 = vmax.f32 %v3349_v12, 0.0 }
 0x49a   : > { %3440 = vxpose.xlu2.b32.cont [9/16] (narrow) %v3392_v62, 32 }
 0x49b   : > { %v3180_v13 = vpop.f32.mrf.mxu2  ;;  %v3261_v5 = vpop.f32.mrf.mxu3 }
 0x49c   : > { %v3262_v21 = vadd.f32 %v3261_v5, %v3173_v55  ;;  %v3181_v6 = vadd.f32 %v5841_v4, %v3180_v13  ;;  %v6047_v5 = vld [vmem:[%s6226_s5 + $0x28] sm:$0xff] }
 0x49d   : > { %v3418_v39 = vpop.trf.xlu1 }
 0x49e   : > { %v3351_v27 = vadd.f32 %v3350_v42, %v3262_v21  ;;  %v6022_v60 = vpop.permute.xlu0 %3527  ;;  %v6038_v42 = vld [vmem:[%s6226_s5 + $0x20] sm:$0xff] }
 0x4a0   : > { %v3393_v59 = vmax.f32 %v3351_v27, 0.0 }
 0x4a2   : > { %3441 = vxpose.xlu2.b32.cont [10/16] (narrow) %v3393_v59, 32  ;;  %v6058_v59 = vld [vmem:[%s6226_s5 + $0x30] sm:$0xff] }
 0x4a3   : > { %v3264_v31 = vpop.f32.mrf.mxu3  ;;  %v3182_v30 = vpop.f32.mrf.mxu2 }
 0x4a4   : > { %v3265_v14 = vadd.f32 %v3264_v31, %v3176_v22  ;;  %v3183_v47 = vadd.f32 %v5841_v4, %v3182_v30 }
 0x4a5   : > { %v3419_v28 = vpop.trf.xlu1 }
 0x4a6   : > { %v3354_v11 = vadd.f32 %v3353_v53, %v3265_v14  ;;  %v3466_v41 = vpack.c.bf16 %v3419_v28, %v3418_v39  ;;  %v6031_v15 = vpop.permute.xlu0 %3532 }
 0x4a8   : > { %v3394_v7 = vmax.f32 %v3354_v11, 0.0  ;;  %3650 = vmatpush.bf16.msrb.mxu1 %v3466_v41  ;;  %4307 = vmatpush.bf16.msrb.mxu3 %v3466_v41 }
 0x4aa   : > { %3442 = vxpose.xlu2.b32.cont [11/16] (narrow) %v3394_v7, 32  ;;  %v4370_v7 = vld [vmem:[%s4691_s16] sm:$0xff] }
 0x4ab   : > { %v3266_v52 = vpop.f32.mrf.mxu3  ;;  %v3185_v35 = vpop.f32.mrf.mxu2 }
 0x4ac   : > { %v3267_v1 = vadd.f32 %v3266_v52, %v3178_v2  ;;  %3651 = vmatpush.bf16.msrb.mxu1 %v3464_v20  ;;  %4308 = vmatpush.bf16.msrb.mxu3 %v3464_v20  ;;  %v3186_v8 = vadd.f32 %v5841_v4, %v3185_v35 }
 0x4ae   : > { %v3356_v44 = vadd.f32 %v3355_v48, %v3267_v1  ;;  %v6033_v12 = vpop.permute.xlu0 %3537 }
 0x4af   : > { %4064 = vmatmul.msk.bf16.vlgmr.msrb.gmra.mxu1 %vm2662_vm10, %v5988_v37  ;;  %4071 = vmatmul.msk.bf16.vlgmr.msrb.gmra.mxu3 %vm2662_vm10, %v5993_v32 }
 0x4b0   : > { %v3395_v26 = vmax.f32 %v3356_v44, 0.0  ;;  %v4371_v44 = vld [vmem:[%s4691_s16 + $0xe0] sm:$0xff] }
 0x4b2   : > { %3443 = vxpose.xlu2.b32.cont [12/16] (narrow) %v3395_v26, 32 }
 0x4b3   : > { %v3269_v57 = vpop.f32.mrf.mxu3  ;;  %v3187_v9 = vpop.f32.mrf.mxu2 }
 0x4b4   : > { %v3270_v3 = vadd.f32 %v3269_v57, %v3181_v6  ;;  %v3188_v54 = vadd.f32 %v5841_v4, %v3187_v9  ;;  %v6027_v4 = vld [vmem:[%s6226_s5 + $0x18] sm:$0xff] }
 0x4b6   : > { %v3359_v50 = vadd.f32 %v3358_v43, %v3270_v3  ;;  %v6042_v55 = vpop.permute.xlu0 %3542  ;;  %v4372_v43 = vld [vmem:[%s4691_s16 + $0x10] sm:$0xff] }
 0x4b8   : > { %v3396_v24 = vmax.f32 %v3359_v50, 0.0 }
 0x4ba   : > { %3444 = vxpose.xlu2.b32.cont [13/16] (narrow) %v3396_v24, 32 }
 0x4bb   : > { %v3271_v0 = vpop.f32.mrf.mxu3  ;;  %v3363_v45 = vpop.f32.mrf.mxu2 }
 0x4bc   : > { %v3272_v49 = vadd.f32 %v3271_v0, %v3183_v47  ;;  %v4373_v0 = vld [vmem:[%s4691_s16 + $0xf0] sm:$0xff] }
 0x4be   : > { %v3361_v58 = vadd.f32 %v3360_v51, %v3272_v49  ;;  %v6049_v21 = vpop.permute.xlu0 %3547 }
 0x4bf   : > { %4065 = vmatmul.msk.bf16.gmra.mxu1 %vm2662_vm10, %v4107_v33 }
 0x4c0   : > { %v3397_v63 = vmax.f32 %v3361_v58, 0.0  ;;  %v4374_v58 = vld [vmem:[%s4691_s16 + $0x20] sm:$0xff] }
 0x4c2   : > { %3445 = vxpose.xlu2.b32.cont [14/16] (narrow) %v3397_v63, 32 }
 0x4c3   : > { %v3274_v46 = vpop.f32.mrf.mxu3  ;;  %v3365_v34 = vpop.f32.mrf.mxu2 }
 0x4c4   : > { %v3275_v29 = vadd.f32 %v3274_v46, %v3186_v8 }
 0x4c6   : > { %v3364_v56 = vadd.f32 %v3363_v45, %v3275_v29  ;;  %v6053_v27 = vpop.permute.xlu0 %3552  ;;  %v4375_v29 = vld [vmem:[%s4691_s16 + $0x30] sm:$0xff] }
 0x4c8   : > { %v3398_v40 = vmax.f32 %v3364_v56, 0.0 }
 0x4ca   : > { %3446 = vxpose.xlu2.b32.cont [15/16] (narrow) %v3398_v40, 32 }
 0x4cb   : > { %v3276_v25 = vpop.f32.mrf.mxu3 }
 0x4cc   : > { %v3277_v19 = vadd.f32 %v3276_v25, %v3188_v54  ;;  %v4376_v25 = vld [vmem:[%s4691_s16 + $0x40] sm:$0xff] }
 0x4ce   : > { %v3366_v17 = vadd.f32 %v3365_v34, %v3277_v19  ;;  %v6062_v14 = vpop.permute.xlu0 %3557 }
 0x4cf   : > { %4066 = vmatmul.msk.bf16.gmra.mxu1 %vm2662_vm10, %v6016_v16 }
 0x4d0   : > { %v3399_v23 = vmax.f32 %v3366_v17, 0.0 }
 0x4d2   : > { %3447 = vxpose.xlu2.b32.end [16/16] (narrow) %v3399_v23, 32 }
 0x4d6   : > { %v6064_v30 = vpop.permute.xlu0 %3562 }
 0x4de   : > { %v6068_v28 = vpop.permute.xlu0 %3567 }
 0x4df   : > { %4067 = vmatmul.msk.bf16.gmra.mxu1 %vm2662_vm10, %v6027_v4 }
 0x4e6   : > { %v6073_v2 = vpop.permute.xlu0 %3572 }
 0x4ee   : > { %v6085_v50 = vpop.permute.xlu0 %3577 }
 0x4ef   : > { %4068 = vmatmul.msk.bf16.gmra.mxu1 %vm2662_vm10, %v6038_v42 }
 0x4f3   : > { %v3448_v62 = vpop.trf.xlu2 }
 0x4fb   : > { %v3449_v13 = vpop.trf.xlu2 }
 0x4fc   : > { %v3465_v31 = vpack.c.bf16 %v3449_v13, %v3448_v62  ;;  %v4377_v62 = vld [vmem:[%s4691_s16 + $0x50] sm:$0xff] }
 0x4ff   : > { %4069 = vmatmul.msk.bf16.gmra.mxu1 %vm2662_vm10, %v6047_v5 }
 0x503   : > { %v3450_v39 = vpop.trf.xlu2 }
 0x50b   : > { %v3451_v53 = vpop.trf.xlu2 }
 0x50c   : > { %v3467_v22 = vpack.c.bf16 %v3451_v53, %v3450_v39 }
 0x50e   : > { %3699 = vmatpush.bf16.msra.mxu1 %v3467_v22 }
 0x50f   : > { %4070 = vmatmul.msk.bf16.gmra.mxu1 %vm2662_vm10, %v6058_v59 }
 0x512   : > { %3700 = vmatpush.bf16.msra.mxu1 %v3465_v31  ;;  %v4378_v31 = vld [vmem:[%s4691_s16 + $0x60] sm:$0xff] }
 0x51f   : > { %4072 = vmatmul.msk.bf16.vlgmr.msra.gmra.mxu1 %vm2662_vm10, %v5988_v37 }
 0x52c   : > { %v3653_v11 = vpop.f32.mrf.mxu1 }
 0x52d   : > { %v3654_v41 = vadd.f32 %v3653_v11, %v5982_v61 }
 0x52f   : > { %v3742_v48 = vadd.f32 %v4370_v7, %v3654_v41  ;;  %4073 = vmatmul.msk.bf16.gmra.mxu1 %vm2662_vm10, %v4107_v33 }
 0x531   : > { %v3774_v20 = vmax.f32 %v3742_v48, 0.0  ;;  %v4379_v48 = vld [vmem:[%s4691_s16 + $0x70] sm:$0xff] }
 0x532   : > { %v3688_v52 = vpop.f32.mrf.mxu3 }
 0x533   : > { %3806 = vst [vmem:[%s6077_s11] sm:$0xff] %v3774_v20  ;;  %v3689_v37 = vadd.f32 %v3688_v52, %v6073_v2 }
 0x534   : > { %v3655_v1 = vpop.f32.mrf.mxu1 }
 0x535   : > { %v3770_v35 = vadd.f32 %v4371_v44, %v3689_v37  ;;  %v3656_v26 = vadd.f32 %v3655_v1, %v5995_v18  ;;  %v4380_v44 = vld [vmem:[%s4691_s16 + $0x80] sm:$0xff] }
 0x537   : > { %v3802_v6 = vmax.f32 %v3770_v35, 0.0  ;;  %v3744_v57 = vadd.f32 %v4372_v43, %v3656_v26  ;;  %v4381_v43 = vld [vmem:[%s4691_s16 + $0x90] sm:$0xff] }
 0x539   : > { %3834 = vst [vmem:[%s6077_s11 + $0xe0] sm:$0xff] %v3802_v6  ;;  %v3776_v3 = vmax.f32 %v3744_v57, 0.0 }
 0x53a   : > { %v3690_v24 = vpop.f32.mrf.mxu3 }
 0x53b   : > { %3808 = vst [vmem:[%s6077_s11 + $0x10] sm:$0xff] %v3776_v3  ;;  %v3691_v9 = vadd.f32 %v3690_v24, %v6085_v50 }
 0x53c   : > { %v3658_v47 = vpop.f32.mrf.mxu1 }
 0x53d   : > { %v3772_v33 = vadd.f32 %v4373_v0, %v3691_v9  ;;  %v3659_v49 = vadd.f32 %v3658_v47, %v6002_v38  ;;  %v4382_v47 = vld [vmem:[%s4691_s16 + $0xa0] sm:$0xff] }
 0x53f   : > { %v3804_v51 = vmax.f32 %v3772_v33, 0.0  ;;  %v3746_v63 = vadd.f32 %v4374_v58, %v3659_v49  ;;  %4074 = vmatmul.msk.bf16.gmra.mxu1 %vm2662_vm10, %v6016_v16 }
 0x541   : > { %3836 = vst [vmem:[%s6077_s11 + $0xf0] sm:$0xff] %v3804_v51  ;;  %v3778_v45 = vmax.f32 %v3746_v63, 0.0  ;;  %v4383_v51 = vld [vmem:[%s4691_s16 + $0xb0] sm:$0xff] }
 0x543   : > { %3810 = vst [vmem:[%s6077_s11 + $0x20] sm:$0xff] %v3778_v45 }
 0x544   : > { %v3660_v8 = vpop.f32.mrf.mxu1 }
 0x545   : > { %v3661_v46 = vadd.f32 %v3660_v8, %v6009_v36 }
 0x547   : > { %v3748_v56 = vadd.f32 %v4375_v29, %v3661_v46  ;;  %v4384_v46 = vld [vmem:[%s4691_s16 + $0xc0] sm:$0xff] }
 0x549   : > { %v3780_v40 = vmax.f32 %v3748_v56, 0.0 }
 0x54b   : > { %3812 = vst [vmem:[%s6077_s11 + $0x30] sm:$0xff] %v3780_v40 }
 0x54c   : > { %v3663_v54 = vpop.f32.mrf.mxu1 }
 0x54d   : > { %v3664_v34 = vadd.f32 %v3663_v54, %v6018_v10  ;;  %v4385_v54 = vld [vmem:[%s4691_s16 + $0xd0] sm:$0xff] }
 0x54f   : > { %v3750_v19 = vadd.f32 %v4376_v25, %v3664_v34  ;;  %4075 = vmatmul.msk.bf16.gmra.mxu1 %vm2662_vm10, %v6027_v4 }
 0x551   : > { %v3782_v16 = vmax.f32 %v3750_v19, 0.0 }
 0x553   : > { %3814 = vst [vmem:[%s6077_s11 + $0x40] sm:$0xff] %v3782_v16 }
 0x554   : > { %v3665_v17 = vpop.f32.mrf.mxu1 }
 0x555   : > { %v3666_v23 = vadd.f32 %v3665_v17, %v6022_v60  ;;  %v4386_v17 = vld [vmem:[%s4691_s16 + $0x8] sm:$0xff] }
 0x557   : > { %v3752_v13 = vadd.f32 %v4377_v62, %v3666_v23 }
 0x559   : > { %v3784_v39 = vmax.f32 %v3752_v13, 0.0 }
 0x55b   : > { %3816 = vst [vmem:[%s6077_s11 + $0x50] sm:$0xff] %v3784_v39  ;;  %v4387_v39 = vld [vmem:[%s4691_s16 + $0x18] sm:$0xff] }
 0x55c   : > { %v3668_v53 = vpop.f32.mrf.mxu1 }
 0x55d   : > { %v3669_v22 = vadd.f32 %v3668_v53, %v6031_v15 }
 0x55f   : > { %v3754_v11 = vadd.f32 %v4378_v31, %v3669_v22  ;;  %4076 = vmatmul.msk.bf16.gmra.mxu1 %vm2662_vm10, %v6038_v42 }
 0x561   : > { %v3786_v4 = vmax.f32 %v3754_v11, 0.0 }
 0x563   : > { %3818 = vst [vmem:[%s6077_s11 + $0x60] sm:$0xff] %v3786_v4 }
 0x564   : > { %v3670_v41 = vpop.f32.mrf.mxu1 }
 0x565   : > { %v3671_v7 = vadd.f32 %v3670_v41, %v6033_v12 }
 0x567   : > { %v3756_v20 = vadd.f32 %v4379_v48, %v3671_v7 }
 0x569   : > { %v3788_v52 = vmax.f32 %v3756_v20, 0.0 }
 0x56b   : > { %3820 = vst [vmem:[%s6077_s11 + $0x70] sm:$0xff] %v3788_v52 }
 0x56c   : > { %v3673_v37 = vpop.f32.mrf.mxu1 }
 0x56d   : > { %v3674_v1 = vadd.f32 %v3673_v37, %v6042_v55 }
 0x56f   : > { %v3758_v35 = vadd.f32 %v4380_v44, %v3674_v1  ;;  %4077 = vmatmul.msk.bf16.gmra.mxu1 %vm2662_vm10, %v6047_v5 }
 0x571   : > { %v3790_v42 = vmax.f32 %v3758_v35, 0.0 }
 0x573   : > { %3822 = vst [vmem:[%s6077_s11 + $0x80] sm:$0xff] %v3790_v42 }
 0x574   : > { %v3675_v26 = vpop.f32.mrf.mxu1 }
 0x575   : > { %v3676_v6 = vadd.f32 %v3675_v26, %v6049_v21 }
 0x577   : > { %v3760_v57 = vadd.f32 %v4381_v43, %v3676_v6 }
 0x579   : > { %v3792_v3 = vmax.f32 %v3760_v57, 0.0 }
 0x57b   : > { %3824 = vst [vmem:[%s6077_s11 + $0x90] sm:$0xff] %v3792_v3 }
 0x57c   : > { %v3678_v24 = vpop.f32.mrf.mxu1 }
 0x57d   : > { %v3679_v9 = vadd.f32 %v3678_v24, %v6053_v27 }
 0x57f   : > { %v3762_v0 = vadd.f32 %v4382_v47, %v3679_v9  ;;  %4078 = vmatmul.msk.bf16.gmra.mxu1 %vm2662_vm10, %v6058_v59 }
 0x581   : > { %v3794_v5 = vmax.f32 %v3762_v0, 0.0 }
 0x583   : > { %3826 = vst [vmem:[%s6077_s11 + $0xa0] sm:$0xff] %v3794_v5 }
 0x584   : > { %v3680_v33 = vpop.f32.mrf.mxu1 }
 0x585   : > { %v3681_v49 = vadd.f32 %v3680_v33, %v6062_v14 }
 0x587   : > { %v3764_v58 = vadd.f32 %v4383_v51, %v3681_v49 }
 0x589   : > { %v3796_v63 = vmax.f32 %v3764_v58, 0.0 }
 0x58b   : > { %3828 = vst [vmem:[%s6077_s11 + $0xb0] sm:$0xff] %v3796_v63 }
 0x58c   : > { %v3683_v45 = vpop.f32.mrf.mxu1 }
 0x58d   : > { %v3684_v8 = vadd.f32 %v3683_v45, %v6064_v30 }
 0x58f   : > { %v3766_v29 = vadd.f32 %v4384_v46, %v3684_v8  ;;  %4079 = vmatmul.msk.bf16.gmra.mxu1 %vm2662_vm10, %v5993_v32 }
 0x591   : > { %v3798_v59 = vmax.f32 %v3766_v29, 0.0 }
 0x593   : > { %3830 = vst [vmem:[%s6077_s11 + $0xc0] sm:$0xff] %v3798_v59 }
 0x594   : > { %v3685_v56 = vpop.f32.mrf.mxu1 }
 0x595   : > { %v3686_v40 = vadd.f32 %v3685_v56, %v6068_v28 }
 0x597   : > { %v3768_v34 = vadd.f32 %v4385_v54, %v3686_v40 }
 0x599   : > { %v3800_v25 = vmax.f32 %v3768_v34, 0.0 }
 0x59b   : > { %3832 = vst [vmem:[%s6077_s11 + $0xd0] sm:$0xff] %v3800_v25 }
 0x59c   : > { %v3702_v19 = vpop.f32.mrf.mxu1 }
 0x59d   : > { %v3703_v16 = vadd.f32 %v3702_v19, %v5982_v61  ;;  %v4388_v61 = vld [vmem:[%s4691_s16 + $0x28] sm:$0xff] }
 0x59f   : > { %v3743_v23 = vadd.f32 %v4386_v17, %v3703_v16 }
 0x5a1   : > { %v3775_v62 = vmax.f32 %v3743_v23, 0.0 }
 0x5a3   : > { %3807 = vst [vmem:[%s6077_s11 + $0x8] sm:$0xff] %v3775_v62 }
 0x5a4   : > { %v3704_v32 = vpop.f32.mrf.mxu1 }
 0x5a5   : > { %v3705_v13 = vadd.f32 %v3704_v32, %v5995_v18  ;;  %v4389_v18 = vld [vmem:[%s4691_s16 + $0x38] sm:$0xff] }
 0x5a7   : > { %v3745_v53 = vadd.f32 %v4387_v39, %v3705_v13 }
 0x5a9   : > { %v3777_v22 = vmax.f32 %v3745_v53, 0.0 }
 0x5ab   : > { %3809 = vst [vmem:[%s6077_s11 + $0x18] sm:$0xff] %v3777_v22 }
 0x5ac   : > { %v3707_v31 = vpop.f32.mrf.mxu1 }
 0x5ad   : > { %v3708_v11 = vadd.f32 %v3707_v31, %v6002_v38  ;;  %v4390_v38 = vld [vmem:[%s4691_s16 + $0x48] sm:$0xff] }
 0x5af   : > { %v3747_v4 = vadd.f32 %v4388_v61, %v3708_v11  ;;  %v4400_v61 = vld [vmem:[%s4691_s16 + $0xe8] sm:$0xff] }
 0x5b1   : > { %v3779_v41 = vmax.f32 %v3747_v4, 0.0 }
 0x5b3   : > { %3811 = vst [vmem:[%s6077_s11 + $0x28] sm:$0xff] %v3779_v41 }
 0x5b4   : > { %v3709_v7 = vpop.f32.mrf.mxu1 }
 0x5b5   : > { %v3710_v48 = vadd.f32 %v3709_v7, %v6009_v36  ;;  %v4391_v36 = vld [vmem:[%s4691_s16 + $0x58] sm:$0xff] }
 0x5b6   : > { %v4401_v7 = vld [vmem:[%s4691_s16 + $0xf8] sm:$0xff] }
 0x5b7   : > { %v3749_v20 = vadd.f32 %v4389_v18, %v3710_v48 }
 0x5b9   : > { %v3781_v52 = vmax.f32 %v3749_v20, 0.0 }
 0x5bb   : > { %3813 = vst [vmem:[%s6077_s11 + $0x38] sm:$0xff] %v3781_v52 }
 0x5bc   : > { %v3712_v37 = vpop.f32.mrf.mxu1 }
 0x5bd   : > { %v3713_v1 = vadd.f32 %v3712_v37, %v6018_v10  ;;  %v4392_v10 = vld [vmem:[%s4691_s16 + $0x68] sm:$0xff] }
 0x5bf   : > { %v3751_v44 = vadd.f32 %v4390_v38, %v3713_v1 }
 0x5c1   : > { %v3783_v35 = vmax.f32 %v3751_v44, 0.0 }
 0x5c3   : > { %3815 = vst [vmem:[%s6077_s11 + $0x48] sm:$0xff] %v3783_v35 }
 0x5c4   : > { %v3714_v42 = vpop.f32.mrf.mxu1 }
 0x5c5   : > { %v3715_v26 = vadd.f32 %v3714_v42, %v6022_v60  ;;  %v4393_v60 = vld [vmem:[%s4691_s16 + $0x78] sm:$0xff] }
 0x5c7   : > { %v3753_v6 = vadd.f32 %v4391_v36, %v3715_v26 }
 0x5c9   : > { %v3785_v43 = vmax.f32 %v3753_v6, 0.0 }
 0x5cb   : > { %3817 = vst [vmem:[%s6077_s11 + $0x58] sm:$0xff] %v3785_v43 }
 0x5cc   : > { %v3717_v57 = vpop.f32.mrf.mxu1 }
 0x5cd   : > { %v3718_v3 = vadd.f32 %v3717_v57, %v6031_v15  ;;  %v4394_v15 = vld [vmem:[%s4691_s16 + $0x88] sm:$0xff] }
 0x5cf   : > { %v3755_v24 = vadd.f32 %v4392_v10, %v3718_v3 }
 0x5d1   : > { %v3787_v9 = vmax.f32 %v3755_v24, 0.0 }
 0x5d3   : > { %3819 = vst [vmem:[%s6077_s11 + $0x68] sm:$0xff] %v3787_v9 }
 0x5d4   : > { %v3719_v47 = vpop.f32.mrf.mxu1 }
 0x5d5   : > { %v3720_v0 = vadd.f32 %v3719_v47, %v6033_v12  ;;  %v4395_v12 = vld [vmem:[%s4691_s16 + $0x98] sm:$0xff] }
 0x5d7   : > { %v3757_v5 = vadd.f32 %v4393_v60, %v3720_v0 }
 0x5d9   : > { %v3789_v33 = vmax.f32 %v3757_v5, 0.0 }
 0x5db   : > { %3821 = vst [vmem:[%s6077_s11 + $0x78] sm:$0xff] %v3789_v33 }
 0x5dc   : > { %v3722_v49 = vpop.f32.mrf.mxu1 }
 0x5dd   : > { %v3723_v51 = vadd.f32 %v3722_v49, %v6042_v55  ;;  %v4396_v55 = vld [vmem:[%s4691_s16 + $0xa8] sm:$0xff] }
 0x5df   : > { %v3759_v58 = vadd.f32 %v4394_v15, %v3723_v51 }
 0x5e1   : > { %v3791_v63 = vmax.f32 %v3759_v58, 0.0 }
 0x5e3   : > { %3823 = vst [vmem:[%s6077_s11 + $0x88] sm:$0xff] %v3791_v63 }
 0x5e4   : > { %v3724_v45 = vpop.f32.mrf.mxu1 }
 0x5e5   : > { %v3725_v8 = vadd.f32 %v3724_v45, %v6049_v21  ;;  %v4397_v21 = vld [vmem:[%s4691_s16 + $0xb8] sm:$0xff] }
 0x5e7   : > { %v3761_v46 = vadd.f32 %v4395_v12, %v3725_v8 }
 0x5e9   : > { %v3793_v29 = vmax.f32 %v3761_v46, 0.0 }
 0x5eb   : > { %3825 = vst [vmem:[%s6077_s11 + $0x98] sm:$0xff] %v3793_v29 }
 0x5ec   : > { %v3727_v59 = vpop.f32.mrf.mxu1 }
 0x5ed   : > { %v3728_v56 = vadd.f32 %v3727_v59, %v6053_v27  ;;  %v4398_v27 = vld [vmem:[%s4691_s16 + $0xc8] sm:$0xff] }
 0x5ef   : > { %v3763_v40 = vadd.f32 %v4396_v55, %v3728_v56 }
 0x5f1   : > { %v3795_v54 = vmax.f32 %v3763_v40, 0.0 }
 0x5f3   : > { %3827 = vst [vmem:[%s6077_s11 + $0xa8] sm:$0xff] %v3795_v54 }
 0x5f4   : > { %v3729_v34 = vpop.f32.mrf.mxu1 }
 0x5f5   : > { %v3730_v25 = vadd.f32 %v3729_v34, %v6062_v14  ;;  %v4399_v14 = vld [vmem:[%s4691_s16 + $0xd8] sm:$0xff] }
 0x5f7   : > { %v3765_v19 = vadd.f32 %v4397_v21, %v3730_v25 }
 0x5f9   : > { %v3797_v16 = vmax.f32 %v3765_v19, 0.0 }
 0x5fb   : > { %3829 = vst [vmem:[%s6077_s11 + $0xb8] sm:$0xff] %v3797_v16 }
 0x5fc   : > { %v3732_v17 = vpop.f32.mrf.mxu1 }
 0x5fd   : > { %v3733_v23 = vadd.f32 %v3732_v17, %v6064_v30 }
 0x5ff   : > { %v3767_v62 = vadd.f32 %v4398_v27, %v3733_v23 }
 0x601   : > { %v3799_v32 = vmax.f32 %v3767_v62, 0.0 }
 0x603   : > { %3831 = vst [vmem:[%s6077_s11 + $0xc8] sm:$0xff] %v3799_v32 }
 0x604   : > { %v3734_v13 = vpop.f32.mrf.mxu1 }
 0x605   : > { %v3735_v39 = vadd.f32 %v3734_v13, %v6068_v28 }
 0x607   : > { %v3769_v53 = vadd.f32 %v4399_v14, %v3735_v39 }
 0x609   : > { %v3801_v22 = vmax.f32 %v3769_v53, 0.0 }
 0x60b   : > { %3833 = vst [vmem:[%s6077_s11 + $0xd8] sm:$0xff] %v3801_v22 }
 0x60c   : > { %v3737_v31 = vpop.f32.mrf.mxu1 }
 0x60d   : > { %v3738_v11 = vadd.f32 %v3737_v31, %v6073_v2 }
 0x60f   : > { %v3771_v30 = vadd.f32 %v4400_v61, %v3738_v11 }
 0x611   : > { %v3803_v4 = vmax.f32 %v3771_v30, 0.0 }
 0x613   : > { %3835 = vst [vmem:[%s6077_s11 + $0xe8] sm:$0xff] %v3803_v4 }
 0x614   : > { %v3739_v28 = vpop.f32.mrf.mxu1 }
 0x615   : > { %v3740_v41 = vadd.f32 %v3739_v28, %v6085_v50 }
 0x617   : > { %v3773_v48 = vadd.f32 %v4401_v7, %v3740_v41 }
 0x619   : > { %v3805_v2 = vmax.f32 %v3773_v48, 0.0 }
 0x61b   : > { %3837 = vst [vmem:[%s6077_s11 + $0xf8] sm:$0xff] %v3805_v2 }
 0x61c   : > { %4495 = shalt.err (!%p4492_p4)
}
 0x61d   : > { %s4557_s22 = smov 256   ;;  %s4558_s16 = smov 16  }
 0x61e   : > { %4311 = dma.vmem_to_hbm [thread:$0]  (%p4649_p11), %s3852_s23, 4096, %s3854_s29, %s3839_s21, %s4557_s22, %s4557_s22, %s4558_s16  }
 0x61f PF: > { %s3868_s11 = sand.u32 1, %s4537_s24   ;;  %p6241_p7 = scmp.ge.s32.totalorder %s4549_s27, 2 }
 0x620   : > { %s3869_s20 = scalar_lea.sflag [#allocation5], %s3868_s11 }
 0x621   : > { %p4318_p5 = pnand %p6241_p7, %p4653_p12 }
 0x623   : > { %p4319_p8 = pneg %p4318_p5 }
 0x625   : > { %4517 = dma.done.wait (%p4319_p8), %s3869_s20, 4096  }
 0x626   : > { %4519 = vsyncadd (%p4319_p8), %s3869_s20, 4294963200  ;;  %s6242_s12 = sld [smem:[#allocation9_spill]]  ;;  %p20_p10 = scmp.ge.s32.totalorder %s4624_s30, 4  }
 0x627   : > { %s6243_s24 = smov %s4541_s25  ;;  %s6244_s25 = smov %s4545_s26 }
 0x628   : > { %s6246_s27 = smov %s4624_s30  ;;  %22 = sbr.rel (!%p20_p10) target bundleno = 5 (0x5), region = 95 }
 0x62c   : > { %s6245_s26 = smov %s6242_s12 }
 0x62d   :  { %3875 = vsyncpa [#allocation4], 1 }
 0x62e   :  { %3877 = vsyncpa [#allocation4 + $0x1], 1 }
 0x62f   :  { %3878 = vsyncpa [#allocation5], 1 }
 0x630   :  { %3880 = vsyncpa [#allocation5 + $0x1], 1 }

</bundles_post_ra>
